<compile_context>
chip_gen: v5e
topology: v5e:2x2
jax: 0.10.0
libtpu: 0.0.40
codegen_flags: <defaults>
</compile_context>

<pallas_src>
import functools

import numpy as np
import jax
import jax.numpy as jnp
from jax.experimental import pallas as pl
from jax.experimental.pallas import tpu as pltpu


# ---------------------------------------------------------------------------
# Fused _AFFM kernel: one grid step == `block_b` batch elements.
# ---------------------------------------------------------------------------
def _affm_kernel(
    f1_ref, f2_ref, hf_ref, masks_ref,
    # FSFB_CH (channel attention) weights, row-vector orientation (din, dout)
    caw1, cab1, caw2, cab2, caw3, cab3, caw4, cab4, caw5, cab5,
    # FSFB_SP conv weights (5, 8, 72) padded im2col + folded BN scale/shift
    spw_ref, sps_ref, spt_ref,
    # _CARM weights (block-diag / stacked, row-vector orientation)
    cw1, cb1, cw2, cb2,
    # outputs
    out_ref, ca_ref, sa_ref,
    *, H, W, num):
  HW = H * W
  Bblk, C, _ = f1_ref.shape
  CP = 8                                              # conv channels padded to one sublane tile

  feat = f1_ref[...] + f2_ref[...]                    # (Bblk, C, HW)

  # ---------------- pooled statistics ----------------
  ch_avg = jnp.mean(feat, axis=2)                     # (Bblk, C)   AdaptiveAvgPool2d(1)
  ch_max = jnp.max(feat, axis=2)                      # (Bblk, C)   AdaptiveMaxPool2d(1)
  sp_avg = jnp.mean(feat, axis=1, keepdims=True)      # (Bblk, 1, HW) mean over channels
  sp_max = jnp.max(feat, axis=1, keepdims=True)       # (Bblk, 1, HW) max over channels

  # ---------------- FSFB_CH: channel-attention MLP (batched, lane-dense) ----
  def mlp(x, w_ref, b_ref):
    return jnp.dot(x, w_ref[...], preferred_element_type=jnp.float32) + b_ref[...]

  v = jnp.concatenate([ch_avg, ch_max], axis=1)       # (Bblk, 2C)
  h = jnp.maximum(mlp(v, caw1, cab1), 0.0)            # block-diag(fc1_1, fc2_1) + ReLU
  h = mlp(h, caw2, cab2)                              # fc1_2 + fc2_2  (= avg_out + max_out)
  h = jnp.maximum(mlp(h, caw3, cab3), 0.0)            # fc3 + ReLU
  h = jnp.maximum(mlp(h, caw4, cab4), 0.0)            # fc4 + ReLU
  o = jnp.maximum(mlp(h, caw5, cab5), 0.0)            # fc5 + ReLU, cols = [n=0 | n=1]
  o0 = o[:, 0:C]
  o1 = o[:, C:2 * C]
  mx = jnp.maximum(o0, o1)                            # pairwise softmax (num=2)
  e0 = jnp.exp(o0 - mx)
  e1 = jnp.exp(o1 - mx)
  den = e0 + e1
  ca0 = e0 / den                                      # (Bblk, C)
  ca1 = e1 / den
  ca_ref[...] = jnp.concatenate([ca0, ca1], axis=1)[:, None, :]   # (Bblk, 1, num*C) lane-dense

  # ---------------- FSFB_SP: 3x3 conv stack (padded, aligned im2col) --------
  masks = masks_ref[...]                              # (9, HW) precomputed boundary masks
  w_sp = [spw_ref[l] for l in range(5)]               # each (CP, 9*CP)
  s_sp = [sps_ref[l] for l in range(4)]               # each (CP, 1) folded BN scale
  t_sp = [spt_ref[l] for l in range(4)]               # each (CP, 1) folded BN shift
  zpad = jnp.zeros((CP - 2, HW), jnp.float32)

  def conv3x3(h2, w):
    # padding=1 conv as ONE 8-sublane-aligned im2col MXU matmul:
    #   (CP, 9*CP) @ (9*CP, HW); taps come from XLU lane rotations + masks.
    taps = []
    for t in range(9):
      dy, dx = t // 3 - 1, t % 3 - 1
      s = (-(dy * W + dx)) % HW
      r = h2 if s == 0 else pltpu.roll(h2, s, axis=1)
      taps.append(r * masks[t:t + 1, :])
    xcol = jnp.concatenate(taps, axis=0)              # (9*CP, HW), 8-aligned chunks
    return jnp.dot(w, xcol, preferred_element_type=jnp.float32)

  sa_list = []
  for b in range(Bblk):                               # static unroll over the batch block
    h2 = jnp.concatenate([sp_avg[b], sp_max[b], zpad], axis=0)    # (CP, HW): [mean; max; 0...]
    for l in range(4):
      h2 = jnp.maximum(conv3x3(h2, w_sp[l]) * s_sp[l] + t_sp[l], 0.0)
    logits = conv3x3(h2, w_sp[4])[0:num, :]           # (num, HW), no BN/ReLU
    lm = jnp.max(logits, axis=0, keepdims=True)
    le = jnp.exp(logits - lm)
    sa_list.append(le / jnp.sum(le, axis=0, keepdims=True))       # softmax over num
  sa = jnp.stack(sa_list, axis=0)                     # (Bblk, num, HW)
  sa_ref[...] = sa                                    # lane-dense spatial attention output

  # ---------------- attention-weighted fusion + _CARM -----------------------
  y = (f1_ref[...] * (ca0[:, :, None] + sa[:, 0:1, :])
       + f2_ref[...] * (ca1[:, :, None] + sa[:, 1:2, :])
       + hf_ref[...])                                 # (Bblk, C, HW)
  c_avg = jnp.mean(y, axis=2)                         # (Bblk, C)
  c_max = jnp.max(y, axis=2)
  vc = jnp.concatenate([c_avg, c_max], axis=1)        # (Bblk, 2C)
  hc = jnp.maximum(mlp(vc, cw1, cb1), 0.0)            # block-diag(fc1_1, fc2_1)
  g = mlp(hc, cw2, cb2)                               # avg_out + max_out, (Bblk, C)
  gate = pl.reciprocal(1.0 + jnp.exp(-g), approx=True)            # sigmoid via EUP rcp
  out_ref[...] = gate[:, :, None] * y


# ---------------------------------------------------------------------------
# Wrapper: single fused pallas_call over the batch (block_b elements per step).
# ---------------------------------------------------------------------------
_WEIGHT_NAMES = (
    "ca_w1", "ca_b1", "ca_w2", "ca_b2", "ca_w3", "ca_b3",
    "ca_w4", "ca_b4", "ca_w5", "ca_b5",
    "sp_w", "sp_scale", "sp_shift",
    "carm_w1", "carm_b1", "carm_w2", "carm_b2",
)


def _boundary_masks(H, W):
  """(9, H*W) f32 validity masks for the 9 taps of a padding=1 3x3 conv."""
  HW = H * W
  yy, xx = np.divmod(np.arange(HW), W)
  m = np.zeros((9, HW), np.float32)
  for t in range(9):
    dy, dx = t // 3 - 1, t % 3 - 1
    valid = (yy + dy >= 0) & (yy + dy < H) & (xx + dx >= 0) & (xx + dx < W)
    m[t] = valid.astype(np.float32)
  return jnp.asarray(m)


def _const_spec(w):
  nd = w.ndim
  return pl.BlockSpec(w.shape, lambda b: (0,) * nd)


def affm_forward(feat1, feat2, hffm, params, num=2, block_b=2):
  assert num == 2, "_AFFM uses num=2"
  B, C, H, W = feat1.shape
  HW = H * W
  block_b = min(block_b, B)
  assert B % block_b == 0, "batch must be divisible by block_b"

  f1 = feat1.reshape(B, C, HW).astype(jnp.float32)
  f2 = feat2.reshape(B, C, HW).astype(jnp.float32)
  hf = hffm.reshape(B, C, HW).astype(jnp.float32)
  masks = _boundary_masks(H, W)
  weights = tuple(params[n] for n in _WEIGHT_NAMES)

  feat_spec = pl.BlockSpec((block_b, C, HW), lambda b: (b, 0, 0))
  out, ca, sa = pl.pallas_call(
      functools.partial(_affm_kernel, H=H, W=W, num=num),
      out_shape=(
          jax.ShapeDtypeStruct((B, C, HW), jnp.float32),        # fused + CARM output
          jax.ShapeDtypeStruct((B, 1, num * C), jnp.float32),   # channel attention (lane-dense)
          jax.ShapeDtypeStruct((B, num, HW), jnp.float32),      # spatial attention
      ),
      grid=(B // block_b,),
      in_specs=[feat_spec, feat_spec, feat_spec, _const_spec(masks)]
               + [_const_spec(w) for w in weights],
      out_specs=(
          pl.BlockSpec((block_b, C, HW), lambda b: (b, 0, 0)),
          pl.BlockSpec((block_b, 1, num * C), lambda b: (b, 0, 0)),
          pl.BlockSpec((block_b, num, HW), lambda b: (b, 0, 0)),
      ),
      compiler_params=pltpu.CompilerParams(dimension_semantics=("parallel",)),
  )(f1, f2, hf, masks, *weights)

  output = out.reshape(B, C, H, W)
  ca = ca.reshape(B, num, C)
  channel_atten = tuple(ca[:, n, :].reshape(B, C, 1, 1) for n in range(num))
  spatial_atten = tuple(sa[:, n, :].reshape(B, 1, H, W) for n in range(num))
  return output, channel_atten, spatial_atten


# ---------------------------------------------------------------------------
# Deterministic synthetic parameters.  `raw` mirrors the torch module's
# tensors; `packed` is the merged / padded / permuted layout the kernel eats
# (BN folded into eval-mode scale/shift, avg/max branches merged host-side,
# conv channels zero-padded to 8 for aligned im2col).
# ---------------------------------------------------------------------------
def init_params(key, C, num=2, ratio=8):
  C8 = C // ratio
  eps = 1e-5
  CP = 8
  keys = iter(jax.random.split(key, 64))

  def lin(din, dout):
    w = jax.random.normal(next(keys), (dout, din), jnp.float32) / np.sqrt(din)
    b = 0.05 * jax.random.normal(next(keys), (dout,), jnp.float32)
    return w, b

  raw = {
      "fc1_1": lin(C, C8), "fc1_2": lin(C8, num * C),
      "fc2_1": lin(C, C8), "fc2_2": lin(C8, num * C),
      "fc3": lin(num * C, 2 * num * C),
      "fc4": lin(2 * num * C, 2 * num * C),
      "fc5": lin(2 * num * C, num * C),
      "cfc1_1": lin(C, C8), "cfc1_2": lin(C8, C),
      "cfc2_1": lin(C, C8), "cfc2_2": lin(C8, C),
  }
  chans = [2, 2 * num, 4 * num, 4 * num, 2 * num, num]
  convs, bns = [], []
  for i in range(5):
    cin, cout = chans[i], chans[i + 1]
    convs.append(jax.random.normal(next(keys), (cout, cin, 3, 3), jnp.float32)
                 / np.sqrt(9 * cin))
    if i < 4:
      kg, kb, km = jax.random.split(next(keys), 3)
      bns.append((1.0 + 0.1 * jax.random.normal(kg, (cout,), jnp.float32),
                  0.1 * jax.random.normal(kb, (cout,), jnp.float32),
                  0.1 * jax.random.normal(km, (cout,), jnp.float32),
                  jnp.ones((cout,), jnp.float32)))
  raw["convs"] = convs
  raw["bns"] = bns

  p = {}
  zk = jnp.zeros((C, C8), jnp.float32)

  def block_diag(wb_a, wb_b):          # merged avg/max first-layer Linear
    (wa, ba), (wb, bb) = wb_a, wb_b
    w = jnp.concatenate(
        [jnp.concatenate([wa.T, zk], axis=1),
         jnp.concatenate([zk, wb.T], axis=1)], axis=0)           # (2C, 2*C8)
    return w, jnp.concatenate([ba, bb])[None, :]

  def stack_sum(wb_a, wb_b):           # merged avg/max second-layer Linear
    (wa, ba), (wb, bb) = wb_a, wb_b
    return jnp.concatenate([wa.T, wb.T], axis=0), (ba + bb)[None, :]

  def wt(wb):
    w, b = wb
    return w.T, b[None, :]

  # ---- FSFB_CH ----
  p["ca_w1"], p["ca_b1"] = block_diag(raw["fc1_1"], raw["fc2_1"])
  p["ca_w2"], p["ca_b2"] = stack_sum(raw["fc1_2"], raw["fc2_2"])
  p["ca_w3"], p["ca_b3"] = wt(raw["fc3"])
  p["ca_w4"], p["ca_b4"] = wt(raw["fc4"])
  w5, b5 = raw["fc5"]
  # permute fc5 outputs: torch index c*num + n  ->  kernel column n*C + c
  perm = np.arange(num * C).reshape(C, num).T.reshape(-1)
  p["ca_w5"] = w5.T[:, perm]
  p["ca_b5"] = b5[perm][None, :]

  # ---- FSFB_SP: padded, aligned im2col weights + folded eval-mode BN ----
  spw = np.zeros((5, CP, 9 * CP), np.float32)
  for i, w in enumerate(convs):
    wnp = np.asarray(w)                                # (cout, cin, 3, 3)
    cout, cin = wnp.shape[:2]
    for ky in range(3):
      for kx in range(3):
        t = ky * 3 + kx
        spw[i, :cout, t * CP:t * CP + cin] = wnp[:, :, ky, kx]
  p["sp_w"] = jnp.asarray(spw)
  sscale = np.ones((4, CP, 1), np.float32)
  sshift = np.zeros((4, CP, 1), np.float32)
  for i, (gamma, beta, mean, var) in enumerate(bns):
    s = np.asarray(gamma) / np.sqrt(np.asarray(var) + eps)
    sh = np.asarray(beta) - np.asarray(mean) * s
    cout = s.shape[0]
    sscale[i, :cout, 0] = s
    sshift[i, :cout, 0] = sh
  p["sp_scale"] = jnp.asarray(sscale)
  p["sp_shift"] = jnp.asarray(sshift)

  # ---- _CARM ----
  p["carm_w1"], p["carm_b1"] = block_diag(raw["cfc1_1"], raw["cfc2_1"])
  p["carm_w2"], p["carm_b2"] = stack_sum(raw["cfc1_2"], raw["cfc2_2"])
  return raw, p


# ---------------------------------------------------------------------------
# Pure-JAX reference built from the RAW (torch-layout) parameters: validates
# the block-diag merge, the fc5 permutation, the padded im2col conv and the
# folded BatchNorm used inside the kernel.
# ---------------------------------------------------------------------------
def _reference(feat1, feat2, hffm, raw, num=2):
  B, C, H, W = feat1.shape
  eps = 1e-5

  def linear(x, wb):
    w, b = wb
    return x @ w.T + b

  with jax.default_matmul_precision("highest"):
    feat = feat1 + feat2
    # FSFB_CH
    avg = feat.mean(axis=(2, 3))
    mxp = feat.max(axis=(2, 3))
    a = linear(jax.nn.relu(linear(avg, raw["fc1_1"])), raw["fc1_2"])
    m = linear(jax.nn.relu(linear(mxp, raw["fc2_1"])), raw["fc2_2"])
    out = a + m
    out = jax.nn.relu(linear(out, raw["fc3"]))
    out = jax.nn.relu(linear(out, raw["fc4"]))
    out = jax.nn.relu(linear(out, raw["fc5"]))
    soft = jax.nn.softmax(out.reshape(B, C, 1, num), axis=3)
    ca = tuple(soft[..., n].reshape(B, C, 1, 1) for n in range(num))
    # FSFB_SP
    x = jnp.stack([feat.mean(axis=1), feat.max(axis=1)], axis=1)
    for i in range(5):
      x = jax.lax.conv_general_dilated(
          x, raw["convs"][i], (1, 1), "SAME",
          dimension_numbers=("NCHW", "OIHW", "NCHW"))
      if i < 4:
        gamma, beta, mean, var = raw["bns"][i]
        s = gamma / jnp.sqrt(var + eps)
        t = beta - mean * s
        x = jax.nn.relu(x * s[None, :, None, None] + t[None, :, None, None])
    saw = jax.nn.softmax(x, axis=1)
    sa = tuple(saw[:, n:n + 1] for n in range(num))
    # fuse + _CARM
    y = ca[0] * feat1 + ca[1] * feat2 + sa[0] * feat1 + sa[1] * feat2 + hffm
    avg = y.mean(axis=(2, 3))
    mxp = y.max(axis=(2, 3))
    a = linear(jax.nn.relu(linear(avg, raw["cfc1_1"])), raw["cfc1_2"])
    m = linear(jax.nn.relu(linear(mxp, raw["cfc2_1"])), raw["cfc2_2"])
    gate = jax.nn.sigmoid(a + m).reshape(B, C, 1, 1)
    return gate * y, ca, sa


if __name__ == "__main__":
  key = jax.random.PRNGKey(0)
  B, C, H, W = 4, 32, 16, 16          # in_channels divisible by ratio=8
  num = 2                             # _AFFM uses FSFB_SP(2) / FSFB_CH(C, 2, 8)
  block_b = 2                         # 2 batch elements per grid step -> grid=(2,)

  k1, k2, k3, kp = jax.random.split(key, 4)
  feat1 = jax.random.normal(k1, (B, C, H, W), jnp.float32)
  feat2 = jax.random.normal(k2, (B, C, H, W), jnp.float32)
  hffm = jax.random.normal(k3, (B, C, H, W), jnp.float32)
  raw, params = init_params(kp, C, num=num)

  fwd = jax.jit(functools.partial(affm_forward, num=num, block_b=block_b))
  output, channel_atten, spatial_atten = fwd(feat1, feat2, hffm, params)
  jax.block_until_ready(output)

  assert output.shape == (B, C, H, W)
  assert len(channel_atten) == num and channel_atten[0].shape == (B, C, 1, 1)
  assert len(spatial_atten) == num and spatial_atten[0].shape == (B, 1, H, W)
  # softmax chunks over num=2 must sum to 1 (exact divides kept in-kernel)
  assert np.allclose(np.asarray(channel_atten[0] + channel_atten[1]), 1.0, atol=1e-4)
  assert np.allclose(np.asarray(spatial_atten[0] + spatial_atten[1]), 1.0, atol=1e-4)

  # structural cross-check against the pure-JAX reference (loose tolerance:
  # MXU vs XLA matmul/conv precision may differ slightly; structure errors are O(1))
  ref_out, ref_ca, ref_sa = _reference(feat1, feat2, hffm, raw, num=num)
  assert float(jnp.max(jnp.abs(output - ref_out))) < 1e-1
  assert float(jnp.max(jnp.abs(channel_atten[0] - ref_ca[0]))) < 5e-2
  assert float(jnp.max(jnp.abs(spatial_atten[0] - ref_sa[0]))) < 5e-2
  print("KERNEL_OK")
</pallas_src>

<mosaic_0001>
module attributes {stable_mosaic.version = 11 : i64} {
  func.func @_affm_kernel(%arg0: i32, %arg1: memref<2x32x256xf32, #tpu.memory_space<vmem>>, %arg2: memref<2x32x256xf32, #tpu.memory_space<vmem>>, %arg3: memref<2x32x256xf32, #tpu.memory_space<vmem>>, %arg4: memref<9x256xf32, #tpu.memory_space<vmem>>, %arg5: memref<64x8xf32, #tpu.memory_space<vmem>>, %arg6: memref<1x8xf32, #tpu.memory_space<vmem>>, %arg7: memref<8x64xf32, #tpu.memory_space<vmem>>, %arg8: memref<1x64xf32, #tpu.memory_space<vmem>>, %arg9: memref<64x128xf32, #tpu.memory_space<vmem>>, %arg10: memref<1x128xf32, #tpu.memory_space<vmem>>, %arg11: memref<128x128xf32, #tpu.memory_space<vmem>>, %arg12: memref<1x128xf32, #tpu.memory_space<vmem>>, %arg13: memref<128x64xf32, #tpu.memory_space<vmem>>, %arg14: memref<1x64xf32, #tpu.memory_space<vmem>>, %arg15: memref<5x8x72xf32, #tpu.memory_space<vmem>>, %arg16: memref<4x8x1xf32, #tpu.memory_space<vmem>>, %arg17: memref<4x8x1xf32, #tpu.memory_space<vmem>>, %arg18: memref<64x8xf32, #tpu.memory_space<vmem>>, %arg19: memref<1x8xf32, #tpu.memory_space<vmem>>, %arg20: memref<8x32xf32, #tpu.memory_space<vmem>>, %arg21: memref<1x32xf32, #tpu.memory_space<vmem>>, %arg22: memref<2x32x256xf32, #tpu.memory_space<vmem>>, %arg23: memref<2x1x64xf32, #tpu.memory_space<vmem>>, %arg24: memref<2x2x256xf32, #tpu.memory_space<vmem>>) attributes {dimension_semantics = [#tpu.dimension_semantics<parallel>], iteration_bounds = array<i64: 2>, scalar_prefetch = 0 : i64, scratch_operands = 0 : i64, tpu.core_type = #tpu.core_type<tc>, window_params = [{transform_indices = @transform_0, window_bounds = array<i64: 2, 32, 256>}, {transform_indices = @transform_1, window_bounds = array<i64: 2, 32, 256>}, {transform_indices = @transform_2, window_bounds = array<i64: 2, 32, 256>}, {pipeline_mode = #tpu.pipeline_mode<synchronous>, transform_indices = @transform_3, window_bounds = array<i64: 9, 256>}, {pipeline_mode = #tpu.pipeline_mode<synchronous>, transform_indices = @transform_4, window_bounds = array<i64: 64, 8>}, {pipeline_mode = #tpu.pipeline_mode<synchronous>, transform_indices = @transform_5, window_bounds = array<i64: 1, 8>}, {pipeline_mode = #tpu.pipeline_mode<synchronous>, transform_indices = @transform_6, window_bounds = array<i64: 8, 64>}, {pipeline_mode = #tpu.pipeline_mode<synchronous>, transform_indices = @transform_7, window_bounds = array<i64: 1, 64>}, {pipeline_mode = #tpu.pipeline_mode<synchronous>, transform_indices = @transform_8, window_bounds = array<i64: 64, 128>}, {pipeline_mode = #tpu.pipeline_mode<synchronous>, transform_indices = @transform_9, window_bounds = array<i64: 1, 128>}, {pipeline_mode = #tpu.pipeline_mode<synchronous>, transform_indices = @transform_10, window_bounds = array<i64: 128, 128>}, {pipeline_mode = #tpu.pipeline_mode<synchronous>, transform_indices = @transform_11, window_bounds = array<i64: 1, 128>}, {pipeline_mode = #tpu.pipeline_mode<synchronous>, transform_indices = @transform_12, window_bounds = array<i64: 128, 64>}, {pipeline_mode = #tpu.pipeline_mode<synchronous>, transform_indices = @transform_13, window_bounds = array<i64: 1, 64>}, {pipeline_mode = #tpu.pipeline_mode<synchronous>, transform_indices = @transform_14, window_bounds = array<i64: 5, 8, 72>}, {pipeline_mode = #tpu.pipeline_mode<synchronous>, transform_indices = @transform_15, window_bounds = array<i64: 4, 8, 1>}, {pipeline_mode = #tpu.pipeline_mode<synchronous>, transform_indices = @transform_16, window_bounds = array<i64: 4, 8, 1>}, {pipeline_mode = #tpu.pipeline_mode<synchronous>, transform_indices = @transform_17, window_bounds = array<i64: 64, 8>}, {pipeline_mode = #tpu.pipeline_mode<synchronous>, transform_indices = @transform_18, window_bounds = array<i64: 1, 8>}, {pipeline_mode = #tpu.pipeline_mode<synchronous>, transform_indices = @transform_19, window_bounds = array<i64: 8, 32>}, {pipeline_mode = #tpu.pipeline_mode<synchronous>, transform_indices = @transform_20, window_bounds = array<i64: 1, 32>}, {transform_indices = @transform_21, window_bounds = array<i64: 2, 32, 256>}, {transform_indices = @transform_22, window_bounds = array<i64: 2, 1, 64>}, {transform_indices = @transform_23, window_bounds = array<i64: 2, 2, 256>}]} {
    %c0 = arith.constant 0 : index
    %c0_0 = arith.constant 0 : index
    %c0_1 = arith.constant 0 : index
    %0 = vector.load %arg1[%c0, %c0_0, %c0_1] : memref<2x32x256xf32, #tpu.memory_space<vmem>>, vector<2x32x256xf32>
    %c0_2 = arith.constant 0 : index
    %c0_3 = arith.constant 0 : index
    %c0_4 = arith.constant 0 : index
    %1 = vector.load %arg2[%c0_2, %c0_3, %c0_4] : memref<2x32x256xf32, #tpu.memory_space<vmem>>, vector<2x32x256xf32>
    %2 = arith.addf %0, %1 : vector<2x32x256xf32>
    %cst = arith.constant dense<0.000000e+00> : vector<2x32xf32>
    %3 = vector.multi_reduction <add>, %2, %cst [2] : vector<2x32x256xf32> to vector<2x32xf32>
    %cst_5 = arith.constant 2.560000e+02 : f32
    %4 = vector.broadcast %cst_5 : f32 to vector<2x32xf32>
    %5 = arith.divf %3, %4 : vector<2x32xf32>
    %cst_6 = arith.constant dense<0xFF800000> : vector<2x32xf32>
    %6 = vector.multi_reduction <maximumf>, %2, %cst_6 [2] : vector<2x32x256xf32> to vector<2x32xf32>
    %cst_7 = arith.constant dense<0.000000e+00> : vector<2x256xf32>
    %7 = vector.multi_reduction <add>, %2, %cst_7 [1] : vector<2x32x256xf32> to vector<2x256xf32>
    %8 = vector.shape_cast %7 : vector<2x256xf32> to vector<2x1x256xf32>
    %cst_8 = arith.constant 3.200000e+01 : f32
    %9 = vector.broadcast %cst_8 : f32 to vector<2x1x256xf32>
    %10 = arith.divf %8, %9 : vector<2x1x256xf32>
    %cst_9 = arith.constant dense<0xFF800000> : vector<2x256xf32>
    %11 = vector.multi_reduction <maximumf>, %2, %cst_9 [1] : vector<2x32x256xf32> to vector<2x256xf32>
    %12 = vector.shape_cast %11 : vector<2x256xf32> to vector<2x1x256xf32>
    %13 = tpu.concatenate %5, %6 in 1 : vector<2x32xf32>, vector<2x32xf32> -> vector<2x64xf32>
    %c0_10 = arith.constant 0 : index
    %c0_11 = arith.constant 0 : index
    %14 = vector.load %arg5[%c0_10, %c0_11] : memref<64x8xf32, #tpu.memory_space<vmem>>, vector<64x8xf32>
    %cst_12 = arith.constant dense<0.000000e+00> : vector<2x8xf32>
    %15 = tpu.matmul %13, %14, %cst_12 {dimension_numbers = #tpu.dot_dimension_numbers<[1], [0], [0], [1], [0, 0, 1, 1], [], []>} : vector<2x64xf32>, vector<64x8xf32>, vector<2x8xf32> -> vector<2x8xf32>
    %c0_13 = arith.constant 0 : index
    %c0_14 = arith.constant 0 : index
    %16 = vector.load %arg6[%c0_13, %c0_14] : memref<1x8xf32, #tpu.memory_space<vmem>>, vector<1x8xf32>
    %17 = vector.broadcast %16 : vector<1x8xf32> to vector<2x8xf32>
    %18 = arith.addf %15, %17 : vector<2x8xf32>
    %cst_15 = arith.constant 0.000000e+00 : f32
    %19 = vector.broadcast %cst_15 : f32 to vector<2x8xf32>
    %20 = arith.maximumf %18, %19 : vector<2x8xf32>
    %c0_16 = arith.constant 0 : index
    %c0_17 = arith.constant 0 : index
    %21 = vector.load %arg7[%c0_16, %c0_17] : memref<8x64xf32, #tpu.memory_space<vmem>>, vector<8x64xf32>
    %cst_18 = arith.constant dense<0.000000e+00> : vector<2x64xf32>
    %22 = tpu.matmul %20, %21, %cst_18 {dimension_numbers = #tpu.dot_dimension_numbers<[1], [0], [0], [1], [0, 0, 1, 1], [], []>} : vector<2x8xf32>, vector<8x64xf32>, vector<2x64xf32> -> vector<2x64xf32>
    %c0_19 = arith.constant 0 : index
    %c0_20 = arith.constant 0 : index
    %23 = vector.load %arg8[%c0_19, %c0_20] : memref<1x64xf32, #tpu.memory_space<vmem>>, vector<1x64xf32>
    %24 = vector.broadcast %23 : vector<1x64xf32> to vector<2x64xf32>
    %25 = arith.addf %22, %24 : vector<2x64xf32>
    %c0_21 = arith.constant 0 : index
    %c0_22 = arith.constant 0 : index
    %26 = vector.load %arg9[%c0_21, %c0_22] : memref<64x128xf32, #tpu.memory_space<vmem>>, vector<64x128xf32>
    %cst_23 = arith.constant dense<0.000000e+00> : vector<2x128xf32>
    %27 = tpu.matmul %25, %26, %cst_23 {dimension_numbers = #tpu.dot_dimension_numbers<[1], [0], [0], [1], [0, 0, 1, 1], [], []>} : vector<2x64xf32>, vector<64x128xf32>, vector<2x128xf32> -> vector<2x128xf32>
    %c0_24 = arith.constant 0 : index
    %c0_25 = arith.constant 0 : index
    %28 = vector.load %arg10[%c0_24, %c0_25] : memref<1x128xf32, #tpu.memory_space<vmem>>, vector<1x128xf32>
    %29 = vector.broadcast %28 : vector<1x128xf32> to vector<2x128xf32>
    %30 = arith.addf %27, %29 : vector<2x128xf32>
    %cst_26 = arith.constant 0.000000e+00 : f32
    %31 = vector.broadcast %cst_26 : f32 to vector<2x128xf32>
    %32 = arith.maximumf %30, %31 : vector<2x128xf32>
    %c0_27 = arith.constant 0 : index
    %c0_28 = arith.constant 0 : index
    %33 = vector.load %arg11[%c0_27, %c0_28] : memref<128x128xf32, #tpu.memory_space<vmem>>, vector<128x128xf32>
    %cst_29 = arith.constant dense<0.000000e+00> : vector<2x128xf32>
    %34 = tpu.matmul %32, %33, %cst_29 {dimension_numbers = #tpu.dot_dimension_numbers<[1], [0], [0], [1], [0, 0, 1, 1], [], []>} : vector<2x128xf32>, vector<128x128xf32>, vector<2x128xf32> -> vector<2x128xf32>
    %c0_30 = arith.constant 0 : index
    %c0_31 = arith.constant 0 : index
    %35 = vector.load %arg12[%c0_30, %c0_31] : memref<1x128xf32, #tpu.memory_space<vmem>>, vector<1x128xf32>
    %36 = vector.broadcast %35 : vector<1x128xf32> to vector<2x128xf32>
    %37 = arith.addf %34, %36 : vector<2x128xf32>
    %cst_32 = arith.constant 0.000000e+00 : f32
    %38 = vector.broadcast %cst_32 : f32 to vector<2x128xf32>
    %39 = arith.maximumf %37, %38 : vector<2x128xf32>
    %c0_33 = arith.constant 0 : index
    %c0_34 = arith.constant 0 : index
    %40 = vector.load %arg13[%c0_33, %c0_34] : memref<128x64xf32, #tpu.memory_space<vmem>>, vector<128x64xf32>
    %cst_35 = arith.constant dense<0.000000e+00> : vector<2x64xf32>
    %41 = tpu.matmul %39, %40, %cst_35 {dimension_numbers = #tpu.dot_dimension_numbers<[1], [0], [0], [1], [0, 0, 1, 1], [], []>} : vector<2x128xf32>, vector<128x64xf32>, vector<2x64xf32> -> vector<2x64xf32>
    %c0_36 = arith.constant 0 : index
    %c0_37 = arith.constant 0 : index
    %42 = vector.load %arg14[%c0_36, %c0_37] : memref<1x64xf32, #tpu.memory_space<vmem>>, vector<1x64xf32>
    %43 = vector.broadcast %42 : vector<1x64xf32> to vector<2x64xf32>
    %44 = arith.addf %41, %43 : vector<2x64xf32>
    %cst_38 = arith.constant 0.000000e+00 : f32
    %45 = vector.broadcast %cst_38 : f32 to vector<2x64xf32>
    %46 = arith.maximumf %44, %45 : vector<2x64xf32>
    %47 = vector.extract_strided_slice %46 {offsets = [0, 0], sizes = [2, 32], strides = [1, 1]} : vector<2x64xf32> to vector<2x32xf32>
    %48 = vector.extract_strided_slice %46 {offsets = [0, 32], sizes = [2, 32], strides = [1, 1]} : vector<2x64xf32> to vector<2x32xf32>
    %49 = arith.maximumf %47, %48 : vector<2x32xf32>
    %50 = arith.subf %47, %49 : vector<2x32xf32>
    %51 = math.exp %50 : vector<2x32xf32>
    %52 = arith.subf %48, %49 : vector<2x32xf32>
    %53 = math.exp %52 : vector<2x32xf32>
    %54 = arith.addf %51, %53 : vector<2x32xf32>
    %55 = arith.divf %51, %54 : vector<2x32xf32>
    %56 = arith.divf %53, %54 : vector<2x32xf32>
    %57 = tpu.concatenate %55, %56 in 1 : vector<2x32xf32>, vector<2x32xf32> -> vector<2x64xf32>
    %58 = vector.shape_cast %57 : vector<2x64xf32> to vector<2x1x64xf32>
    %c0_39 = arith.constant 0 : index
    %c0_40 = arith.constant 0 : index
    %c0_41 = arith.constant 0 : index
    %59 = vector.load %arg23[%c0_39, %c0_40, %c0_41] : memref<2x1x64xf32, #tpu.memory_space<vmem>>, vector<2x1x64xf32>
    tpu.vector_store %arg23[%c0_39, %c0_40, %c0_41], %58 {strides = array<i32>} : memref<2x1x64xf32, #tpu.memory_space<vmem>>, vector<2x1x64xf32>,
    %c0_42 = arith.constant 0 : index
    %c0_43 = arith.constant 0 : index
    %60 = vector.load %arg4[%c0_42, %c0_43] : memref<9x256xf32, #tpu.memory_space<vmem>>, vector<9x256xf32>
    %c0_44 = arith.constant 0 : index
    %c0_45 = arith.constant 0 : index
    %c0_46 = arith.constant 0 : index
    %61 = vector.load %arg15[%c0_44, %c0_45, %c0_46] : memref<5x8x72xf32, #tpu.memory_space<vmem>>, vector<1x8x72xf32>
    %62 = vector.shape_cast %61 : vector<1x8x72xf32> to vector<8x72xf32>
    %c1 = arith.constant 1 : index
    %c0_47 = arith.constant 0 : index
    %c0_48 = arith.constant 0 : index
    %63 = vector.load %arg15[%c1, %c0_47, %c0_48] : memref<5x8x72xf32, #tpu.memory_space<vmem>>, vector<1x8x72xf32>
    %64 = vector.shape_cast %63 : vector<1x8x72xf32> to vector<8x72xf32>
    %c2 = arith.constant 2 : index
    %c0_49 = arith.constant 0 : index
    %c0_50 = arith.constant 0 : index
    %65 = vector.load %arg15[%c2, %c0_49, %c0_50] : memref<5x8x72xf32, #tpu.memory_space<vmem>>, vector<1x8x72xf32>
    %66 = vector.shape_cast %65 : vector<1x8x72xf32> to vector<8x72xf32>
    %c3 = arith.constant 3 : index
    %c0_51 = arith.constant 0 : index
    %c0_52 = arith.constant 0 : index
    %67 = vector.load %arg15[%c3, %c0_51, %c0_52] : memref<5x8x72xf32, #tpu.memory_space<vmem>>, vector<1x8x72xf32>
    %68 = vector.shape_cast %67 : vector<1x8x72xf32> to vector<8x72xf32>
    %c4 = arith.constant 4 : index
    %c0_53 = arith.constant 0 : index
    %c0_54 = arith.constant 0 : index
    %69 = vector.load %arg15[%c4, %c0_53, %c0_54] : memref<5x8x72xf32, #tpu.memory_space<vmem>>, vector<1x8x72xf32>
    %70 = vector.shape_cast %69 : vector<1x8x72xf32> to vector<8x72xf32>
    %c0_55 = arith.constant 0 : index
    %c0_56 = arith.constant 0 : index
    %c0_57 = arith.constant 0 : index
    %71 = vector.load %arg16[%c0_55, %c0_56, %c0_57] : memref<4x8x1xf32, #tpu.memory_space<vmem>>, vector<1x8x1xf32>
    %72 = vector.shape_cast %71 : vector<1x8x1xf32> to vector<8x1xf32>
    %c1_58 = arith.constant 1 : index
    %c0_59 = arith.constant 0 : index
    %c0_60 = arith.constant 0 : index
    %73 = vector.load %arg16[%c1_58, %c0_59, %c0_60] : memref<4x8x1xf32, #tpu.memory_space<vmem>>, vector<1x8x1xf32>
    %74 = vector.shape_cast %73 : vector<1x8x1xf32> to vector<8x1xf32>
    %c2_61 = arith.constant 2 : index
    %c0_62 = arith.constant 0 : index
    %c0_63 = arith.constant 0 : index
    %75 = vector.load %arg16[%c2_61, %c0_62, %c0_63] : memref<4x8x1xf32, #tpu.memory_space<vmem>>, vector<1x8x1xf32>
    %76 = vector.shape_cast %75 : vector<1x8x1xf32> to vector<8x1xf32>
    %c3_64 = arith.constant 3 : index
    %c0_65 = arith.constant 0 : index
    %c0_66 = arith.constant 0 : index
    %77 = vector.load %arg16[%c3_64, %c0_65, %c0_66] : memref<4x8x1xf32, #tpu.memory_space<vmem>>, vector<1x8x1xf32>
    %78 = vector.shape_cast %77 : vector<1x8x1xf32> to vector<8x1xf32>
    %c0_67 = arith.constant 0 : index
    %c0_68 = arith.constant 0 : index
    %c0_69 = arith.constant 0 : index
    %79 = vector.load %arg17[%c0_67, %c0_68, %c0_69] : memref<4x8x1xf32, #tpu.memory_space<vmem>>, vector<1x8x1xf32>
    %80 = vector.shape_cast %79 : vector<1x8x1xf32> to vector<8x1xf32>
    %c1_70 = arith.constant 1 : index
    %c0_71 = arith.constant 0 : index
    %c0_72 = arith.constant 0 : index
    %81 = vector.load %arg17[%c1_70, %c0_71, %c0_72] : memref<4x8x1xf32, #tpu.memory_space<vmem>>, vector<1x8x1xf32>
    %82 = vector.shape_cast %81 : vector<1x8x1xf32> to vector<8x1xf32>
    %c2_73 = arith.constant 2 : index
    %c0_74 = arith.constant 0 : index
    %c0_75 = arith.constant 0 : index
    %83 = vector.load %arg17[%c2_73, %c0_74, %c0_75] : memref<4x8x1xf32, #tpu.memory_space<vmem>>, vector<1x8x1xf32>
    %84 = vector.shape_cast %83 : vector<1x8x1xf32> to vector<8x1xf32>
    %c3_76 = arith.constant 3 : index
    %c0_77 = arith.constant 0 : index
    %c0_78 = arith.constant 0 : index
    %85 = vector.load %arg17[%c3_76, %c0_77, %c0_78] : memref<4x8x1xf32, #tpu.memory_space<vmem>>, vector<1x8x1xf32>
    %86 = vector.shape_cast %85 : vector<1x8x1xf32> to vector<8x1xf32>
    %cst_79 = arith.constant 0.000000e+00 : f32
    %87 = vector.broadcast %cst_79 : f32 to vector<6x256xf32>
    %88 = vector.extract_strided_slice %10 {offsets = [0, 0, 0], sizes = [1, 1, 256], strides = [1, 1, 1]} : vector<2x1x256xf32> to vector<1x1x256xf32>
    %89 = vector.shape_cast %88 : vector<1x1x256xf32> to vector<1x256xf32>
    %90 = vector.extract_strided_slice %12 {offsets = [0, 0, 0], sizes = [1, 1, 256], strides = [1, 1, 1]} : vector<2x1x256xf32> to vector<1x1x256xf32>
    %91 = vector.shape_cast %90 : vector<1x1x256xf32> to vector<1x256xf32>
    %92 = tpu.concatenate %89, %91, %87 in 0 : vector<1x256xf32>, vector<1x256xf32>, vector<6x256xf32> -> vector<8x256xf32>
    %c17_i32 = arith.constant 17 : i32
    %93 = tpu.dynamic_rotate %92 by %c17_i32 dim 1 : vector<8x256xf32>, i32 -> vector<8x256xf32>
    %94 = vector.extract_strided_slice %60 {offsets = [0, 0], sizes = [1, 256], strides = [1, 1]} : vector<9x256xf32> to vector<1x256xf32>
    %95 = vector.broadcast %94 : vector<1x256xf32> to vector<8x256xf32>
    %96 = arith.mulf %93, %95 : vector<8x256xf32>
    %c16_i32 = arith.constant 16 : i32
    %97 = tpu.dynamic_rotate %92 by %c16_i32 dim 1 : vector<8x256xf32>, i32 -> vector<8x256xf32>
    %98 = vector.extract_strided_slice %60 {offsets = [1, 0], sizes = [1, 256], strides = [1, 1]} : vector<9x256xf32> to vector<1x256xf32>
    %99 = vector.broadcast %98 : vector<1x256xf32> to vector<8x256xf32>
    %100 = arith.mulf %97, %99 : vector<8x256xf32>
    %c15_i32 = arith.constant 15 : i32
    %101 = tpu.dynamic_rotate %92 by %c15_i32 dim 1 : vector<8x256xf32>, i32 -> vector<8x256xf32>
    %102 = vector.extract_strided_slice %60 {offsets = [2, 0], sizes = [1, 256], strides = [1, 1]} : vector<9x256xf32> to vector<1x256xf32>
    %103 = vector.broadcast %102 : vector<1x256xf32> to vector<8x256xf32>
    %104 = arith.mulf %101, %103 : vector<8x256xf32>
    %c1_i32 = arith.constant 1 : i32
    %105 = tpu.dynamic_rotate %92 by %c1_i32 dim 1 : vector<8x256xf32>, i32 -> vector<8x256xf32>
    %106 = vector.extract_strided_slice %60 {offsets = [3, 0], sizes = [1, 256], strides = [1, 1]} : vector<9x256xf32> to vector<1x256xf32>
    %107 = vector.broadcast %106 : vector<1x256xf32> to vector<8x256xf32>
    %108 = arith.mulf %105, %107 : vector<8x256xf32>
    %109 = vector.extract_strided_slice %60 {offsets = [4, 0], sizes = [1, 256], strides = [1, 1]} : vector<9x256xf32> to vector<1x256xf32>
    %110 = vector.broadcast %109 : vector<1x256xf32> to vector<8x256xf32>
    %111 = arith.mulf %92, %110 : vector<8x256xf32>
    %c255_i32 = arith.constant 255 : i32
    %112 = tpu.dynamic_rotate %92 by %c255_i32 dim 1 : vector<8x256xf32>, i32 -> vector<8x256xf32>
    %113 = vector.extract_strided_slice %60 {offsets = [5, 0], sizes = [1, 256], strides = [1, 1]} : vector<9x256xf32> to vector<1x256xf32>
    %114 = vector.broadcast %113 : vector<1x256xf32> to vector<8x256xf32>
    %115 = arith.mulf %112, %114 : vector<8x256xf32>
    %c241_i32 = arith.constant 241 : i32
    %116 = tpu.dynamic_rotate %92 by %c241_i32 dim 1 : vector<8x256xf32>, i32 -> vector<8x256xf32>
    %117 = vector.extract_strided_slice %60 {offsets = [6, 0], sizes = [1, 256], strides = [1, 1]} : vector<9x256xf32> to vector<1x256xf32>
    %118 = vector.broadcast %117 : vector<1x256xf32> to vector<8x256xf32>
    %119 = arith.mulf %116, %118 : vector<8x256xf32>
    %c240_i32 = arith.constant 240 : i32
    %120 = tpu.dynamic_rotate %92 by %c240_i32 dim 1 : vector<8x256xf32>, i32 -> vector<8x256xf32>
    %121 = vector.extract_strided_slice %60 {offsets = [7, 0], sizes = [1, 256], strides = [1, 1]} : vector<9x256xf32> to vector<1x256xf32>
    %122 = vector.broadcast %121 : vector<1x256xf32> to vector<8x256xf32>
    %123 = arith.mulf %120, %122 : vector<8x256xf32>
    %c239_i32 = arith.constant 239 : i32
    %124 = tpu.dynamic_rotate %92 by %c239_i32 dim 1 : vector<8x256xf32>, i32 -> vector<8x256xf32>
    %125 = vector.extract_strided_slice %60 {offsets = [8, 0], sizes = [1, 256], strides = [1, 1]} : vector<9x256xf32> to vector<1x256xf32>
    %126 = vector.broadcast %125 : vector<1x256xf32> to vector<8x256xf32>
    %127 = arith.mulf %124, %126 : vector<8x256xf32>
    %128 = tpu.concatenate %96, %100, %104, %108, %111, %115, %119, %123, %127 in 0 : vector<8x256xf32>, vector<8x256xf32>, vector<8x256xf32>, vector<8x256xf32>, vector<8x256xf32>, vector<8x256xf32>, vector<8x256xf32>, vector<8x256xf32>, vector<8x256xf32> -> vector<72x256xf32>
    %cst_80 = arith.constant dense<0.000000e+00> : vector<8x256xf32>
    %129 = tpu.matmul %62, %128, %cst_80 {dimension_numbers = #tpu.dot_dimension_numbers<[1], [0], [0], [1], [0, 0, 1, 1], [], []>} : vector<8x72xf32>, vector<72x256xf32>, vector<8x256xf32> -> vector<8x256xf32>
    %130 = vector.broadcast %72 : vector<8x1xf32> to vector<8x256xf32>
    %131 = arith.mulf %129, %130 : vector<8x256xf32>
    %132 = vector.broadcast %80 : vector<8x1xf32> to vector<8x256xf32>
    %133 = arith.addf %131, %132 : vector<8x256xf32>
    %cst_81 = arith.constant 0.000000e+00 : f32
    %134 = vector.broadcast %cst_81 : f32 to vector<8x256xf32>
    %135 = arith.maximumf %133, %134 : vector<8x256xf32>
    %c17_i32_82 = arith.constant 17 : i32
    %136 = tpu.dynamic_rotate %135 by %c17_i32_82 dim 1 : vector<8x256xf32>, i32 -> vector<8x256xf32>
    %137 = vector.extract_strided_slice %60 {offsets = [0, 0], sizes = [1, 256], strides = [1, 1]} : vector<9x256xf32> to vector<1x256xf32>
    %138 = vector.broadcast %137 : vector<1x256xf32> to vector<8x256xf32>
    %139 = arith.mulf %136, %138 : vector<8x256xf32>
    %c16_i32_83 = arith.constant 16 : i32
    %140 = tpu.dynamic_rotate %135 by %c16_i32_83 dim 1 : vector<8x256xf32>, i32 -> vector<8x256xf32>
    %141 = vector.extract_strided_slice %60 {offsets = [1, 0], sizes = [1, 256], strides = [1, 1]} : vector<9x256xf32> to vector<1x256xf32>
    %142 = vector.broadcast %141 : vector<1x256xf32> to vector<8x256xf32>
    %143 = arith.mulf %140, %142 : vector<8x256xf32>
    %c15_i32_84 = arith.constant 15 : i32
    %144 = tpu.dynamic_rotate %135 by %c15_i32_84 dim 1 : vector<8x256xf32>, i32 -> vector<8x256xf32>
    %145 = vector.extract_strided_slice %60 {offsets = [2, 0], sizes = [1, 256], strides = [1, 1]} : vector<9x256xf32> to vector<1x256xf32>
    %146 = vector.broadcast %145 : vector<1x256xf32> to vector<8x256xf32>
    %147 = arith.mulf %144, %146 : vector<8x256xf32>
    %c1_i32_85 = arith.constant 1 : i32
    %148 = tpu.dynamic_rotate %135 by %c1_i32_85 dim 1 : vector<8x256xf32>, i32 -> vector<8x256xf32>
    %149 = vector.extract_strided_slice %60 {offsets = [3, 0], sizes = [1, 256], strides = [1, 1]} : vector<9x256xf32> to vector<1x256xf32>
    %150 = vector.broadcast %149 : vector<1x256xf32> to vector<8x256xf32>
    %151 = arith.mulf %148, %150 : vector<8x256xf32>
    %152 = vector.extract_strided_slice %60 {offsets = [4, 0], sizes = [1, 256], strides = [1, 1]} : vector<9x256xf32> to vector<1x256xf32>
    %153 = vector.broadcast %152 : vector<1x256xf32> to vector<8x256xf32>
    %154 = arith.mulf %135, %153 : vector<8x256xf32>
    %c255_i32_86 = arith.constant 255 : i32
    %155 = tpu.dynamic_rotate %135 by %c255_i32_86 dim 1 : vector<8x256xf32>, i32 -> vector<8x256xf32>
    %156 = vector.extract_strided_slice %60 {offsets = [5, 0], sizes = [1, 256], strides = [1, 1]} : vector<9x256xf32> to vector<1x256xf32>
    %157 = vector.broadcast %156 : vector<1x256xf32> to vector<8x256xf32>
    %158 = arith.mulf %155, %157 : vector<8x256xf32>
    %c241_i32_87 = arith.constant 241 : i32
    %159 = tpu.dynamic_rotate %135 by %c241_i32_87 dim 1 : vector<8x256xf32>, i32 -> vector<8x256xf32>
    %160 = vector.extract_strided_slice %60 {offsets = [6, 0], sizes = [1, 256], strides = [1, 1]} : vector<9x256xf32> to vector<1x256xf32>
    %161 = vector.broadcast %160 : vector<1x256xf32> to vector<8x256xf32>
    %162 = arith.mulf %159, %161 : vector<8x256xf32>
    %c240_i32_88 = arith.constant 240 : i32
    %163 = tpu.dynamic_rotate %135 by %c240_i32_88 dim 1 : vector<8x256xf32>, i32 -> vector<8x256xf32>
    %164 = vector.extract_strided_slice %60 {offsets = [7, 0], sizes = [1, 256], strides = [1, 1]} : vector<9x256xf32> to vector<1x256xf32>
    %165 = vector.broadcast %164 : vector<1x256xf32> to vector<8x256xf32>
    %166 = arith.mulf %163, %165 : vector<8x256xf32>
    %c239_i32_89 = arith.constant 239 : i32
    %167 = tpu.dynamic_rotate %135 by %c239_i32_89 dim 1 : vector<8x256xf32>, i32 -> vector<8x256xf32>
    %168 = vector.extract_strided_slice %60 {offsets = [8, 0], sizes = [1, 256], strides = [1, 1]} : vector<9x256xf32> to vector<1x256xf32>
    %169 = vector.broadcast %168 : vector<1x256xf32> to vector<8x256xf32>
    %170 = arith.mulf %167, %169 : vector<8x256xf32>
    %171 = tpu.concatenate %139, %143, %147, %151, %154, %158, %162, %166, %170 in 0 : vector<8x256xf32>, vector<8x256xf32>, vector<8x256xf32>, vector<8x256xf32>, vector<8x256xf32>, vector<8x256xf32>, vector<8x256xf32>, vector<8x256xf32>, vector<8x256xf32> -> vector<72x256xf32>
    %cst_90 = arith.constant dense<0.000000e+00> : vector<8x256xf32>
    %172 = tpu.matmul %64, %171, %cst_90 {dimension_numbers = #tpu.dot_dimension_numbers<[1], [0], [0], [1], [0, 0, 1, 1], [], []>} : vector<8x72xf32>, vector<72x256xf32>, vector<8x256xf32> -> vector<8x256xf32>
    %173 = vector.broadcast %74 : vector<8x1xf32> to vector<8x256xf32>
    %174 = arith.mulf %172, %173 : vector<8x256xf32>
    %175 = vector.broadcast %82 : vector<8x1xf32> to vector<8x256xf32>
    %176 = arith.addf %174, %175 : vector<8x256xf32>
    %cst_91 = arith.constant 0.000000e+00 : f32
    %177 = vector.broadcast %cst_91 : f32 to vector<8x256xf32>
    %178 = arith.maximumf %176, %177 : vector<8x256xf32>
    %c17_i32_92 = arith.constant 17 : i32
    %179 = tpu.dynamic_rotate %178 by %c17_i32_92 dim 1 : vector<8x256xf32>, i32 -> vector<8x256xf32>
    %180 = vector.extract_strided_slice %60 {offsets = [0, 0], sizes = [1, 256], strides = [1, 1]} : vector<9x256xf32> to vector<1x256xf32>
    %181 = vector.broadcast %180 : vector<1x256xf32> to vector<8x256xf32>
    %182 = arith.mulf %179, %181 : vector<8x256xf32>
    %c16_i32_93 = arith.constant 16 : i32
    %183 = tpu.dynamic_rotate %178 by %c16_i32_93 dim 1 : vector<8x256xf32>, i32 -> vector<8x256xf32>
    %184 = vector.extract_strided_slice %60 {offsets = [1, 0], sizes = [1, 256], strides = [1, 1]} : vector<9x256xf32> to vector<1x256xf32>
    %185 = vector.broadcast %184 : vector<1x256xf32> to vector<8x256xf32>
    %186 = arith.mulf %183, %185 : vector<8x256xf32>
    %c15_i32_94 = arith.constant 15 : i32
    %187 = tpu.dynamic_rotate %178 by %c15_i32_94 dim 1 : vector<8x256xf32>, i32 -> vector<8x256xf32>
    %188 = vector.extract_strided_slice %60 {offsets = [2, 0], sizes = [1, 256], strides = [1, 1]} : vector<9x256xf32> to vector<1x256xf32>
    %189 = vector.broadcast %188 : vector<1x256xf32> to vector<8x256xf32>
    %190 = arith.mulf %187, %189 : vector<8x256xf32>
    %c1_i32_95 = arith.constant 1 : i32
    %191 = tpu.dynamic_rotate %178 by %c1_i32_95 dim 1 : vector<8x256xf32>, i32 -> vector<8x256xf32>
    %192 = vector.extract_strided_slice %60 {offsets = [3, 0], sizes = [1, 256], strides = [1, 1]} : vector<9x256xf32> to vector<1x256xf32>
    %193 = vector.broadcast %192 : vector<1x256xf32> to vector<8x256xf32>
    %194 = arith.mulf %191, %193 : vector<8x256xf32>
    %195 = vector.extract_strided_slice %60 {offsets = [4, 0], sizes = [1, 256], strides = [1, 1]} : vector<9x256xf32> to vector<1x256xf32>
    %196 = vector.broadcast %195 : vector<1x256xf32> to vector<8x256xf32>
    %197 = arith.mulf %178, %196 : vector<8x256xf32>
    %c255_i32_96 = arith.constant 255 : i32
    %198 = tpu.dynamic_rotate %178 by %c255_i32_96 dim 1 : vector<8x256xf32>, i32 -> vector<8x256xf32>
    %199 = vector.extract_strided_slice %60 {offsets = [5, 0], sizes = [1, 256], strides = [1, 1]} : vector<9x256xf32> to vector<1x256xf32>
    %200 = vector.broadcast %199 : vector<1x256xf32> to vector<8x256xf32>
    %201 = arith.mulf %198, %200 : vector<8x256xf32>
    %c241_i32_97 = arith.constant 241 : i32
    %202 = tpu.dynamic_rotate %178 by %c241_i32_97 dim 1 : vector<8x256xf32>, i32 -> vector<8x256xf32>
    %203 = vector.extract_strided_slice %60 {offsets = [6, 0], sizes = [1, 256], strides = [1, 1]} : vector<9x256xf32> to vector<1x256xf32>
    %204 = vector.broadcast %203 : vector<1x256xf32> to vector<8x256xf32>
    %205 = arith.mulf %202, %204 : vector<8x256xf32>
    %c240_i32_98 = arith.constant 240 : i32
    %206 = tpu.dynamic_rotate %178 by %c240_i32_98 dim 1 : vector<8x256xf32>, i32 -> vector<8x256xf32>
    %207 = vector.extract_strided_slice %60 {offsets = [7, 0], sizes = [1, 256], strides = [1, 1]} : vector<9x256xf32> to vector<1x256xf32>
    %208 = vector.broadcast %207 : vector<1x256xf32> to vector<8x256xf32>
    %209 = arith.mulf %206, %208 : vector<8x256xf32>
    %c239_i32_99 = arith.constant 239 : i32
    %210 = tpu.dynamic_rotate %178 by %c239_i32_99 dim 1 : vector<8x256xf32>, i32 -> vector<8x256xf32>
    %211 = vector.extract_strided_slice %60 {offsets = [8, 0], sizes = [1, 256], strides = [1, 1]} : vector<9x256xf32> to vector<1x256xf32>
    %212 = vector.broadcast %211 : vector<1x256xf32> to vector<8x256xf32>
    %213 = arith.mulf %210, %212 : vector<8x256xf32>
    %214 = tpu.concatenate %182, %186, %190, %194, %197, %201, %205, %209, %213 in 0 : vector<8x256xf32>, vector<8x256xf32>, vector<8x256xf32>, vector<8x256xf32>, vector<8x256xf32>, vector<8x256xf32>, vector<8x256xf32>, vector<8x256xf32>, vector<8x256xf32> -> vector<72x256xf32>
    %cst_100 = arith.constant dense<0.000000e+00> : vector<8x256xf32>
    %215 = tpu.matmul %66, %214, %cst_100 {dimension_numbers = #tpu.dot_dimension_numbers<[1], [0], [0], [1], [0, 0, 1, 1], [], []>} : vector<8x72xf32>, vector<72x256xf32>, vector<8x256xf32> -> vector<8x256xf32>
    %216 = vector.broadcast %76 : vector<8x1xf32> to vector<8x256xf32>
    %217 = arith.mulf %215, %216 : vector<8x256xf32>
    %218 = vector.broadcast %84 : vector<8x1xf32> to vector<8x256xf32>
    %219 = arith.addf %217, %218 : vector<8x256xf32>
    %cst_101 = arith.constant 0.000000e+00 : f32
    %220 = vector.broadcast %cst_101 : f32 to vector<8x256xf32>
    %221 = arith.maximumf %219, %220 : vector<8x256xf32>
    %c17_i32_102 = arith.constant 17 : i32
    %222 = tpu.dynamic_rotate %221 by %c17_i32_102 dim 1 : vector<8x256xf32>, i32 -> vector<8x256xf32>
    %223 = vector.extract_strided_slice %60 {offsets = [0, 0], sizes = [1, 256], strides = [1, 1]} : vector<9x256xf32> to vector<1x256xf32>
    %224 = vector.broadcast %223 : vector<1x256xf32> to vector<8x256xf32>
    %225 = arith.mulf %222, %224 : vector<8x256xf32>
    %c16_i32_103 = arith.constant 16 : i32
    %226 = tpu.dynamic_rotate %221 by %c16_i32_103 dim 1 : vector<8x256xf32>, i32 -> vector<8x256xf32>
    %227 = vector.extract_strided_slice %60 {offsets = [1, 0], sizes = [1, 256], strides = [1, 1]} : vector<9x256xf32> to vector<1x256xf32>
    %228 = vector.broadcast %227 : vector<1x256xf32> to vector<8x256xf32>
    %229 = arith.mulf %226, %228 : vector<8x256xf32>
    %c15_i32_104 = arith.constant 15 : i32
    %230 = tpu.dynamic_rotate %221 by %c15_i32_104 dim 1 : vector<8x256xf32>, i32 -> vector<8x256xf32>
    %231 = vector.extract_strided_slice %60 {offsets = [2, 0], sizes = [1, 256], strides = [1, 1]} : vector<9x256xf32> to vector<1x256xf32>
    %232 = vector.broadcast %231 : vector<1x256xf32> to vector<8x256xf32>
    %233 = arith.mulf %230, %232 : vector<8x256xf32>
    %c1_i32_105 = arith.constant 1 : i32
    %234 = tpu.dynamic_rotate %221 by %c1_i32_105 dim 1 : vector<8x256xf32>, i32 -> vector<8x256xf32>
    %235 = vector.extract_strided_slice %60 {offsets = [3, 0], sizes = [1, 256], strides = [1, 1]} : vector<9x256xf32> to vector<1x256xf32>
    %236 = vector.broadcast %235 : vector<1x256xf32> to vector<8x256xf32>
    %237 = arith.mulf %234, %236 : vector<8x256xf32>
    %238 = vector.extract_strided_slice %60 {offsets = [4, 0], sizes = [1, 256], strides = [1, 1]} : vector<9x256xf32> to vector<1x256xf32>
    %239 = vector.broadcast %238 : vector<1x256xf32> to vector<8x256xf32>
    %240 = arith.mulf %221, %239 : vector<8x256xf32>
    %c255_i32_106 = arith.constant 255 : i32
    %241 = tpu.dynamic_rotate %221 by %c255_i32_106 dim 1 : vector<8x256xf32>, i32 -> vector<8x256xf32>
    %242 = vector.extract_strided_slice %60 {offsets = [5, 0], sizes = [1, 256], strides = [1, 1]} : vector<9x256xf32> to vector<1x256xf32>
    %243 = vector.broadcast %242 : vector<1x256xf32> to vector<8x256xf32>
    %244 = arith.mulf %241, %243 : vector<8x256xf32>
    %c241_i32_107 = arith.constant 241 : i32
    %245 = tpu.dynamic_rotate %221 by %c241_i32_107 dim 1 : vector<8x256xf32>, i32 -> vector<8x256xf32>
    %246 = vector.extract_strided_slice %60 {offsets = [6, 0], sizes = [1, 256], strides = [1, 1]} : vector<9x256xf32> to vector<1x256xf32>
    %247 = vector.broadcast %246 : vector<1x256xf32> to vector<8x256xf32>
    %248 = arith.mulf %245, %247 : vector<8x256xf32>
    %c240_i32_108 = arith.constant 240 : i32
    %249 = tpu.dynamic_rotate %221 by %c240_i32_108 dim 1 : vector<8x256xf32>, i32 -> vector<8x256xf32>
    %250 = vector.extract_strided_slice %60 {offsets = [7, 0], sizes = [1, 256], strides = [1, 1]} : vector<9x256xf32> to vector<1x256xf32>
    %251 = vector.broadcast %250 : vector<1x256xf32> to vector<8x256xf32>
    %252 = arith.mulf %249, %251 : vector<8x256xf32>
    %c239_i32_109 = arith.constant 239 : i32
    %253 = tpu.dynamic_rotate %221 by %c239_i32_109 dim 1 : vector<8x256xf32>, i32 -> vector<8x256xf32>
    %254 = vector.extract_strided_slice %60 {offsets = [8, 0], sizes = [1, 256], strides = [1, 1]} : vector<9x256xf32> to vector<1x256xf32>
    %255 = vector.broadcast %254 : vector<1x256xf32> to vector<8x256xf32>
    %256 = arith.mulf %253, %255 : vector<8x256xf32>
    %257 = tpu.concatenate %225, %229, %233, %237, %240, %244, %248, %252, %256 in 0 : vector<8x256xf32>, vector<8x256xf32>, vector<8x256xf32>, vector<8x256xf32>, vector<8x256xf32>, vector<8x256xf32>, vector<8x256xf32>, vector<8x256xf32>, vector<8x256xf32> -> vector<72x256xf32>
    %cst_110 = arith.constant dense<0.000000e+00> : vector<8x256xf32>
    %258 = tpu.matmul %68, %257, %cst_110 {dimension_numbers = #tpu.dot_dimension_numbers<[1], [0], [0], [1], [0, 0, 1, 1], [], []>} : vector<8x72xf32>, vector<72x256xf32>, vector<8x256xf32> -> vector<8x256xf32>
    %259 = vector.broadcast %78 : vector<8x1xf32> to vector<8x256xf32>
    %260 = arith.mulf %258, %259 : vector<8x256xf32>
    %261 = vector.broadcast %86 : vector<8x1xf32> to vector<8x256xf32>
    %262 = arith.addf %260, %261 : vector<8x256xf32>
    %cst_111 = arith.constant 0.000000e+00 : f32
    %263 = vector.broadcast %cst_111 : f32 to vector<8x256xf32>
    %264 = arith.maximumf %262, %263 : vector<8x256xf32>
    %c17_i32_112 = arith.constant 17 : i32
    %265 = tpu.dynamic_rotate %264 by %c17_i32_112 dim 1 : vector<8x256xf32>, i32 -> vector<8x256xf32>
    %266 = vector.extract_strided_slice %60 {offsets = [0, 0], sizes = [1, 256], strides = [1, 1]} : vector<9x256xf32> to vector<1x256xf32>
    %267 = vector.broadcast %266 : vector<1x256xf32> to vector<8x256xf32>
    %268 = arith.mulf %265, %267 : vector<8x256xf32>
    %c16_i32_113 = arith.constant 16 : i32
    %269 = tpu.dynamic_rotate %264 by %c16_i32_113 dim 1 : vector<8x256xf32>, i32 -> vector<8x256xf32>
    %270 = vector.extract_strided_slice %60 {offsets = [1, 0], sizes = [1, 256], strides = [1, 1]} : vector<9x256xf32> to vector<1x256xf32>
    %271 = vector.broadcast %270 : vector<1x256xf32> to vector<8x256xf32>
    %272 = arith.mulf %269, %271 : vector<8x256xf32>
    %c15_i32_114 = arith.constant 15 : i32
    %273 = tpu.dynamic_rotate %264 by %c15_i32_114 dim 1 : vector<8x256xf32>, i32 -> vector<8x256xf32>
    %274 = vector.extract_strided_slice %60 {offsets = [2, 0], sizes = [1, 256], strides = [1, 1]} : vector<9x256xf32> to vector<1x256xf32>
    %275 = vector.broadcast %274 : vector<1x256xf32> to vector<8x256xf32>
    %276 = arith.mulf %273, %275 : vector<8x256xf32>
    %c1_i32_115 = arith.constant 1 : i32
    %277 = tpu.dynamic_rotate %264 by %c1_i32_115 dim 1 : vector<8x256xf32>, i32 -> vector<8x256xf32>
    %278 = vector.extract_strided_slice %60 {offsets = [3, 0], sizes = [1, 256], strides = [1, 1]} : vector<9x256xf32> to vector<1x256xf32>
    %279 = vector.broadcast %278 : vector<1x256xf32> to vector<8x256xf32>
    %280 = arith.mulf %277, %279 : vector<8x256xf32>
    %281 = vector.extract_strided_slice %60 {offsets = [4, 0], sizes = [1, 256], strides = [1, 1]} : vector<9x256xf32> to vector<1x256xf32>
    %282 = vector.broadcast %281 : vector<1x256xf32> to vector<8x256xf32>
    %283 = arith.mulf %264, %282 : vector<8x256xf32>
    %c255_i32_116 = arith.constant 255 : i32
    %284 = tpu.dynamic_rotate %264 by %c255_i32_116 dim 1 : vector<8x256xf32>, i32 -> vector<8x256xf32>
    %285 = vector.extract_strided_slice %60 {offsets = [5, 0], sizes = [1, 256], strides = [1, 1]} : vector<9x256xf32> to vector<1x256xf32>
    %286 = vector.broadcast %285 : vector<1x256xf32> to vector<8x256xf32>
    %287 = arith.mulf %284, %286 : vector<8x256xf32>
    %c241_i32_117 = arith.constant 241 : i32
    %288 = tpu.dynamic_rotate %264 by %c241_i32_117 dim 1 : vector<8x256xf32>, i32 -> vector<8x256xf32>
    %289 = vector.extract_strided_slice %60 {offsets = [6, 0], sizes = [1, 256], strides = [1, 1]} : vector<9x256xf32> to vector<1x256xf32>
    %290 = vector.broadcast %289 : vector<1x256xf32> to vector<8x256xf32>
    %291 = arith.mulf %288, %290 : vector<8x256xf32>
    %c240_i32_118 = arith.constant 240 : i32
    %292 = tpu.dynamic_rotate %264 by %c240_i32_118 dim 1 : vector<8x256xf32>, i32 -> vector<8x256xf32>
    %293 = vector.extract_strided_slice %60 {offsets = [7, 0], sizes = [1, 256], strides = [1, 1]} : vector<9x256xf32> to vector<1x256xf32>
    %294 = vector.broadcast %293 : vector<1x256xf32> to vector<8x256xf32>
    %295 = arith.mulf %292, %294 : vector<8x256xf32>
    %c239_i32_119 = arith.constant 239 : i32
    %296 = tpu.dynamic_rotate %264 by %c239_i32_119 dim 1 : vector<8x256xf32>, i32 -> vector<8x256xf32>
    %297 = vector.extract_strided_slice %60 {offsets = [8, 0], sizes = [1, 256], strides = [1, 1]} : vector<9x256xf32> to vector<1x256xf32>
    %298 = vector.broadcast %297 : vector<1x256xf32> to vector<8x256xf32>
    %299 = arith.mulf %296, %298 : vector<8x256xf32>
    %300 = tpu.concatenate %268, %272, %276, %280, %283, %287, %291, %295, %299 in 0 : vector<8x256xf32>, vector<8x256xf32>, vector<8x256xf32>, vector<8x256xf32>, vector<8x256xf32>, vector<8x256xf32>, vector<8x256xf32>, vector<8x256xf32>, vector<8x256xf32> -> vector<72x256xf32>
    %cst_120 = arith.constant dense<0.000000e+00> : vector<8x256xf32>
    %301 = tpu.matmul %70, %300, %cst_120 {dimension_numbers = #tpu.dot_dimension_numbers<[1], [0], [0], [1], [0, 0, 1, 1], [], []>} : vector<8x72xf32>, vector<72x256xf32>, vector<8x256xf32> -> vector<8x256xf32>
    %302 = vector.extract_strided_slice %301 {offsets = [0, 0], sizes = [2, 256], strides = [1, 1]} : vector<8x256xf32> to vector<2x256xf32>
    %cst_121 = arith.constant dense<0xFF800000> : vector<256xf32>
    %303 = vector.multi_reduction <maximumf>, %302, %cst_121 [0] : vector<2x256xf32> to vector<256xf32>
    %304 = vector.shape_cast %303 : vector<256xf32> to vector<1x256xf32>
    %305 = vector.broadcast %304 : vector<1x256xf32> to vector<2x256xf32>
    %306 = arith.subf %302, %305 : vector<2x256xf32>
    %307 = math.exp %306 : vector<2x256xf32>
    %cst_122 = arith.constant dense<0.000000e+00> : vector<256xf32>
    %308 = vector.multi_reduction <add>, %307, %cst_122 [0] : vector<2x256xf32> to vector<256xf32>
    %309 = vector.shape_cast %308 : vector<256xf32> to vector<1x256xf32>
    %310 = vector.broadcast %309 : vector<1x256xf32> to vector<2x256xf32>
    %311 = arith.divf %307, %310 : vector<2x256xf32>
    %312 = vector.extract_strided_slice %10 {offsets = [1, 0, 0], sizes = [1, 1, 256], strides = [1, 1, 1]} : vector<2x1x256xf32> to vector<1x1x256xf32>
    %313 = vector.shape_cast %312 : vector<1x1x256xf32> to vector<1x256xf32>
    %314 = vector.extract_strided_slice %12 {offsets = [1, 0, 0], sizes = [1, 1, 256], strides = [1, 1, 1]} : vector<2x1x256xf32> to vector<1x1x256xf32>
    %315 = vector.shape_cast %314 : vector<1x1x256xf32> to vector<1x256xf32>
    %316 = tpu.concatenate %313, %315, %87 in 0 : vector<1x256xf32>, vector<1x256xf32>, vector<6x256xf32> -> vector<8x256xf32>
    %c17_i32_123 = arith.constant 17 : i32
    %317 = tpu.dynamic_rotate %316 by %c17_i32_123 dim 1 : vector<8x256xf32>, i32 -> vector<8x256xf32>
    %318 = vector.extract_strided_slice %60 {offsets = [0, 0], sizes = [1, 256], strides = [1, 1]} : vector<9x256xf32> to vector<1x256xf32>
    %319 = vector.broadcast %318 : vector<1x256xf32> to vector<8x256xf32>
    %320 = arith.mulf %317, %319 : vector<8x256xf32>
    %c16_i32_124 = arith.constant 16 : i32
    %321 = tpu.dynamic_rotate %316 by %c16_i32_124 dim 1 : vector<8x256xf32>, i32 -> vector<8x256xf32>
    %322 = vector.extract_strided_slice %60 {offsets = [1, 0], sizes = [1, 256], strides = [1, 1]} : vector<9x256xf32> to vector<1x256xf32>
    %323 = vector.broadcast %322 : vector<1x256xf32> to vector<8x256xf32>
    %324 = arith.mulf %321, %323 : vector<8x256xf32>
    %c15_i32_125 = arith.constant 15 : i32
    %325 = tpu.dynamic_rotate %316 by %c15_i32_125 dim 1 : vector<8x256xf32>, i32 -> vector<8x256xf32>
    %326 = vector.extract_strided_slice %60 {offsets = [2, 0], sizes = [1, 256], strides = [1, 1]} : vector<9x256xf32> to vector<1x256xf32>
    %327 = vector.broadcast %326 : vector<1x256xf32> to vector<8x256xf32>
    %328 = arith.mulf %325, %327 : vector<8x256xf32>
    %c1_i32_126 = arith.constant 1 : i32
    %329 = tpu.dynamic_rotate %316 by %c1_i32_126 dim 1 : vector<8x256xf32>, i32 -> vector<8x256xf32>
    %330 = vector.extract_strided_slice %60 {offsets = [3, 0], sizes = [1, 256], strides = [1, 1]} : vector<9x256xf32> to vector<1x256xf32>
    %331 = vector.broadcast %330 : vector<1x256xf32> to vector<8x256xf32>
    %332 = arith.mulf %329, %331 : vector<8x256xf32>
    %333 = vector.extract_strided_slice %60 {offsets = [4, 0], sizes = [1, 256], strides = [1, 1]} : vector<9x256xf32> to vector<1x256xf32>
    %334 = vector.broadcast %333 : vector<1x256xf32> to vector<8x256xf32>
    %335 = arith.mulf %316, %334 : vector<8x256xf32>
    %c255_i32_127 = arith.constant 255 : i32
    %336 = tpu.dynamic_rotate %316 by %c255_i32_127 dim 1 : vector<8x256xf32>, i32 -> vector<8x256xf32>
    %337 = vector.extract_strided_slice %60 {offsets = [5, 0], sizes = [1, 256], strides = [1, 1]} : vector<9x256xf32> to vector<1x256xf32>
    %338 = vector.broadcast %337 : vector<1x256xf32> to vector<8x256xf32>
    %339 = arith.mulf %336, %338 : vector<8x256xf32>
    %c241_i32_128 = arith.constant 241 : i32
    %340 = tpu.dynamic_rotate %316 by %c241_i32_128 dim 1 : vector<8x256xf32>, i32 -> vector<8x256xf32>
    %341 = vector.extract_strided_slice %60 {offsets = [6, 0], sizes = [1, 256], strides = [1, 1]} : vector<9x256xf32> to vector<1x256xf32>
    %342 = vector.broadcast %341 : vector<1x256xf32> to vector<8x256xf32>
    %343 = arith.mulf %340, %342 : vector<8x256xf32>
    %c240_i32_129 = arith.constant 240 : i32
    %344 = tpu.dynamic_rotate %316 by %c240_i32_129 dim 1 : vector<8x256xf32>, i32 -> vector<8x256xf32>
    %345 = vector.extract_strided_slice %60 {offsets = [7, 0], sizes = [1, 256], strides = [1, 1]} : vector<9x256xf32> to vector<1x256xf32>
    %346 = vector.broadcast %345 : vector<1x256xf32> to vector<8x256xf32>
    %347 = arith.mulf %344, %346 : vector<8x256xf32>
    %c239_i32_130 = arith.constant 239 : i32
    %348 = tpu.dynamic_rotate %316 by %c239_i32_130 dim 1 : vector<8x256xf32>, i32 -> vector<8x256xf32>
    %349 = vector.extract_strided_slice %60 {offsets = [8, 0], sizes = [1, 256], strides = [1, 1]} : vector<9x256xf32> to vector<1x256xf32>
    %350 = vector.broadcast %349 : vector<1x256xf32> to vector<8x256xf32>
    %351 = arith.mulf %348, %350 : vector<8x256xf32>
    %352 = tpu.concatenate %320, %324, %328, %332, %335, %339, %343, %347, %351 in 0 : vector<8x256xf32>, vector<8x256xf32>, vector<8x256xf32>, vector<8x256xf32>, vector<8x256xf32>, vector<8x256xf32>, vector<8x256xf32>, vector<8x256xf32>, vector<8x256xf32> -> vector<72x256xf32>
    %cst_131 = arith.constant dense<0.000000e+00> : vector<8x256xf32>
    %353 = tpu.matmul %62, %352, %cst_131 {dimension_numbers = #tpu.dot_dimension_numbers<[1], [0], [0], [1], [0, 0, 1, 1], [], []>} : vector<8x72xf32>, vector<72x256xf32>, vector<8x256xf32> -> vector<8x256xf32>
    %354 = vector.broadcast %72 : vector<8x1xf32> to vector<8x256xf32>
    %355 = arith.mulf %353, %354 : vector<8x256xf32>
    %356 = vector.broadcast %80 : vector<8x1xf32> to vector<8x256xf32>
    %357 = arith.addf %355, %356 : vector<8x256xf32>
    %cst_132 = arith.constant 0.000000e+00 : f32
    %358 = vector.broadcast %cst_132 : f32 to vector<8x256xf32>
    %359 = arith.maximumf %357, %358 : vector<8x256xf32>
    %c17_i32_133 = arith.constant 17 : i32
    %360 = tpu.dynamic_rotate %359 by %c17_i32_133 dim 1 : vector<8x256xf32>, i32 -> vector<8x256xf32>
    %361 = vector.extract_strided_slice %60 {offsets = [0, 0], sizes = [1, 256], strides = [1, 1]} : vector<9x256xf32> to vector<1x256xf32>
    %362 = vector.broadcast %361 : vector<1x256xf32> to vector<8x256xf32>
    %363 = arith.mulf %360, %362 : vector<8x256xf32>
    %c16_i32_134 = arith.constant 16 : i32
    %364 = tpu.dynamic_rotate %359 by %c16_i32_134 dim 1 : vector<8x256xf32>, i32 -> vector<8x256xf32>
    %365 = vector.extract_strided_slice %60 {offsets = [1, 0], sizes = [1, 256], strides = [1, 1]} : vector<9x256xf32> to vector<1x256xf32>
    %366 = vector.broadcast %365 : vector<1x256xf32> to vector<8x256xf32>
    %367 = arith.mulf %364, %366 : vector<8x256xf32>
    %c15_i32_135 = arith.constant 15 : i32
    %368 = tpu.dynamic_rotate %359 by %c15_i32_135 dim 1 : vector<8x256xf32>, i32 -> vector<8x256xf32>
    %369 = vector.extract_strided_slice %60 {offsets = [2, 0], sizes = [1, 256], strides = [1, 1]} : vector<9x256xf32> to vector<1x256xf32>
    %370 = vector.broadcast %369 : vector<1x256xf32> to vector<8x256xf32>
    %371 = arith.mulf %368, %370 : vector<8x256xf32>
    %c1_i32_136 = arith.constant 1 : i32
    %372 = tpu.dynamic_rotate %359 by %c1_i32_136 dim 1 : vector<8x256xf32>, i32 -> vector<8x256xf32>
    %373 = vector.extract_strided_slice %60 {offsets = [3, 0], sizes = [1, 256], strides = [1, 1]} : vector<9x256xf32> to vector<1x256xf32>
    %374 = vector.broadcast %373 : vector<1x256xf32> to vector<8x256xf32>
    %375 = arith.mulf %372, %374 : vector<8x256xf32>
    %376 = vector.extract_strided_slice %60 {offsets = [4, 0], sizes = [1, 256], strides = [1, 1]} : vector<9x256xf32> to vector<1x256xf32>
    %377 = vector.broadcast %376 : vector<1x256xf32> to vector<8x256xf32>
    %378 = arith.mulf %359, %377 : vector<8x256xf32>
    %c255_i32_137 = arith.constant 255 : i32
    %379 = tpu.dynamic_rotate %359 by %c255_i32_137 dim 1 : vector<8x256xf32>, i32 -> vector<8x256xf32>
    %380 = vector.extract_strided_slice %60 {offsets = [5, 0], sizes = [1, 256], strides = [1, 1]} : vector<9x256xf32> to vector<1x256xf32>
    %381 = vector.broadcast %380 : vector<1x256xf32> to vector<8x256xf32>
    %382 = arith.mulf %379, %381 : vector<8x256xf32>
    %c241_i32_138 = arith.constant 241 : i32
    %383 = tpu.dynamic_rotate %359 by %c241_i32_138 dim 1 : vector<8x256xf32>, i32 -> vector<8x256xf32>
    %384 = vector.extract_strided_slice %60 {offsets = [6, 0], sizes = [1, 256], strides = [1, 1]} : vector<9x256xf32> to vector<1x256xf32>
    %385 = vector.broadcast %384 : vector<1x256xf32> to vector<8x256xf32>
    %386 = arith.mulf %383, %385 : vector<8x256xf32>
    %c240_i32_139 = arith.constant 240 : i32
    %387 = tpu.dynamic_rotate %359 by %c240_i32_139 dim 1 : vector<8x256xf32>, i32 -> vector<8x256xf32>
    %388 = vector.extract_strided_slice %60 {offsets = [7, 0], sizes = [1, 256], strides = [1, 1]} : vector<9x256xf32> to vector<1x256xf32>
    %389 = vector.broadcast %388 : vector<1x256xf32> to vector<8x256xf32>
    %390 = arith.mulf %387, %389 : vector<8x256xf32>
    %c239_i32_140 = arith.constant 239 : i32
    %391 = tpu.dynamic_rotate %359 by %c239_i32_140 dim 1 : vector<8x256xf32>, i32 -> vector<8x256xf32>
    %392 = vector.extract_strided_slice %60 {offsets = [8, 0], sizes = [1, 256], strides = [1, 1]} : vector<9x256xf32> to vector<1x256xf32>
    %393 = vector.broadcast %392 : vector<1x256xf32> to vector<8x256xf32>
    %394 = arith.mulf %391, %393 : vector<8x256xf32>
    %395 = tpu.concatenate %363, %367, %371, %375, %378, %382, %386, %390, %394 in 0 : vector<8x256xf32>, vector<8x256xf32>, vector<8x256xf32>, vector<8x256xf32>, vector<8x256xf32>, vector<8x256xf32>, vector<8x256xf32>, vector<8x256xf32>, vector<8x256xf32> -> vector<72x256xf32>
    %cst_141 = arith.constant dense<0.000000e+00> : vector<8x256xf32>
    %396 = tpu.matmul %64, %395, %cst_141 {dimension_numbers = #tpu.dot_dimension_numbers<[1], [0], [0], [1], [0, 0, 1, 1], [], []>} : vector<8x72xf32>, vector<72x256xf32>, vector<8x256xf32> -> vector<8x256xf32>
    %397 = vector.broadcast %74 : vector<8x1xf32> to vector<8x256xf32>
    %398 = arith.mulf %396, %397 : vector<8x256xf32>
    %399 = vector.broadcast %82 : vector<8x1xf32> to vector<8x256xf32>
    %400 = arith.addf %398, %399 : vector<8x256xf32>
    %cst_142 = arith.constant 0.000000e+00 : f32
    %401 = vector.broadcast %cst_142 : f32 to vector<8x256xf32>
    %402 = arith.maximumf %400, %401 : vector<8x256xf32>
    %c17_i32_143 = arith.constant 17 : i32
    %403 = tpu.dynamic_rotate %402 by %c17_i32_143 dim 1 : vector<8x256xf32>, i32 -> vector<8x256xf32>
    %404 = vector.extract_strided_slice %60 {offsets = [0, 0], sizes = [1, 256], strides = [1, 1]} : vector<9x256xf32> to vector<1x256xf32>
    %405 = vector.broadcast %404 : vector<1x256xf32> to vector<8x256xf32>
    %406 = arith.mulf %403, %405 : vector<8x256xf32>
    %c16_i32_144 = arith.constant 16 : i32
    %407 = tpu.dynamic_rotate %402 by %c16_i32_144 dim 1 : vector<8x256xf32>, i32 -> vector<8x256xf32>
    %408 = vector.extract_strided_slice %60 {offsets = [1, 0], sizes = [1, 256], strides = [1, 1]} : vector<9x256xf32> to vector<1x256xf32>
    %409 = vector.broadcast %408 : vector<1x256xf32> to vector<8x256xf32>
    %410 = arith.mulf %407, %409 : vector<8x256xf32>
    %c15_i32_145 = arith.constant 15 : i32
    %411 = tpu.dynamic_rotate %402 by %c15_i32_145 dim 1 : vector<8x256xf32>, i32 -> vector<8x256xf32>
    %412 = vector.extract_strided_slice %60 {offsets = [2, 0], sizes = [1, 256], strides = [1, 1]} : vector<9x256xf32> to vector<1x256xf32>
    %413 = vector.broadcast %412 : vector<1x256xf32> to vector<8x256xf32>
    %414 = arith.mulf %411, %413 : vector<8x256xf32>
    %c1_i32_146 = arith.constant 1 : i32
    %415 = tpu.dynamic_rotate %402 by %c1_i32_146 dim 1 : vector<8x256xf32>, i32 -> vector<8x256xf32>
    %416 = vector.extract_strided_slice %60 {offsets = [3, 0], sizes = [1, 256], strides = [1, 1]} : vector<9x256xf32> to vector<1x256xf32>
    %417 = vector.broadcast %416 : vector<1x256xf32> to vector<8x256xf32>
    %418 = arith.mulf %415, %417 : vector<8x256xf32>
    %419 = vector.extract_strided_slice %60 {offsets = [4, 0], sizes = [1, 256], strides = [1, 1]} : vector<9x256xf32> to vector<1x256xf32>
    %420 = vector.broadcast %419 : vector<1x256xf32> to vector<8x256xf32>
    %421 = arith.mulf %402, %420 : vector<8x256xf32>
    %c255_i32_147 = arith.constant 255 : i32
    %422 = tpu.dynamic_rotate %402 by %c255_i32_147 dim 1 : vector<8x256xf32>, i32 -> vector<8x256xf32>
    %423 = vector.extract_strided_slice %60 {offsets = [5, 0], sizes = [1, 256], strides = [1, 1]} : vector<9x256xf32> to vector<1x256xf32>
    %424 = vector.broadcast %423 : vector<1x256xf32> to vector<8x256xf32>
    %425 = arith.mulf %422, %424 : vector<8x256xf32>
    %c241_i32_148 = arith.constant 241 : i32
    %426 = tpu.dynamic_rotate %402 by %c241_i32_148 dim 1 : vector<8x256xf32>, i32 -> vector<8x256xf32>
    %427 = vector.extract_strided_slice %60 {offsets = [6, 0], sizes = [1, 256], strides = [1, 1]} : vector<9x256xf32> to vector<1x256xf32>
    %428 = vector.broadcast %427 : vector<1x256xf32> to vector<8x256xf32>
    %429 = arith.mulf %426, %428 : vector<8x256xf32>
    %c240_i32_149 = arith.constant 240 : i32
    %430 = tpu.dynamic_rotate %402 by %c240_i32_149 dim 1 : vector<8x256xf32>, i32 -> vector<8x256xf32>
    %431 = vector.extract_strided_slice %60 {offsets = [7, 0], sizes = [1, 256], strides = [1, 1]} : vector<9x256xf32> to vector<1x256xf32>
    %432 = vector.broadcast %431 : vector<1x256xf32> to vector<8x256xf32>
    %433 = arith.mulf %430, %432 : vector<8x256xf32>
    %c239_i32_150 = arith.constant 239 : i32
    %434 = tpu.dynamic_rotate %402 by %c239_i32_150 dim 1 : vector<8x256xf32>, i32 -> vector<8x256xf32>
    %435 = vector.extract_strided_slice %60 {offsets = [8, 0], sizes = [1, 256], strides = [1, 1]} : vector<9x256xf32> to vector<1x256xf32>
    %436 = vector.broadcast %435 : vector<1x256xf32> to vector<8x256xf32>
    %437 = arith.mulf %434, %436 : vector<8x256xf32>
    %438 = tpu.concatenate %406, %410, %414, %418, %421, %425, %429, %433, %437 in 0 : vector<8x256xf32>, vector<8x256xf32>, vector<8x256xf32>, vector<8x256xf32>, vector<8x256xf32>, vector<8x256xf32>, vector<8x256xf32>, vector<8x256xf32>, vector<8x256xf32> -> vector<72x256xf32>
    %cst_151 = arith.constant dense<0.000000e+00> : vector<8x256xf32>
    %439 = tpu.matmul %66, %438, %cst_151 {dimension_numbers = #tpu.dot_dimension_numbers<[1], [0], [0], [1], [0, 0, 1, 1], [], []>} : vector<8x72xf32>, vector<72x256xf32>, vector<8x256xf32> -> vector<8x256xf32>
    %440 = vector.broadcast %76 : vector<8x1xf32> to vector<8x256xf32>
    %441 = arith.mulf %439, %440 : vector<8x256xf32>
    %442 = vector.broadcast %84 : vector<8x1xf32> to vector<8x256xf32>
    %443 = arith.addf %441, %442 : vector<8x256xf32>
    %cst_152 = arith.constant 0.000000e+00 : f32
    %444 = vector.broadcast %cst_152 : f32 to vector<8x256xf32>
    %445 = arith.maximumf %443, %444 : vector<8x256xf32>
    %c17_i32_153 = arith.constant 17 : i32
    %446 = tpu.dynamic_rotate %445 by %c17_i32_153 dim 1 : vector<8x256xf32>, i32 -> vector<8x256xf32>
    %447 = vector.extract_strided_slice %60 {offsets = [0, 0], sizes = [1, 256], strides = [1, 1]} : vector<9x256xf32> to vector<1x256xf32>
    %448 = vector.broadcast %447 : vector<1x256xf32> to vector<8x256xf32>
    %449 = arith.mulf %446, %448 : vector<8x256xf32>
    %c16_i32_154 = arith.constant 16 : i32
    %450 = tpu.dynamic_rotate %445 by %c16_i32_154 dim 1 : vector<8x256xf32>, i32 -> vector<8x256xf32>
    %451 = vector.extract_strided_slice %60 {offsets = [1, 0], sizes = [1, 256], strides = [1, 1]} : vector<9x256xf32> to vector<1x256xf32>
    %452 = vector.broadcast %451 : vector<1x256xf32> to vector<8x256xf32>
    %453 = arith.mulf %450, %452 : vector<8x256xf32>
    %c15_i32_155 = arith.constant 15 : i32
    %454 = tpu.dynamic_rotate %445 by %c15_i32_155 dim 1 : vector<8x256xf32>, i32 -> vector<8x256xf32>
    %455 = vector.extract_strided_slice %60 {offsets = [2, 0], sizes = [1, 256], strides = [1, 1]} : vector<9x256xf32> to vector<1x256xf32>
    %456 = vector.broadcast %455 : vector<1x256xf32> to vector<8x256xf32>
    %457 = arith.mulf %454, %456 : vector<8x256xf32>
    %c1_i32_156 = arith.constant 1 : i32
    %458 = tpu.dynamic_rotate %445 by %c1_i32_156 dim 1 : vector<8x256xf32>, i32 -> vector<8x256xf32>
    %459 = vector.extract_strided_slice %60 {offsets = [3, 0], sizes = [1, 256], strides = [1, 1]} : vector<9x256xf32> to vector<1x256xf32>
    %460 = vector.broadcast %459 : vector<1x256xf32> to vector<8x256xf32>
    %461 = arith.mulf %458, %460 : vector<8x256xf32>
    %462 = vector.extract_strided_slice %60 {offsets = [4, 0], sizes = [1, 256], strides = [1, 1]} : vector<9x256xf32> to vector<1x256xf32>
    %463 = vector.broadcast %462 : vector<1x256xf32> to vector<8x256xf32>
    %464 = arith.mulf %445, %463 : vector<8x256xf32>
    %c255_i32_157 = arith.constant 255 : i32
    %465 = tpu.dynamic_rotate %445 by %c255_i32_157 dim 1 : vector<8x256xf32>, i32 -> vector<8x256xf32>
    %466 = vector.extract_strided_slice %60 {offsets = [5, 0], sizes = [1, 256], strides = [1, 1]} : vector<9x256xf32> to vector<1x256xf32>
    %467 = vector.broadcast %466 : vector<1x256xf32> to vector<8x256xf32>
    %468 = arith.mulf %465, %467 : vector<8x256xf32>
    %c241_i32_158 = arith.constant 241 : i32
    %469 = tpu.dynamic_rotate %445 by %c241_i32_158 dim 1 : vector<8x256xf32>, i32 -> vector<8x256xf32>
    %470 = vector.extract_strided_slice %60 {offsets = [6, 0], sizes = [1, 256], strides = [1, 1]} : vector<9x256xf32> to vector<1x256xf32>
    %471 = vector.broadcast %470 : vector<1x256xf32> to vector<8x256xf32>
    %472 = arith.mulf %469, %471 : vector<8x256xf32>
    %c240_i32_159 = arith.constant 240 : i32
    %473 = tpu.dynamic_rotate %445 by %c240_i32_159 dim 1 : vector<8x256xf32>, i32 -> vector<8x256xf32>
    %474 = vector.extract_strided_slice %60 {offsets = [7, 0], sizes = [1, 256], strides = [1, 1]} : vector<9x256xf32> to vector<1x256xf32>
    %475 = vector.broadcast %474 : vector<1x256xf32> to vector<8x256xf32>
    %476 = arith.mulf %473, %475 : vector<8x256xf32>
    %c239_i32_160 = arith.constant 239 : i32
    %477 = tpu.dynamic_rotate %445 by %c239_i32_160 dim 1 : vector<8x256xf32>, i32 -> vector<8x256xf32>
    %478 = vector.extract_strided_slice %60 {offsets = [8, 0], sizes = [1, 256], strides = [1, 1]} : vector<9x256xf32> to vector<1x256xf32>
    %479 = vector.broadcast %478 : vector<1x256xf32> to vector<8x256xf32>
    %480 = arith.mulf %477, %479 : vector<8x256xf32>
    %481 = tpu.concatenate %449, %453, %457, %461, %464, %468, %472, %476, %480 in 0 : vector<8x256xf32>, vector<8x256xf32>, vector<8x256xf32>, vector<8x256xf32>, vector<8x256xf32>, vector<8x256xf32>, vector<8x256xf32>, vector<8x256xf32>, vector<8x256xf32> -> vector<72x256xf32>
    %cst_161 = arith.constant dense<0.000000e+00> : vector<8x256xf32>
    %482 = tpu.matmul %68, %481, %cst_161 {dimension_numbers = #tpu.dot_dimension_numbers<[1], [0], [0], [1], [0, 0, 1, 1], [], []>} : vector<8x72xf32>, vector<72x256xf32>, vector<8x256xf32> -> vector<8x256xf32>
    %483 = vector.broadcast %78 : vector<8x1xf32> to vector<8x256xf32>
    %484 = arith.mulf %482, %483 : vector<8x256xf32>
    %485 = vector.broadcast %86 : vector<8x1xf32> to vector<8x256xf32>
    %486 = arith.addf %484, %485 : vector<8x256xf32>
    %cst_162 = arith.constant 0.000000e+00 : f32
    %487 = vector.broadcast %cst_162 : f32 to vector<8x256xf32>
    %488 = arith.maximumf %486, %487 : vector<8x256xf32>
    %c17_i32_163 = arith.constant 17 : i32
    %489 = tpu.dynamic_rotate %488 by %c17_i32_163 dim 1 : vector<8x256xf32>, i32 -> vector<8x256xf32>
    %490 = vector.extract_strided_slice %60 {offsets = [0, 0], sizes = [1, 256], strides = [1, 1]} : vector<9x256xf32> to vector<1x256xf32>
    %491 = vector.broadcast %490 : vector<1x256xf32> to vector<8x256xf32>
    %492 = arith.mulf %489, %491 : vector<8x256xf32>
    %c16_i32_164 = arith.constant 16 : i32
    %493 = tpu.dynamic_rotate %488 by %c16_i32_164 dim 1 : vector<8x256xf32>, i32 -> vector<8x256xf32>
    %494 = vector.extract_strided_slice %60 {offsets = [1, 0], sizes = [1, 256], strides = [1, 1]} : vector<9x256xf32> to vector<1x256xf32>
    %495 = vector.broadcast %494 : vector<1x256xf32> to vector<8x256xf32>
    %496 = arith.mulf %493, %495 : vector<8x256xf32>
    %c15_i32_165 = arith.constant 15 : i32
    %497 = tpu.dynamic_rotate %488 by %c15_i32_165 dim 1 : vector<8x256xf32>, i32 -> vector<8x256xf32>
    %498 = vector.extract_strided_slice %60 {offsets = [2, 0], sizes = [1, 256], strides = [1, 1]} : vector<9x256xf32> to vector<1x256xf32>
    %499 = vector.broadcast %498 : vector<1x256xf32> to vector<8x256xf32>
    %500 = arith.mulf %497, %499 : vector<8x256xf32>
    %c1_i32_166 = arith.constant 1 : i32
    %501 = tpu.dynamic_rotate %488 by %c1_i32_166 dim 1 : vector<8x256xf32>, i32 -> vector<8x256xf32>
    %502 = vector.extract_strided_slice %60 {offsets = [3, 0], sizes = [1, 256], strides = [1, 1]} : vector<9x256xf32> to vector<1x256xf32>
    %503 = vector.broadcast %502 : vector<1x256xf32> to vector<8x256xf32>
    %504 = arith.mulf %501, %503 : vector<8x256xf32>
    %505 = vector.extract_strided_slice %60 {offsets = [4, 0], sizes = [1, 256], strides = [1, 1]} : vector<9x256xf32> to vector<1x256xf32>
    %506 = vector.broadcast %505 : vector<1x256xf32> to vector<8x256xf32>
    %507 = arith.mulf %488, %506 : vector<8x256xf32>
    %c255_i32_167 = arith.constant 255 : i32
    %508 = tpu.dynamic_rotate %488 by %c255_i32_167 dim 1 : vector<8x256xf32>, i32 -> vector<8x256xf32>
    %509 = vector.extract_strided_slice %60 {offsets = [5, 0], sizes = [1, 256], strides = [1, 1]} : vector<9x256xf32> to vector<1x256xf32>
    %510 = vector.broadcast %509 : vector<1x256xf32> to vector<8x256xf32>
    %511 = arith.mulf %508, %510 : vector<8x256xf32>
    %c241_i32_168 = arith.constant 241 : i32
    %512 = tpu.dynamic_rotate %488 by %c241_i32_168 dim 1 : vector<8x256xf32>, i32 -> vector<8x256xf32>
    %513 = vector.extract_strided_slice %60 {offsets = [6, 0], sizes = [1, 256], strides = [1, 1]} : vector<9x256xf32> to vector<1x256xf32>
    %514 = vector.broadcast %513 : vector<1x256xf32> to vector<8x256xf32>
    %515 = arith.mulf %512, %514 : vector<8x256xf32>
    %c240_i32_169 = arith.constant 240 : i32
    %516 = tpu.dynamic_rotate %488 by %c240_i32_169 dim 1 : vector<8x256xf32>, i32 -> vector<8x256xf32>
    %517 = vector.extract_strided_slice %60 {offsets = [7, 0], sizes = [1, 256], strides = [1, 1]} : vector<9x256xf32> to vector<1x256xf32>
    %518 = vector.broadcast %517 : vector<1x256xf32> to vector<8x256xf32>
    %519 = arith.mulf %516, %518 : vector<8x256xf32>
    %c239_i32_170 = arith.constant 239 : i32
    %520 = tpu.dynamic_rotate %488 by %c239_i32_170 dim 1 : vector<8x256xf32>, i32 -> vector<8x256xf32>
    %521 = vector.extract_strided_slice %60 {offsets = [8, 0], sizes = [1, 256], strides = [1, 1]} : vector<9x256xf32> to vector<1x256xf32>
    %522 = vector.broadcast %521 : vector<1x256xf32> to vector<8x256xf32>
    %523 = arith.mulf %520, %522 : vector<8x256xf32>
    %524 = tpu.concatenate %492, %496, %500, %504, %507, %511, %515, %519, %523 in 0 : vector<8x256xf32>, vector<8x256xf32>, vector<8x256xf32>, vector<8x256xf32>, vector<8x256xf32>, vector<8x256xf32>, vector<8x256xf32>, vector<8x256xf32>, vector<8x256xf32> -> vector<72x256xf32>
    %cst_171 = arith.constant dense<0.000000e+00> : vector<8x256xf32>
    %525 = tpu.matmul %70, %524, %cst_171 {dimension_numbers = #tpu.dot_dimension_numbers<[1], [0], [0], [1], [0, 0, 1, 1], [], []>} : vector<8x72xf32>, vector<72x256xf32>, vector<8x256xf32> -> vector<8x256xf32>
    %526 = vector.extract_strided_slice %525 {offsets = [0, 0], sizes = [2, 256], strides = [1, 1]} : vector<8x256xf32> to vector<2x256xf32>
    %cst_172 = arith.constant dense<0xFF800000> : vector<256xf32>
    %527 = vector.multi_reduction <maximumf>, %526, %cst_172 [0] : vector<2x256xf32> to vector<256xf32>
    %528 = vector.shape_cast %527 : vector<256xf32> to vector<1x256xf32>
    %529 = vector.broadcast %528 : vector<1x256xf32> to vector<2x256xf32>
    %530 = arith.subf %526, %529 : vector<2x256xf32>
    %531 = math.exp %530 : vector<2x256xf32>
    %cst_173 = arith.constant dense<0.000000e+00> : vector<256xf32>
    %532 = vector.multi_reduction <add>, %531, %cst_173 [0] : vector<2x256xf32> to vector<256xf32>
    %533 = vector.shape_cast %532 : vector<256xf32> to vector<1x256xf32>
    %534 = vector.broadcast %533 : vector<1x256xf32> to vector<2x256xf32>
    %535 = arith.divf %531, %534 : vector<2x256xf32>
    %536 = vector.shape_cast %311 : vector<2x256xf32> to vector<1x2x256xf32>
    %537 = vector.shape_cast %535 : vector<2x256xf32> to vector<1x2x256xf32>
    %538 = tpu.concatenate %536, %537 in 0 : vector<1x2x256xf32>, vector<1x2x256xf32> -> vector<2x2x256xf32>
    %c0_174 = arith.constant 0 : index
    %c0_175 = arith.constant 0 : index
    %c0_176 = arith.constant 0 : index
    %539 = vector.load %arg24[%c0_174, %c0_175, %c0_176] : memref<2x2x256xf32, #tpu.memory_space<vmem>>, vector<2x2x256xf32>
    tpu.vector_store %arg24[%c0_174, %c0_175, %c0_176], %538 {strides = array<i32>} : memref<2x2x256xf32, #tpu.memory_space<vmem>>, vector<2x2x256xf32>,
    %c0_177 = arith.constant 0 : index
    %c0_178 = arith.constant 0 : index
    %c0_179 = arith.constant 0 : index
    %540 = vector.load %arg1[%c0_177, %c0_178, %c0_179] : memref<2x32x256xf32, #tpu.memory_space<vmem>>, vector<2x32x256xf32>
    %541 = vector.shape_cast %55 : vector<2x32xf32> to vector<2x32x1xf32>
    %542 = vector.extract_strided_slice %538 {offsets = [0, 0, 0], sizes = [2, 1, 256], strides = [1, 1, 1]} : vector<2x2x256xf32> to vector<2x1x256xf32>
    %543 = vector.broadcast %541 : vector<2x32x1xf32> to vector<2x32x256xf32>
    %544 = vector.broadcast %542 : vector<2x1x256xf32> to vector<2x32x256xf32>
    %545 = arith.addf %543, %544 : vector<2x32x256xf32>
    %546 = arith.mulf %540, %545 : vector<2x32x256xf32>
    %c0_180 = arith.constant 0 : index
    %c0_181 = arith.constant 0 : index
    %c0_182 = arith.constant 0 : index
    %547 = vector.load %arg2[%c0_180, %c0_181, %c0_182] : memref<2x32x256xf32, #tpu.memory_space<vmem>>, vector<2x32x256xf32>
    %548 = vector.shape_cast %56 : vector<2x32xf32> to vector<2x32x1xf32>
    %549 = vector.extract_strided_slice %538 {offsets = [0, 1, 0], sizes = [2, 1, 256], strides = [1, 1, 1]} : vector<2x2x256xf32> to vector<2x1x256xf32>
    %550 = vector.broadcast %548 : vector<2x32x1xf32> to vector<2x32x256xf32>
    %551 = vector.broadcast %549 : vector<2x1x256xf32> to vector<2x32x256xf32>
    %552 = arith.addf %550, %551 : vector<2x32x256xf32>
    %553 = arith.mulf %547, %552 : vector<2x32x256xf32>
    %554 = arith.addf %546, %553 : vector<2x32x256xf32>
    %c0_183 = arith.constant 0 : index
    %c0_184 = arith.constant 0 : index
    %c0_185 = arith.constant 0 : index
    %555 = vector.load %arg3[%c0_183, %c0_184, %c0_185] : memref<2x32x256xf32, #tpu.memory_space<vmem>>, vector<2x32x256xf32>
    %556 = arith.addf %554, %555 : vector<2x32x256xf32>
    %cst_186 = arith.constant dense<0.000000e+00> : vector<2x32xf32>
    %557 = vector.multi_reduction <add>, %556, %cst_186 [2] : vector<2x32x256xf32> to vector<2x32xf32>
    %cst_187 = arith.constant 2.560000e+02 : f32
    %558 = vector.broadcast %cst_187 : f32 to vector<2x32xf32>
    %559 = arith.divf %557, %558 : vector<2x32xf32>
    %cst_188 = arith.constant dense<0xFF800000> : vector<2x32xf32>
    %560 = vector.multi_reduction <maximumf>, %556, %cst_188 [2] : vector<2x32x256xf32> to vector<2x32xf32>
    %561 = tpu.concatenate %559, %560 in 1 : vector<2x32xf32>, vector<2x32xf32> -> vector<2x64xf32>
    %c0_189 = arith.constant 0 : index
    %c0_190 = arith.constant 0 : index
    %562 = vector.load %arg18[%c0_189, %c0_190] : memref<64x8xf32, #tpu.memory_space<vmem>>, vector<64x8xf32>
    %cst_191 = arith.constant dense<0.000000e+00> : vector<2x8xf32>
    %563 = tpu.matmul %561, %562, %cst_191 {dimension_numbers = #tpu.dot_dimension_numbers<[1], [0], [0], [1], [0, 0, 1, 1], [], []>} : vector<2x64xf32>, vector<64x8xf32>, vector<2x8xf32> -> vector<2x8xf32>
    %c0_192 = arith.constant 0 : index
    %c0_193 = arith.constant 0 : index
    %564 = vector.load %arg19[%c0_192, %c0_193] : memref<1x8xf32, #tpu.memory_space<vmem>>, vector<1x8xf32>
    %565 = vector.broadcast %564 : vector<1x8xf32> to vector<2x8xf32>
    %566 = arith.addf %563, %565 : vector<2x8xf32>
    %cst_194 = arith.constant 0.000000e+00 : f32
    %567 = vector.broadcast %cst_194 : f32 to vector<2x8xf32>
    %568 = arith.maximumf %566, %567 : vector<2x8xf32>
    %c0_195 = arith.constant 0 : index
    %c0_196 = arith.constant 0 : index
    %569 = vector.load %arg20[%c0_195, %c0_196] : memref<8x32xf32, #tpu.memory_space<vmem>>, vector<8x32xf32>
    %cst_197 = arith.constant dense<0.000000e+00> : vector<2x32xf32>
    %570 = tpu.matmul %568, %569, %cst_197 {dimension_numbers = #tpu.dot_dimension_numbers<[1], [0], [0], [1], [0, 0, 1, 1], [], []>} : vector<2x8xf32>, vector<8x32xf32>, vector<2x32xf32> -> vector<2x32xf32>
    %c0_198 = arith.constant 0 : index
    %c0_199 = arith.constant 0 : index
    %571 = vector.load %arg21[%c0_198, %c0_199] : memref<1x32xf32, #tpu.memory_space<vmem>>, vector<1x32xf32>
    %572 = vector.broadcast %571 : vector<1x32xf32> to vector<2x32xf32>
    %573 = arith.addf %570, %572 : vector<2x32xf32>
    %cst_200 = arith.constant 0.000000e+00 : f32
    %574 = vector.broadcast %cst_200 : f32 to vector<2x32xf32>
    %575 = arith.subf %574, %573 : vector<2x32xf32>
    %576 = math.exp %575 : vector<2x32xf32>
    %cst_201 = arith.constant 1.000000e+00 : f32
    %577 = vector.broadcast %cst_201 : f32 to vector<2x32xf32>
    %578 = arith.addf %577, %576 : vector<2x32xf32>
    %579 = tpu.reciprocal %578 {approx = true} : vector<2x32xf32> -> vector<2x32xf32>
    %580 = vector.shape_cast %579 : vector<2x32xf32> to vector<2x32x1xf32>
    %581 = vector.broadcast %580 : vector<2x32x1xf32> to vector<2x32x256xf32>
    %582 = arith.mulf %581, %556 : vector<2x32x256xf32>
    %c0_202 = arith.constant 0 : index
    %c0_203 = arith.constant 0 : index
    %c0_204 = arith.constant 0 : index
    %583 = vector.load %arg22[%c0_202, %c0_203, %c0_204] : memref<2x32x256xf32, #tpu.memory_space<vmem>>, vector<2x32x256xf32>
    tpu.vector_store %arg22[%c0_202, %c0_203, %c0_204], %582 {strides = array<i32>} : memref<2x32x256xf32, #tpu.memory_space<vmem>>, vector<2x32x256xf32>,
    return
  }
  func.func @transform_0(%arg0: i32) -> (i32, i32, i32) {
    %c0_i32 = arith.constant 0 : i32
    %c0_i32_0 = arith.constant 0 : i32
    %c0_i32_1 = arith.constant 0 : i32
    return %arg0, %c0_i32, %c0_i32_0 : i32, i32, i32
  }
  func.func @transform_1(%arg0: i32) -> (i32, i32, i32) {
    %c0_i32 = arith.constant 0 : i32
    %c0_i32_0 = arith.constant 0 : i32
    %c0_i32_1 = arith.constant 0 : i32
    return %arg0, %c0_i32, %c0_i32_0 : i32, i32, i32
  }
  func.func @transform_2(%arg0: i32) -> (i32, i32, i32) {
    %c0_i32 = arith.constant 0 : i32
    %c0_i32_0 = arith.constant 0 : i32
    %c0_i32_1 = arith.constant 0 : i32
    return %arg0, %c0_i32, %c0_i32_0 : i32, i32, i32
  }
  func.func @transform_3(%arg0: i32) -> (i32, i32) {
    %c0_i32 = arith.constant 0 : i32
    %c0_i32_0 = arith.constant 0 : i32
    %c0_i32_1 = arith.constant 0 : i32
    return %c0_i32, %c0_i32_0 : i32, i32
  }
  func.func @transform_4(%arg0: i32) -> (i32, i32) {
    %c0_i32 = arith.constant 0 : i32
    %c0_i32_0 = arith.constant 0 : i32
    %c0_i32_1 = arith.constant 0 : i32
    return %c0_i32, %c0_i32_0 : i32, i32
  }
  func.func @transform_5(%arg0: i32) -> (i32, i32) {
    %c0_i32 = arith.constant 0 : i32
    %c0_i32_0 = arith.constant 0 : i32
    %c0_i32_1 = arith.constant 0 : i32
    return %c0_i32, %c0_i32_0 : i32, i32
  }
  func.func @transform_6(%arg0: i32) -> (i32, i32) {
    %c0_i32 = arith.constant 0 : i32
    %c0_i32_0 = arith.constant 0 : i32
    %c0_i32_1 = arith.constant 0 : i32
    return %c0_i32, %c0_i32_0 : i32, i32
  }
  func.func @transform_7(%arg0: i32) -> (i32, i32) {
    %c0_i32 = arith.constant 0 : i32
    %c0_i32_0 = arith.constant 0 : i32
    %c0_i32_1 = arith.constant 0 : i32
    return %c0_i32, %c0_i32_0 : i32, i32
  }
  func.func @transform_8(%arg0: i32) -> (i32, i32) {
    %c0_i32 = arith.constant 0 : i32
    %c0_i32_0 = arith.constant 0 : i32
    %c0_i32_1 = arith.constant 0 : i32
    return %c0_i32, %c0_i32_0 : i32, i32
  }
  func.func @transform_9(%arg0: i32) -> (i32, i32) {
    %c0_i32 = arith.constant 0 : i32
    %c0_i32_0 = arith.constant 0 : i32
    %c0_i32_1 = arith.constant 0 : i32
    return %c0_i32, %c0_i32_0 : i32, i32
  }
  func.func @transform_10(%arg0: i32) -> (i32, i32) {
    %c0_i32 = arith.constant 0 : i32
    %c0_i32_0 = arith.constant 0 : i32
    %c0_i32_1 = arith.constant 0 : i32
    return %c0_i32, %c0_i32_0 : i32, i32
  }
  func.func @transform_11(%arg0: i32) -> (i32, i32) {
    %c0_i32 = arith.constant 0 : i32
    %c0_i32_0 = arith.constant 0 : i32
    %c0_i32_1 = arith.constant 0 : i32
    return %c0_i32, %c0_i32_0 : i32, i32
  }
  func.func @transform_12(%arg0: i32) -> (i32, i32) {
    %c0_i32 = arith.constant 0 : i32
    %c0_i32_0 = arith.constant 0 : i32
    %c0_i32_1 = arith.constant 0 : i32
    return %c0_i32, %c0_i32_0 : i32, i32
  }
  func.func @transform_13(%arg0: i32) -> (i32, i32) {
    %c0_i32 = arith.constant 0 : i32
    %c0_i32_0 = arith.constant 0 : i32
    %c0_i32_1 = arith.constant 0 : i32
    return %c0_i32, %c0_i32_0 : i32, i32
  }
  func.func @transform_14(%arg0: i32) -> (i32, i32, i32) {
    %c0_i32 = arith.constant 0 : i32
    %c0_i32_0 = arith.constant 0 : i32
    %c0_i32_1 = arith.constant 0 : i32
    %c0_i32_2 = arith.constant 0 : i32
    return %c0_i32, %c0_i32_0, %c0_i32_1 : i32, i32, i32
  }
  func.func @transform_15(%arg0: i32) -> (i32, i32, i32) {
    %c0_i32 = arith.constant 0 : i32
    %c0_i32_0 = arith.constant 0 : i32
    %c0_i32_1 = arith.constant 0 : i32
    %c0_i32_2 = arith.constant 0 : i32
    return %c0_i32, %c0_i32_0, %c0_i32_1 : i32, i32, i32
  }
  func.func @transform_16(%arg0: i32) -> (i32, i32, i32) {
    %c0_i32 = arith.constant 0 : i32
    %c0_i32_0 = arith.constant 0 : i32
    %c0_i32_1 = arith.constant 0 : i32
    %c0_i32_2 = arith.constant 0 : i32
    return %c0_i32, %c0_i32_0, %c0_i32_1 : i32, i32, i32
  }
  func.func @transform_17(%arg0: i32) -> (i32, i32) {
    %c0_i32 = arith.constant 0 : i32
    %c0_i32_0 = arith.constant 0 : i32
    %c0_i32_1 = arith.constant 0 : i32
    return %c0_i32, %c0_i32_0 : i32, i32
  }
  func.func @transform_18(%arg0: i32) -> (i32, i32) {
    %c0_i32 = arith.constant 0 : i32
    %c0_i32_0 = arith.constant 0 : i32
    %c0_i32_1 = arith.constant 0 : i32
    return %c0_i32, %c0_i32_0 : i32, i32
  }
  func.func @transform_19(%arg0: i32) -> (i32, i32) {
    %c0_i32 = arith.constant 0 : i32
    %c0_i32_0 = arith.constant 0 : i32
    %c0_i32_1 = arith.constant 0 : i32
    return %c0_i32, %c0_i32_0 : i32, i32
  }
  func.func @transform_20(%arg0: i32) -> (i32, i32) {
    %c0_i32 = arith.constant 0 : i32
    %c0_i32_0 = arith.constant 0 : i32
    %c0_i32_1 = arith.constant 0 : i32
    return %c0_i32, %c0_i32_0 : i32, i32
  }
  func.func @transform_21(%arg0: i32) -> (i32, i32, i32) {
    %c0_i32 = arith.constant 0 : i32
    %c0_i32_0 = arith.constant 0 : i32
    %c0_i32_1 = arith.constant 0 : i32
    return %arg0, %c0_i32, %c0_i32_0 : i32, i32, i32
  }
  func.func @transform_22(%arg0: i32) -> (i32, i32, i32) {
    %c0_i32 = arith.constant 0 : i32
    %c0_i32_0 = arith.constant 0 : i32
    %c0_i32_1 = arith.constant 0 : i32
    return %arg0, %c0_i32, %c0_i32_0 : i32, i32, i32
  }
  func.func @transform_23(%arg0: i32) -> (i32, i32, i32) {
    %c0_i32 = arith.constant 0 : i32
    %c0_i32_0 = arith.constant 0 : i32
    %c0_i32_1 = arith.constant 0 : i32
    return %arg0, %c0_i32, %c0_i32_0 : i32, i32, i32
  }
}

</mosaic_0001>

<bundles_post_ra>
// kernel: squeeze.6
= control target key start
LH: loop header
LB: loop body
LE: loop exit
PB: predicated region body
PF: predicated region fallthrough
CT: control target
= control target key end

     0   :  { %s170_s0 = inlined_call_operand.vmem [shape: f32[4,256], index: 0, kind: input, shape index: {}]   ;;  %s171_s1 = inlined_call_operand.hbm [shape: f32[4,1,16,16], index: 1, kind: output, shape index: {}]  }
   0x1   :  { %v90_v0 = vld [vmem:[%s170_s0 + $0x4] sm:$0xf]  ;;  %v9_v1 = vld [vmem:[%s170_s0] sm:$0xf] }
   0x2   :  { %8 = vst [vmem:[#allocation2 + $0x8] sm:$0xf] %v90_v0 }
   0x3   :  { %10 = vst [vmem:[#allocation2] sm:$0xf] %v9_v1 }
   0x4   :  { %2 = vsyncpa [#allocation1], 0  ;;  %s125_s0 = smov 112   ;;  %s126_s10 = smov 80   ;;  %vm12_vm0 = vcmask 130048  }
   0x5   :  { %s127_s11 = smov 48   ;;  %s128_s12 = smov 96  }
   0x6   :  { %s129_s13 = smov 64   ;;  %s130_s14 = smov 32  }
   0x7   :  { %s131_s15 = smov 16   ;;  %s132_s16 = smov [#allocation0]  }
   0x8   :  { %s81_s17 = sshll.u32 %s132_s16, 4  ;;  %s83_s1 = sshll.u32 %s171_s1, 4  ;;  %s82_s17 = int_to_ptr.vmem [resolvable:$true] %s81_s17  ;;  %s84_s1 = int_to_ptr.hbm [resolvable:$true] %s83_s1 }
   0x9   :  { %v16_v6 = vld [vmem:[#allocation2 + $0x8] sm:$0xf]  }
   0xa   :  { %v22_v2 = vld.sshfl [vmem:[#allocation2] sm:$0xff pattern:$0xb3a29180]   ;;  %19 = vst.msk [vmem:[#allocation0 + $0x8] ss:$16 sm:$0x3] %vm12_vm0, %v16_v6  }
   0xb   :  { %23 = vrot.lane.b32.xlu0 %v22_v2, %s125_s0  ;;  %39 = vrot.lane.b32.xlu1 %v22_v2, %s126_s10  ;;  %v11_v5 = vld [vmem:[#allocation2] sm:$0xf]   ;;  %21 = vst.msk [vmem:[#allocation0 + $0x8] ss:$16 sm:$0xc] %vm12_vm0, %v16_v6  }
   0xc   :  { %55 = vrot.lane.b32.xlu2 %v22_v2, %s127_s11  ;;  %13 = vst.msk [vmem:[#allocation0] ss:$16 sm:$0x3] %vm12_vm0, %v11_v5  }
   0xd   :  { %14 = vst.msk [vmem:[#allocation0] ss:$16 sm:$0xc] %vm12_vm0, %v11_v5  }
  0x13   :  { %31 = vrot.lane.b32.xlu0 %v22_v2, %s128_s12  ;;  %47 = vrot.lane.b32.xlu1 %v22_v2, %s129_s13 }
  0x14   :  { %63 = vrot.lane.b32.xlu2 %v22_v2, %s130_s14 }
  0x1b   :  { %71 = vrot.lane.b32.xlu0 %v22_v2, %s131_s15 }
  0x66   :  { %v56_v3 = vpop.permute.xlu2 %55  }
  0x67   :  { %59 = vst.msk [vmem:[#allocation0 + $0x5] ss:$8 sm:$0xf] %vm12_vm0, %v56_v3  }
  0x68   :  { %61 = vst.msk [vmem:[#allocation0 + $0x5] ss:$8 sm:$0xf0] %vm12_vm0, %v56_v3  }
  0x6e   :  { %v64_v4 = vpop.permute.xlu2 %63  }
  0x6f   :  { %67 = vst.msk [vmem:[#allocation0 + $0x6] ss:$8 sm:$0xf] %vm12_vm0, %v64_v4  }
  0x70   :  { %69 = vst.msk [vmem:[#allocation0 + $0x6] ss:$8 sm:$0xf0] %vm12_vm0, %v64_v4  }
  0x7d   :  { %v24_v7 = vpop.permute.xlu0 %23   ;;  %v40_v8 = vpop.permute.xlu1 %39  }
  0x7e   :  { %27 = vst.msk [vmem:[#allocation0 + $0x1] ss:$8 sm:$0xf] %vm12_vm0, %v24_v7  }
  0x7f   :  { %29 = vst.msk [vmem:[#allocation0 + $0x1] ss:$8 sm:$0xf0] %vm12_vm0, %v24_v7  }
  0x80   :  { %43 = vst.msk [vmem:[#allocation0 + $0x3] ss:$8 sm:$0xf] %vm12_vm0, %v40_v8  }
  0x81   :  { %45 = vst.msk [vmem:[#allocation0 + $0x3] ss:$8 sm:$0xf0] %vm12_vm0, %v40_v8  }
  0x85   :  { %v32_v9 = vpop.permute.xlu0 %31   ;;  %v48_v10 = vpop.permute.xlu1 %47  }
  0x86   :  { %35 = vst.msk [vmem:[#allocation0 + $0x2] ss:$8 sm:$0xf] %vm12_vm0, %v32_v9  }
  0x87   :  { %37 = vst.msk [vmem:[#allocation0 + $0x2] ss:$8 sm:$0xf0] %vm12_vm0, %v32_v9  }
  0x88   :  { %51 = vst.msk [vmem:[#allocation0 + $0x4] ss:$8 sm:$0xf] %vm12_vm0, %v48_v10  }
  0x89   :  { %53 = vst.msk [vmem:[#allocation0 + $0x4] ss:$8 sm:$0xf0] %vm12_vm0, %v48_v10  }
  0x8d   :  { %v72_v11 = vpop.permute.xlu0 %71  }
  0x8e   :  { %75 = vst.msk [vmem:[#allocation0 + $0x7] ss:$8 sm:$0xf] %vm12_vm0, %v72_v11  }
  0x8f   :  { %77 = vst.msk [vmem:[#allocation0 + $0x7] ss:$8 sm:$0xf0] %vm12_vm0, %v72_v11  }
  0x90   :  { %86 = dma.vmem_to_hbm [thread:$0]  %s82_s17, 1024, %s84_s1, [#allocation1]  }
  0x91   :  { %123 = dma.done.wait [#allocation1], 1024  }
  0x92   :  { %124 = vsyncadd [#allocation1], 4294966272 }
  0x93   :  { %89 = vsyncpa [#allocation1], 1 }

// kernel: affm_forward.1
= control target key start
LH: loop header
LB: loop body
LE: loop exit
PB: predicated region body
PF: predicated region fallthrough
CT: control target
= control target key end

     0   :  { %s5502_s0 = inlined_call_operand.vmem [shape: f32[4,32,256], index: 0, kind: input, shape index: {}]   ;;  %s5503_s1 = inlined_call_operand.vmem [shape: f32[4,32,256], index: 1, kind: input, shape index: {}]   ;;  %s5504_s2 = inlined_call_operand.vmem [shape: f32[4,32,256], index: 2, kind: input, shape index: {}]   ;;  %s5505_s3 = inlined_call_operand.vmem [shape: f32[9,256], index: 3, kind: input, shape index: {}]   ;;  %s5506_s4 = inlined_call_operand.vmem [shape: f32[64,8], index: 4, kind: input, shape index: {}]   ;;  %s5507_s5 = inlined_call_operand.vmem [shape: f32[1,8], index: 5, kind: input, shape index: {}]   ;;  %s5508_s6 = inlined_call_operand.vmem [shape: f32[8,64], index: 6, kind: input, shape index: {}]   ;;  %s5509_s7 = inlined_call_operand.vmem [shape: f32[1,64], index: 7, kind: input, shape index: {}]   ;;  %s5510_s8 = inlined_call_operand.vmem [shape: f32[64,128], index: 8, kind: input, shape index: {}]   ;;  %s5511_s9 = inlined_call_operand.vmem [shape: f32[1,128], index: 9, kind: input, shape index: {}]   ;;  %s5512_s10 = inlined_call_operand.vmem [shape: f32[128,128], index: 10, kind: input, shape index: {}]   ;;  %s5513_s11 = inlined_call_operand.vmem [shape: f32[1,128], index: 11, kind: input, shape index: {}]   ;;  %s5514_s12 = inlined_call_operand.vmem [shape: f32[128,64], index: 12, kind: input, shape index: {}]   ;;  %s5515_s13 = inlined_call_operand.vmem [shape: f32[1,64], index: 13, kind: input, shape index: {}]   ;;  %s5516_s14 = inlined_call_operand.vmem [shape: f32[5,8,72], index: 14, kind: input, shape index: {}]   ;;  %s5517_s15 = inlined_call_operand.vmem [shape: f32[4,8,1], index: 15, kind: input, shape index: {}]   ;;  %s5518_s16 = inlined_call_operand.vmem [shape: f32[4,8,1], index: 16, kind: input, shape index: {}]   ;;  %s5519_s17 = inlined_call_operand.vmem [shape: f32[64,8], index: 17, kind: input, shape index: {}]   ;;  %s5520_s18 = inlined_call_operand.vmem [shape: f32[1,8], index: 18, kind: input, shape index: {}]   ;;  %s5521_s19 = inlined_call_operand.vmem [shape: f32[8,32], index: 19, kind: input, shape index: {}]   ;;  %s5522_s20 = inlined_call_operand.vmem [shape: f32[1,32], index: 20, kind: input, shape index: {}]   ;;  %s5523_s21 = inlined_call_operand.vmem [shape: f32[4,32,256], index: 21, kind: output, shape index: {0}]   ;;  %s5524_s22 = inlined_call_operand.vmem [shape: f32[4,1,64], index: 22, kind: output, shape index: {1}]   ;;  %s5525_s23 = inlined_call_operand.vmem [shape: f32[4,2,256], index: 23, kind: output, shape index: {2}]  }
   0x1   :  { %5572 = sst [smem:[#allocation9_spill]] %s5502_s0 }
   0x2   :  { %5573 = sst [smem:[#allocation10_spill]] %s5503_s1 }
   0x3   :  { %5574 = sst [smem:[#allocation11_spill]] %s5504_s2 }
   0x4   :  { %5575 = sst [smem:[#allocation12_spill]] %s5505_s3 }
   0x5   :  { %5576 = sst [smem:[#allocation13_spill]] %s5506_s4  ;;  %s3621_s4 = smov 0  }
   0x6   :  { %5577 = sst [smem:[#allocation14_spill]] %s5507_s5 }
   0x7   :  { %5578 = sst [smem:[#allocation15_spill]] %s5508_s6 }
   0x8   :  { %5579 = sst [smem:[#allocation16_spill]] %s5509_s7 }
   0x9   :  { %5580 = sst [smem:[#allocation17_spill]] %s5510_s8 }
   0xa   :  { %5581 = sst [smem:[#allocation18_spill]] %s5511_s9 }
   0xb   :  { %5582 = sst [smem:[#allocation19_spill]] %s5512_s10 }
   0xc   :  { %5583 = sst [smem:[#allocation20_spill]] %s5519_s17 }
   0xd   :  { %5584 = sst [smem:[#allocation21_spill]] %s5520_s18 }
   0xe   :  { %5585 = sst [smem:[#allocation22_spill]] %s5521_s19 }
   0xf   :  { %5586 = sst [smem:[#allocation23_spill]] %s5522_s20 }
  0x10   :  { %5587 = sst [smem:[#allocation24_spill]] %s5523_s21 }
  0x11 LB: > { %5588 = sst [smem:[#allocation2_spill]] %s3486_s4  ;;  %s3322_s30 = sadd.s32 4294967295, %s3486_s4   ;;  %s3486_s4 = sphi %s3621_s4, %s34_s4  }
  0x12   : > { %p3326_p0 = scmp.ge.s32.totalorder %s3486_s4, 1  ;;  %p668_p1 = scmp.lt.s32.totalorder %s3486_s4, 3 }
  0x14   : > { %p669_p2 = pnand %p3326_p0, %p668_p1 }
  0x16   : > { %672 = sbr.rel (%p669_p2) target bundleno = 3663 (0xe4f), region = 104 }
  0x1b   : > { %s3327_s24 = sshll.u32 %s3322_s30, 1  ;;  %s5589_s26 = sld [smem:[#allocation9_spill]]  ;;  %vm5568_vm2 = vcmask 130112   ;;  %vm5566_vm3 = vcmask 195712   ;;  %vm5567_vm4 = vcmask 392512   ;;  %vm1328_vm5 = vcmask 1040384  }
  0x1c   : > { %p757_p3 = scmp.lt.s32.totalorder %s3327_s24, 3  ;;  %s5590_s7 = sld [smem:[#allocation10_spill]]  ;;  %vm1331_vm6 = vcmask 1041408   ;;  %vm5548_vm7 = vcmask 458112   ;;  %vm5547_vm8 = vcmask 261312   ;;  %vm5546_vm9 = vcmask 523712  }
  0x1d   : > { %s5591_s0 = sld [smem:[#allocation13_spill]]  ;;  %s5538_s27 = smov 111   ;;  %vm5545_vm10 = vcmask 1041409   ;;  %vm5569_vm11 = vcmask 261120   ;;  %vm5565_vm12 = vcmask 523264  }
  0x1e   : > { %s5660_s24 = smov (!%p757_p3, %s3327_s24), 3  ;;  %s5534_s29 = smov 113  }
  0x1f   : > { %s3632_s25 = sshll.u32 %s5660_s24, 6  ;;  %s5536_s3 = smov 127  }
  0x20   : > { %s5532_s30 = smov 1   ;;  %s5530_s5 = smov 15  }
  0x21   : > { %s3638_s2 = scalar_lea.vmem %s5589_s26, %s3632_s25  ;;  %s5541_s1 = smov 16  }
  0x22   : > { %s3644_s28 = scalar_lea.vmem %s5590_s7, %s3632_s25  ;;  %v804_v0 = vld [vmem:[%s3638_s2 + $0x40] sm:$0xff]  ;;  %v805_v1 = vld [vmem:[%s3638_s2 + $0x48] sm:$0xff]  ;;  %v806_v19 = vld [vmem:[%s3638_s2 + $0x50] sm:$0xff]  ;;  %s5528_s7 = smov 112  }
  0x23   : > { %v820_v2 = vld [vmem:[%s3644_s28 + $0x40] sm:$0xff]  ;;  %v821_v3 = vld [vmem:[%s3644_s28 + $0x48] sm:$0xff]  ;;  %v807_v20 = vld [vmem:[%s3638_s2 + $0x58] sm:$0xff]  ;;  %s5543_s26 = smov 17   ;;  %s5599_s8 = sld [smem:[#allocation17_spill]] }
  0x24   : > { %v3650_v4 = vadd.f32 %v820_v2, %v804_v0  ;;  %v796_v5 = vld [vmem:[%s3638_s2] sm:$0xff]  ;;  %v797_v6 = vld [vmem:[%s3638_s2 + $0x8] sm:$0xff]  ;;  %v3654_v7 = vadd.f32 %v821_v3, %v805_v1  ;;  %v822_v21 = vld [vmem:[%s3644_s28 + $0x50] sm:$0xff]  ;;  %s5600_s6 = sld [smem:[#allocation12_spill]]  ;;  %s5612_s20 = smov 17  }
  0x25   : > { %v812_v8 = vld [vmem:[%s3644_s28] sm:$0xff]  ;;  %v813_v9 = vld [vmem:[%s3644_s28 + $0x8] sm:$0xff]  ;;  %v823_v23 = vld [vmem:[%s3644_s28 + $0x58] sm:$0xff]  ;;  %v3678_v24 = vadd.f32 %v822_v21, %v806_v19  ;;  %s5602_s10 = sld [smem:[#allocation19_spill]] }
  0x26   : > { %v800_v10 = vld [vmem:[%s3638_s2 + $0x20] sm:$0xff]  ;;  %v3659_v11 = vadd.f32 %v812_v8, %v796_v5  ;;  %v3661_v12 = vadd.f32 %v813_v9, %v797_v6  ;;  %v801_v13 = vld [vmem:[%s3638_s2 + $0x28] sm:$0xff]  ;;  %v856_v16 = vadd.f32 %v3654_v7, %v3650_v4  ;;  %v798_v25 = vld [vmem:[%s3638_s2 + $0x10] sm:$0xff]  ;;  %v3684_v28 = vadd.f32 %v823_v23, %v807_v20  ;;  %s5603_s4 = sld [smem:[#allocation16_spill]] }
  0x27   : > { %v816_v14 = vld [vmem:[%s3644_s28 + $0x20] sm:$0xff]  ;;  %v817_v15 = vld [vmem:[%s3644_s28 + $0x28] sm:$0xff]  ;;  %v799_v26 = vld [vmem:[%s3638_s2 + $0x18] sm:$0xff]  ;;  %v925_v32 = vadd.f32 %v3678_v24, %v3650_v4  ;;  %v972_v33 = vmax.f32 %v3650_v4, %v3678_v24  ;;  %v895_v23 = vmax.f32 %v3650_v4, %v3654_v7  ;;  %s5611_s9 = sld [smem:[#allocation18_spill]] }
  0x28   : > { %v3668_v17 = vadd.f32 %v816_v14, %v800_v10  ;;  %v3670_v18 = vadd.f32 %v817_v15, %v801_v13  ;;  %v844_v22 = vadd.f32 %v3661_v12, %v3659_v11  ;;  %857 = vadd.xlane.f32.xlu1 %v856_v16  ;;  %v814_v29 = vld [vmem:[%s3644_s28 + $0x10] sm:$0xff]  ;;  %v815_v30 = vld [vmem:[%s3644_s28 + $0x18] sm:$0xff]  ;;  %v808_v31 = vld [vmem:[%s3638_s2 + $0x60] sm:$0xff]  ;;  %v859_v39 = vadd.f32 %v3684_v28, %v3678_v24  ;;  %s5629_s21 = sld [smem:[#allocation11_spill]] }
  0x29   : > { %v830_v34 = vadd.f32 %v814_v29, %v798_v25  ;;  %v831_v35 = vadd.f32 %v815_v30, %v799_v26  ;;  %v809_v36 = vld [vmem:[%s3638_s2 + $0x68] sm:$0xff]  ;;  %v824_v37 = vld [vmem:[%s3644_s28 + $0x60] sm:$0xff]  ;;  %v934_v40 = vadd.f32 %v3684_v28, %v3654_v7  ;;  %v981_v41 = vmax.f32 %v3654_v7, %v3684_v28  ;;  %v810_v43 = vld [vmem:[%s3638_s2 + $0x70] sm:$0xff]  ;;  %s5656_s18 = sld [smem:[#allocation23_spill]] }
  0x2a   : > { %v850_v27 = vadd.f32 %v3670_v18, %v3668_v17  ;;  %845 = vadd.xlane.f32.xlu0 %v844_v22  ;;  %v825_v38 = vld [vmem:[%s3644_s28 + $0x68] sm:$0xff]  ;;  %v840_v42 = vadd.f32 %v824_v37, %v808_v31  ;;  %v826_v44 = vld [vmem:[%s3644_s28 + $0x70] sm:$0xff]  ;;  %v811_v53 = vld [vmem:[%s3638_s2 + $0x78] sm:$0xff]  ;;  %v883_v22 = vmax.f32 %v3659_v11, %v3661_v12  ;;  %v898_v26 = vmax.f32 %v3678_v24, %v3684_v28 }
  0x2b   : > { %v847_v45 = vadd.f32 %v831_v35, %v830_v34  ;;  %v907_v46 = vadd.f32 %v830_v34, %v3659_v11  ;;  %v916_v47 = vadd.f32 %v831_v35, %v3661_v12  ;;  %v954_v48 = vmax.f32 %v3659_v11, %v830_v34  ;;  %v827_v54 = vld [vmem:[%s3644_s28 + $0x78] sm:$0xff]  ;;  %v802_v55 = vld [vmem:[%s3638_s2 + $0x30] sm:$0xff]  ;;  %v1061_v28 = vld [vmem:[%s5591_s0 + $0x28] sm:$0xff] }
  0x2c   : > { %851 = vadd.xlane.f32.xlu2 %v850_v27  ;;  %v963_v49 = vmax.f32 %v3661_v12, %v831_v35  ;;  %v841_v50 = vadd.f32 %v825_v38, %v809_v36  ;;  %v926_v51 = vadd.f32 %v925_v32, %v840_v42  ;;  %v973_v52 = vmax.f32 %v972_v33, %v840_v42  ;;  %v803_v60 = vld [vmem:[%s3638_s2 + $0x38] sm:$0xff]  ;;  %v818_v61 = vld [vmem:[%s3644_s28 + $0x30] sm:$0xff]  ;;  %v1060_v31 = vld [vmem:[%s5591_s0 + $0x20] sm:$0xff] }
  0x2d   : > { %v908_v56 = vadd.f32 %v907_v46, %v3668_v17  ;;  %v917_v57 = vadd.f32 %v916_v47, %v3670_v18  ;;  %v955_v58 = vmax.f32 %v954_v48, %v3668_v17  ;;  %v842_v59 = vadd.f32 %v826_v44, %v810_v43  ;;  %v819_v62 = vld [vmem:[%s3644_s28 + $0x38] sm:$0xff]  ;;  %v1062_v24 = vld [vmem:[%s5591_s0 + $0x30] sm:$0xff]  ;;  %v1057_v44 = vld [vmem:[%s5591_s0 + $0x8] sm:$0xff] }
  0x2e   : > { %v964_v63 = vmax.f32 %v963_v49, %v3670_v18  ;;  %v862_v0 = vadd.f32 %v841_v50, %v840_v42  ;;  %v935_v1 = vadd.f32 %v934_v40, %v841_v50  ;;  %v982_v2 = vmax.f32 %v981_v41, %v841_v50  ;;  %v1063_v4 = vld [vmem:[%s5591_s0 + $0x38] sm:$0xff]  ;;  %v1058_v40 = vld [vmem:[%s5591_s0 + $0x10] sm:$0xff]  ;;  %v1056_v48 = vld [vmem:[%s5591_s0] sm:$0xff] }
  0x2f   : > { %v843_v3 = vadd.f32 %v827_v54, %v811_v53  ;;  %v3718_v5 = vadd.f32 %v926_v51, %v842_v59  ;;  %v3720_v6 = vmax.f32 %v973_v52, %v842_v59  ;;  %v834_v8 = vadd.f32 %v818_v61, %v802_v55  ;;  %1080 = vmatpush.msra.mxu0 %v1063_v4  ;;  %v1059_v32 = vld [vmem:[%s5591_s0 + $0x18] sm:$0xff]  ;;  %s5601_s0 = sld [smem:[#allocation14_spill]] }
  0x30   : > { %860 = vadd.xlane.f32.xlu1 %v859_v39  ;;  %v835_v9 = vadd.f32 %v819_v62, %v803_v60  ;;  %v886_v25 = vmax.f32 %v830_v34, %v831_v35  ;;  %v901_v27 = vmax.f32 %v840_v42, %v841_v50  ;;  %v889_v29 = vmax.f32 %v3668_v17, %v3670_v18 }
  0x31   : > { %v3722_v10 = vadd.f32 %v935_v1, %v843_v3  ;;  %v3724_v13 = vmax.f32 %v982_v2, %v843_v3  ;;  %v909_v14 = vadd.f32 %v908_v56, %v834_v8  ;;  %v956_v16 = vmax.f32 %v955_v58, %v834_v8  ;;  %1081 = vmatpush.msra.mxu0 %v1062_v24 }
  0x32   : > { %848 = vadd.xlane.f32.xlu0 %v847_v45  ;;  %v918_v15 = vadd.f32 %v917_v57, %v835_v9  ;;  %v865_v19 = vadd.f32 %v843_v3, %v842_v59  ;;  %v965_v20 = vmax.f32 %v964_v63, %v835_v9  ;;  %v853_v21 = vadd.f32 %v835_v9, %v834_v8 }
  0x33   : > { %v892_v30 = vmax.f32 %v834_v8, %v835_v9  ;;  %v904_v11 = vmax.f32 %v842_v59, %v843_v3  ;;  %v3488_v17 = vmov 256.0   ;;  %1082 = vmatpush.msra.mxu0 %v1061_v28  ;;  %v910_v33 = vrot.slane %v909_v14, 4 }
  0x34   : > { %863 = vadd.xlane.f32.xlu2 %v862_v0  ;;  %3441 = vrcp.f32 %v3488_v17  ;;  %v919_v34 = vrot.slane %v918_v15, 4  ;;  %v957_v35 = vrot.slane %v956_v16, 4  ;;  %v966_v36 = vrot.slane %v965_v20, 4 }
  0x35   : > { %1083 = vmatpush.msra.mxu0 %v1060_v31  ;;  %v911_v41 = vadd.f32 %v910_v33, %v909_v14  ;;  %v3489_v55 = vmov 32.0   ;;  %v5552_v2 = vlaneseq }
  0x36   : > { %v920_v42 = vadd.f32 %v919_v34, %v918_v15  ;;  %v958_v45 = vmax.f32 %v956_v16, %v957_v35  ;;  %v967_v46 = vmax.f32 %v965_v20, %v966_v36  ;;  %3443 = vrcp.f32 %v3489_v55 }
  0x37   : > { %1084 = vmatpush.msra.mxu0 %v1059_v32  ;;  %v912_v49 = vrot.slane %v911_v41, 2 }
  0x38   : > { %866 = vadd.xlane.f32.xlu1 %v865_v19  ;;  %v921_v50 = vrot.slane %v920_v42, 2  ;;  %v959_v51 = vrot.slane %v958_v45, 2  ;;  %v968_v52 = vrot.slane %v967_v46, 2 }
  0x39   : > { %1085 = vmatpush.msra.mxu0 %v1058_v40  ;;  %v913_v57 = vadd.f32 %v912_v49, %v911_v41 }
  0x3a   : > { %854 = vadd.xlane.f32.xlu0 %v853_v21  ;;  %v3442_v37 = vpop.eup %3441  ;;  %v922_v58 = vadd.f32 %v921_v50, %v920_v42  ;;  %v960_v60 = vmax.f32 %v958_v45, %v959_v51  ;;  %v969_v61 = vmax.f32 %v967_v46, %v968_v52  ;;  %v3771_v21 = vand.u32 127, %v5552_v2 }
  0x3b   : > { %v869_v47 = vmul.f32 256.0, %v3442_v37  ;;  %1086 = vmatpush.msra.mxu0 %v1057_v44  ;;  %v914_v0 = vrot.slane %v913_v57, 1  ;;  %vm873_vm0 = vweird.f32 %v3442_v37 }
  0x3c   : > { %884 = vmax.xlane.f32.xlu2 %v883_v22  ;;  %v3444_v63 = vpop.eup %3443  ;;  %v923_v1 = vrot.slane %v922_v58, 1  ;;  %v961_v3 = vrot.slane %v960_v60, 1  ;;  %v970_v8 = vrot.slane %v969_v61, 1  ;;  %v3783_v4 = vadd.s32 4294967288, %v3771_v21 }
  0x3d   : > { %1087 = vmatpush.msra.mxu0 %v1056_v48  ;;  %v870_v53 = vsub.f32 1.0, %v869_v47  ;;  %v944_v14 = vmul.f32 32.0, %v3444_v63  ;;  %v915_v19 = vadd.f32 %v914_v0, %v913_v57  ;;  %vm948_vm1 = vweird.f32 %v3444_v63 }
  0x3e   : > { %v924_v20 = vadd.f32 %v923_v1, %v922_v58  ;;  %v3788_v31 = vadd.s32 4294967272, %v3771_v21  ;;  %v3791_v32 = vadd.s32 4294967264, %v3771_v21  ;;  %v3799_v34 = vadd.s32 4294967248, %v3771_v21 }
  0x3f   : > { %v871_v62 = vmul.f32 %v3442_v37, %v870_v53  ;;  %v945_v16 = vsub.f32 1.0, %v944_v14  ;;  %v3820_v49 = vadd.s32 4294967240, %v3771_v21  ;;  %vm1419_vm13 = vcmp.lt.s32.totalorder %v3771_v21, 111 }
  0x40   : > { %896 = vmax.xlane.f32.xlu1 %v895_v23  ;;  %v962_v23 = vmax.f32 %v960_v60, %v961_v3  ;;  %5593 = vst [vmem:[#allocation4_spill] sm:$0xff] %v3788_v31  ;;  %vm1408_vm14 = vcmp.lt.s32.totalorder %v3771_v21, 112  ;;  %vm1397_vm15 = vcmp.lt.s32.totalorder %v3771_v21, 113 }
  0x41   : > { %v872_v9 = vadd.f32 %v3442_v37, %v871_v62  ;;  %5594 = vst [vmem:[#allocation5_spill] sm:$0xff] %v3791_v32 }
  0x42   : > { %887 = vmax.xlane.f32.xlu0 %v886_v25  ;;  %v971_v25 = vmax.f32 %v969_v61, %v970_v8  ;;  %5596 = vst [vmem:[#allocation7_spill] sm:$0xff] %v3799_v34 }
  0x43   : > { %5597 = vst [vmem:[#allocation8_spill] sm:$0xff] %v3820_v49 }
  0x44   : > { %899 = vmax.xlane.f32.xlu2 %v898_v26  ;;  %v3775_v26 = vsel %vm873_vm0, %v3442_v37, %v872_v9  ;;  %vm1386_vm0 = vcmp.lt.s32.totalorder %v3771_v21, 127 }
  0x48   : > { %902 = vmax.xlane.f32.xlu1 %v901_v27 }
  0x4a   : > { %890 = vmax.xlane.f32.xlu0 %v889_v29  ;;  %v946_v29 = vmul.f32 %v3444_v63, %v945_v16 }
  0x4c   : > { %893 = vmax.xlane.f32.xlu2 %v892_v30  ;;  %v947_v28 = vadd.f32 %v3444_v63, %v946_v29 }
  0x4e   : > { %v3801_v35 = vsel %vm948_vm1, %v3444_v63, %v947_v28  ;;  %v1129_v28 = vld [vmem:[%s5599_s8 + $0x38] sm:$0xff]  ;;  %vm1371_vm1 = vcmp.lt.s32.totalorder %v3771_v21, 1 }
  0x4f   : > { %v950_v37 = vmul.f32 %v3801_v35, %v915_v19  ;;  %1145 = vmatpush.msra.mxu2 %v1129_v28 }
  0x51   : > { %v1329_v46 = vsel %vm1328_vm5, %v950_v37, %v962_v23  ;;  %v3905_v37 = vld [vmem:[%s5600_s6 + $0x10] ss:$0 sm:$0xff] }
  0x52   : > { %905 = vmax.xlane.f32.xlu0 %v904_v11  ;;  %v3780_v11 = vadd.s32 4294967280, %v3771_v21  ;;  %v3823_v50 = vsel %vm1331_vm6, %v1329_v46, 0.0  ;;  %v3928_v46 = vld [vmem:[%s5600_s6 + $0x8] sm:$0xff] }
  0x54   : > { %5592 = vst [vmem:[#allocation3_spill] sm:$0xff] %v3780_v11 }
  0x61   : > { %1415 = vrot.lane.b32.xlu1 %v3823_v50, %s5538_s27 }
  0x66   : > { %1404 = vrot.lane.b32.xlu0 %v3823_v50, %s5528_s7 }
  0x69   : > { %1393 = vrot.lane.b32.xlu1 %v3823_v50, %s5534_s29 }
  0x9b   : > { %v3737_v7 = vpop.xlane.xlu1 %857 }
  0x9c   : > { %v879_v30 = vmul.f32 %v3775_v26, %v3737_v7  ;;  %v3794_v7 = vadd.s32 4294967256, %v3771_v21 }
  0x9d   : > { %v3739_v12 = vpop.xlane.xlu0 %845 }
  0x9e   : > { %5595 = vst [vmem:[#allocation6_spill] sm:$0xff] %v3794_v7  ;;  %v875_v33 = vmul.f32 %v3775_v26, %v3739_v12  ;;  %v1013_v36 = vperm.slane %v879_v30, %v3771_v21 }
  0x9f   : > { %v3744_v18 = vpop.xlane.xlu2 %851 }
  0xa0   : > { %v1000_v48 = vperm.slane %v875_v33, %v3771_v21  ;;  %v1128_v33 = vld [vmem:[%s5599_s8 + $0x30] sm:$0xff] }
  0xa1   : > { %1146 = vmatpush.msra.mxu2 %v1128_v33 }
  0xa3   : > { %v861_v38 = vpop.xlane.xlu1 %860 }
  0xa4   : > { %v880_v24 = vmul.f32 %v3775_v26, %v861_v38  ;;  %v951_v38 = vmul.f32 %v3801_v35, %v924_v20 }
  0xa5   : > { %v849_v39 = vpop.xlane.xlu0 %848 }
  0xa6   : > { %v876_v17 = vmul.f32 %v3775_v26, %v849_v39  ;;  %v877_v39 = vmul.f32 %v3775_v26, %v3744_v18  ;;  %v1014_v40 = vperm.slane %v880_v24, %v3783_v4  ;;  %v1330_v47 = vsel %vm1328_vm5, %v951_v38, %v971_v25  ;;  %v3910_v38 = vld [vmem:[%s5600_s6] sm:$0xff] }
  0xa7   : > { %v3758_v43 = vpop.xlane.xlu2 %863 }
  0xa8   : > { %v1002_v12 = vperm.slane %v876_v17, %v3783_v4  ;;  %v881_v41 = vmul.f32 %v3775_v26, %v3758_v43  ;;  %v1006_v55 = vperm.slane %v877_v39, %v3780_v11  ;;  %v1126_v39 = vld [vmem:[%s5599_s8 + $0x20] sm:$0xff] }
  0xaa   : > { %v1004_v60 = vsel %vm5568_vm2, %v1002_v12, %v1000_v48  ;;  %v1124_v48 = vld [vmem:[%s5599_s8 + $0x10] sm:$0xff] }
  0xab   : > { %v867_v54 = vpop.xlane.xlu1 %866 }
  0xac   : > { %v882_v44 = vmul.f32 %v3775_v26, %v867_v54  ;;  %v3835_v54 = vsel %vm1331_vm6, %v1330_v47, 0.0 }
  0xad   : > { %v855_v56 = vpop.xlane.xlu0 %854  ;;  %1417 = vrot.lane.b32.xlu2 %v3835_v54, %s5538_s27  ;;  %1395 = vrot.lane.b32.xlu0 %v3835_v54, %s5534_s29  ;;  %s5610_s29 = smov 1  }
  0xae   : > { %v878_v45 = vmul.f32 %v3775_v26, %v855_v56  ;;  %v1016_v56 = vperm.slane %v881_v41, %v3780_v11  ;;  %v1018_v61 = vperm.slane %v882_v44, %v3788_v31  ;;  %1384 = vrot.lane.b32.xlu1 %v3835_v54, %s5536_s3  ;;  %v1125_v41 = vld [vmem:[%s5599_s8 + $0x18] sm:$0xff]  ;;  %v3922_v44 = vperm.slane %v3910_v38, 7 }
  0xaf   : > { %v3766_v59 = vpop.xlane.xlu2 %884 }
  0xb0   : > { %v1032_v18 = vperm.slane %v3766_v59, %v3791_v32  ;;  %v1015_v59 = vsel %vm5568_vm2, %v1014_v40, %v1013_v36  ;;  %v1010_v62 = vperm.slane %v878_v45, %v3788_v31  ;;  %v1127_v36 = vld [vmem:[%s5599_s8 + $0x28] sm:$0xff] }
  0xb1   : > { %v1017_v8 = vsel %vm5566_vm3, %v1016_v56, %v1015_v59  ;;  %1147 = vmatpush.msra.mxu2 %v1127_v36 }
  0xb2   : > { %v1019_v20 = vsel %vm5547_vm8, %v1018_v61, %v1017_v8 }
  0xb3   : > { %v3773_v22 = vpop.xlane.xlu1 %896  ;;  %1148 = vmatpush.msra.mxu2 %v1126_v39 }
  0xb4   : > { %v1045_v43 = vperm.slane %v3773_v22, %v3791_v32 }
  0xb5   : > { %v3768_v15 = vpop.xlane.xlu0 %887  ;;  %1406 = vrot.lane.b32.xlu2 %v3835_v54, %s5528_s7  ;;  %1367 = vrot.lane.b32.xlu0 %v3823_v50, %s5532_s30  ;;  %s5608_s7 = smov 16  }
  0xb6   : > { %v1034_v51 = vperm.slane %v3768_v15, %v3794_v7  ;;  %v1008_v15 = vsel %vm5566_vm3, %v1006_v55, %v1004_v60  ;;  %1356 = vrot.lane.b32.xlu1 %v3823_v50, %s5530_s5  ;;  %1149 = vmatpush.msra.mxu2 %v1125_v41  ;;  %v3947_v55 = vperm.slane %v3928_v46, 7  ;;  %v3960_v60 = vperm.slane %v3928_v46, 6 }
  0xb7   : > { %v900_v27 = vpop.xlane.xlu2 %899  ;;  %v1012_v19 = vsel %vm5547_vm8, %v1010_v62, %v1008_v15  ;;  %vm1349_vm8 = vcmp.lt.s32.totalorder %v3771_v21, 16 }
  0xb8   : > { %v1046_v52 = vperm.slane %v900_v27, %v3794_v7  ;;  %v1036_v0 = vsel %vm5567_vm4, %v1034_v51, %v1032_v18  ;;  %v1021_v27 = vsel %vm5545_vm10, %v1019_v20, %v1012_v19  ;;  %v3936_v18 = vld [vmem:[%s5600_s6 + $0x18] ss:$0 sm:$0xff]  ;;  %1150 = vmatpush.msra.mxu2 %v1124_v48  ;;  %v3977_v19 = vperm.slane %v3910_v38, 5 }
  0xb9   : > { %v3980_v20 = vperm.slane %v3910_v38, 4  ;;  %v4019_v48 = vperm.slane %v3928_v46, 2 }
  0xba   : > { %v1047_v1 = vsel %vm5567_vm4, %v1046_v52, %v1045_v43  ;;  %v1123_v52 = vld [vmem:[%s5599_s8 + $0x8] sm:$0xff] }
  0xbb   : > { %v903_v53 = vpop.xlane.xlu1 %902  ;;  %1151 = vmatpush.msra.mxu2 %v1123_v52  ;;  %v1380_v33 = vmul.f32 %v3980_v20, %v3823_v50 }
  0xbc   : > { %v1048_v63 = vperm.slane %v903_v53, %v3799_v34 }
  0xbd   : > { %v891_v42 = vpop.xlane.xlu0 %890  ;;  %1382 = vrot.lane.b32.xlu2 %v3823_v50, %s5536_s3  ;;  %1358 = vrot.lane.b32.xlu0 %v3835_v54, %s5530_s5  ;;  %s5598_s5 = sld [smem:[#allocation15_spill]] }
  0xbe   : > { %v1038_v57 = vperm.slane %v891_v42, %v3799_v34  ;;  %v1049_v22 = vsel %vm5548_vm7, %v1048_v63, %v1047_v1  ;;  %1347 = vrot.lane.b32.xlu1 %v3835_v54, %s5541_s1  ;;  %v1314_v63 = vld [vmem:[%s5517_s15] sm:$0xff]  ;;  %s5630_s3 = sld [smem:[#allocation20_spill]] }
  0xbf   : > { %v894_v58 = vpop.xlane.xlu2 %893 }
  0xc0   : > { %v1042_v3 = vperm.slane %v894_v58, %v3820_v49  ;;  %v1040_v9 = vsel %vm5548_vm7, %v1038_v57, %v1036_v0  ;;  %v3953_v57 = vperm.slane %v3910_v38, 6  ;;  %v1122_v58 = vld [vmem:[%s5599_s8] sm:$0xff]  ;;  %vm5571_vm7 = vcmp.lt.s32.totalorder %v3771_v21, 17  ;;  %s5605_s8 = smov 127  }
  0xc1   : > { %v1321_v0 = vld [vmem:[%s5518_s16] sm:$0xff]  ;;  %1152 = vmatpush.msra.mxu2 %v1122_v58 }
  0xc2   : > { %v1044_v23 = vsel %vm5546_vm9, %v1042_v3, %v1040_v9  ;;  %v3498_v9 = vmov 0  }
  0xc3   : > { %v1093_v24 = vld [vmem:[%s5598_s5] sm:$0xff]  ;;  %3406 = vset.pattern.permute.xlu1 %v3498_v9  ;;  %3407 = vset.pattern.permute.xlu0 %v3498_v9  ;;  %s5609_s5 = smov 15  }
  0xc4   : > { %1117 = vmatpush.msra.mxu1 %v1093_v24  ;;  %3408 = vset.pattern.permute.xlu2 %v3498_v9  ;;  %v3994_v24 = vperm.slane %v3910_v38, 3  ;;  %v4039_v9 = vperm.slane %v3910_v38, 0 }
  0xc5   : > { %v906_v14 = vpop.xlane.xlu0 %905  ;;  %1369 = vrot.lane.b32.xlu2 %v3835_v54, %s5532_s30  ;;  %1334 = vrot.lane.b32.xlu0 %v3823_v50, %s5543_s26 }
  0xc6   : > { %v1050_v16 = vperm.slane %v906_v14, %v3820_v49  ;;  %1472 = vperm.xlu1 %3406, %v1314_v63   ;;  %v4030_v63 = vperm.slane %v3910_v38, 1 }
  0xc8   : > { %v1051_v25 = vsel %vm5546_vm9, %v1050_v16, %v1049_v22  ;;  %v3983_v22 = vperm.slane %v3928_v46, 5  ;;  %vm5549_vm9 = vcmask 64512  }
  0xc9   : > { %v1052_v29 = vsel %vm5545_vm10, %v1051_v25, %v1044_v23  ;;  %v3986_v23 = vperm.slane %v3928_v46, 4  ;;  %vm1360_vm10 = vcmp.lt.s32.totalorder %v3771_v21, 15 }
  0xca   : > { %v1055_v30 = vsel %vm5569_vm11, %v1021_v27, %v1052_v29 }
  0xcb   : > { %3343 = vmatmul.msk.f32.vlgmr.msra.gmra.mxu0 %vm5565_vm12, %v1055_v30  ;;  %v1381_v39 = vmul.f32 %v3986_v23, %v3835_v54 }
  0xcd   : > { %1345 = vrot.lane.b32.xlu2 %v3823_v50, %s5541_s1  ;;  %1479 = vperm.xlu0 %3407, %v1321_v0   ;;  %v4033_v0 = vperm.slane %v3928_v46, 1  ;;  %s5606_s1 = smov 113  }
  0xd3   : > { %v1416_v40 = vpop.permute.xlu1 %1415 }
  0xd5   : > { %1336 = vrot.lane.b32.xlu2 %v3835_v54, %s5543_s26  ;;  %v4016_v54 = vperm.slane %v3910_v38, 2  ;;  %v4051_v38 = vld [vmem:[%s5516_s14] sm:$0xff]  ;;  %s5607_s26 = smov 112  }
  0xd8   : > { %v1405_v12 = vpop.permute.xlu0 %1404 }
  0xdb   : > { %v1394_v61 = vpop.permute.xlu1 %1393 }
 0x107   : > { %v1418_v17 = vpop.permute.xlu2 %1417 }
 0x108   : > { %v1420_v42 = vsel %vm1419_vm13, %v1416_v40, %v1418_v17  ;;  %v1421_v43 = vsel %vm1419_vm13, %v1418_v17, %v1416_v40  ;;  %v3997_v17 = vperm.slane %v3928_v46, 3  ;;  %v3432_v40 = vld [vmem:[%s5601_s0] ss:$0 sm:$0xff] }
 0x109   : > { %v1424_v45 = vmul.f32 %v3905_v37, %v1420_v42  ;;  %v1425_v59 = vmul.f32 %v3936_v18, %v1421_v43 }
 0x10b   : > { %1437 = vmatpush.msrb.mxu0 %v1424_v45  ;;  %1457 = vmatpush.msrb.mxu2 %v1425_v59 }
 0x10f   : > { %v1407_v47 = vpop.permute.xlu2 %1406 }
 0x110   : > { %v1409_v51 = vsel %vm1408_vm14, %v1405_v12, %v1407_v47  ;;  %v1410_v56 = vsel %vm1408_vm14, %v1407_v47, %v1405_v12 }
 0x111   : > { %v1413_v53 = vmul.f32 %v3922_v44, %v1409_v51  ;;  %v1414_v1 = vmul.f32 %v3947_v55, %v1410_v56 }
 0x113   : > { %1438 = vmatpush.msrb.mxu0 %v1413_v53  ;;  %1458 = vmatpush.msrb.mxu2 %v1414_v1 }
 0x117   : > { %v1383_v15 = vpop.permute.xlu2 %1382 }
 0x11f   : > { %v1396_v62 = vpop.permute.xlu0 %1395  ;;  %v1370_v12 = vpop.permute.xlu2 %1369 }
 0x120   : > { %v1398_v3 = vsel %vm1397_vm15, %v1394_v61, %v1396_v62  ;;  %v1399_v8 = vsel %vm1397_vm15, %v1396_v62, %v1394_v61  ;;  %v1385_v25 = vpop.permute.xlu1 %1384 }
 0x121   : > { %v1402_v14 = vmul.f32 %v3953_v57, %v1398_v3  ;;  %v1403_v16 = vmul.f32 %v3960_v60, %v1399_v8  ;;  %v1387_v29 = vsel %vm1386_vm0, %v1383_v15, %v1385_v25  ;;  %v1388_v30 = vsel %vm1386_vm0, %v1385_v25, %v1383_v15 }
 0x122   : > { %v1391_v28 = vmul.f32 %v3977_v19, %v1387_v29  ;;  %v1392_v36 = vmul.f32 %v3983_v22, %v1388_v30  ;;  %v4056_v30 = vperm.slane %v3928_v46, 0  ;;  %v1171_v46 = vld [vmem:[%s5602_s10 + $0x68] sm:$0xff] }
 0x123   : > { %1439 = vmatpush.msrb.mxu0 %v1402_v14  ;;  %1459 = vmatpush.msrb.mxu2 %v1403_v16 }
 0x125   : > { %1440 = vmatpush.msrb.mxu0 %v1391_v28  ;;  %1460 = vmatpush.msrb.mxu2 %v1392_v36  ;;  %v1173_v36 = vld [vmem:[%s5602_s10 + $0x78] sm:$0xff] }
 0x126   : > { %1178 = vmatpush.msra.mxu3 %v1173_v36 }
 0x127   : > { %v1368_v27 = vpop.permute.xlu0 %1367  ;;  %1441 = vmatpush.msrb.mxu0 %v1380_v33  ;;  %1461 = vmatpush.msrb.mxu2 %v1381_v39  ;;  %v1346_v62 = vpop.permute.xlu2 %1345  ;;  %v1172_v39 = vld [vmem:[%s5602_s10 + $0x70] sm:$0xff] }
 0x128   : > { %v1373_v41 = vsel %vm1371_vm1, %v1370_v12, %v1368_v27  ;;  %v1372_v42 = vsel %vm1371_vm1, %v1368_v27, %v1370_v12  ;;  %v1357_v51 = vpop.permute.xlu1 %1356  ;;  %1179 = vmatpush.msra.mxu3 %v1172_v39  ;;  %v1169_v12 = vld [vmem:[%s5602_s10 + $0x58] sm:$0xff] }
 0x129   : > { %v1376_v50 = vmul.f32 %v3994_v24, %v1373_v41  ;;  %v1377_v45 = vmul.f32 %v3997_v17, %v1372_v42  ;;  %v1168_v41 = vld [vmem:[%s5602_s10 + $0x50] sm:$0xff]  ;;  %v1167_v42 = vld [vmem:[%s5602_s10 + $0x48] sm:$0xff] }
 0x12a   : > { %1180 = vmatpush.msra.mxu3 %v1171_v46 }
 0x12b   : > { %1442 = vmatpush.msrb.mxu0 %v1376_v50  ;;  %1462 = vmatpush.msrb.mxu2 %v1377_v45  ;;  %v1166_v50 = vld [vmem:[%s5602_s10 + $0x40] sm:$0xff]  ;;  %v1165_v45 = vld [vmem:[%s5602_s10 + $0x38] sm:$0xff] }
 0x12f   : > { %v1359_v52 = vpop.permute.xlu0 %1358  ;;  %v1337_v25 = vpop.permute.xlu2 %1336 }
 0x130   : > { %v1362_v56 = vsel %vm1360_vm10, %v1359_v52, %v1357_v51  ;;  %v1361_v58 = vsel %vm1360_vm10, %v1357_v51, %v1359_v52  ;;  %v1348_v1 = vpop.permute.xlu1 %1347  ;;  %v1163_v51 = vld [vmem:[%s5602_s10 + $0x28] sm:$0xff] }
 0x131   : > { %v1365_v59 = vmul.f32 %v4016_v54, %v1362_v56  ;;  %v1366_v61 = vmul.f32 %v4019_v48, %v1361_v58  ;;  %v1351_v8 = vsel %vm1349_vm8, %v1348_v1, %v1346_v62  ;;  %v1350_v14 = vsel %vm1349_vm8, %v1346_v62, %v1348_v1  ;;  %v1161_v58 = vld [vmem:[%s5602_s10 + $0x18] sm:$0xff] }
 0x132   : > { %v1354_v15 = vmul.f32 %v4030_v63, %v1351_v8  ;;  %v1355_v16 = vmul.f32 %v4033_v0, %v1350_v14  ;;  %v1160_v14 = vld [vmem:[%s5602_s10 + $0x10] sm:$0xff] }
 0x133   : > { %1443 = vmatpush.msrb.mxu0 %v1365_v59  ;;  %1463 = vmatpush.msrb.mxu2 %v1366_v61 }
 0x135   : > { %1444 = vmatpush.msrb.mxu0 %v1354_v15  ;;  %1464 = vmatpush.msrb.mxu2 %v1355_v16  ;;  %v1159_v15 = vld [vmem:[%s5602_s10 + $0x8] sm:$0xff]  ;;  %v1158_v16 = vld [vmem:[%s5602_s10] sm:$0xff] }
 0x137   : > { %v1335_v3 = vpop.permute.xlu0 %1334 }
 0x138   : > { %v1340_v27 = vsel %vm5571_vm7, %v1337_v25, %v1335_v3  ;;  %v1339_v28 = vsel %vm5571_vm7, %v1335_v3, %v1337_v25  ;;  %v4106_v59 = vpop.permute.xlu1 %1472  ;;  %v3436_v25 = vld [vmem:[%s5611_s9] ss:$0 sm:$0xff] }
 0x139   : > { %v1343_v29 = vmul.f32 %v4039_v9, %v1340_v27  ;;  %v1344_v33 = vmul.f32 %v4056_v30, %v1339_v28 }
 0x13b   : > { %1445 = vmatpush.msrb.mxu0 %v1343_v29  ;;  %1465 = vmatpush.msrb.mxu2 %v1344_v33 }
 0x13f   : > { %v4108_v62 = vpop.permute.xlu0 %1479 }
 0x148   : > { %v1089_v47 = vpop.f32.mrf.mxu0 }
 0x149   : > { %v1090_v43 = vadd.f32 %v3432_v40, %v1089_v47  ;;  %v1170_v40 = vld [vmem:[%s5602_s10 + $0x60] sm:$0xff]  ;;  %v1164_v47 = vld [vmem:[%s5602_s10 + $0x30] sm:$0xff] }
 0x14a   : > { %1181 = vmatpush.msra.mxu3 %v1170_v40  ;;  %v3350_v40 = vld [vmem:[%s5517_s15 + $0x8] sm:$0xff] }
 0x14b   : > { %v1092_v53 = vmax.f32 %v1090_v43, 0.0  ;;  %v3435_v43 = vld [vmem:[%s5603_s4] ss:$0 sm:$0xff]  ;;  %s5604_s4 = smov 111  }
 0x14c   : > { %1182 = vmatpush.msra.mxu3 %v1169_v12  ;;  %v1214_v12 = vld [vmem:[%s5514_s12 + $0x78] sm:$0xff] }
 0x14d   : > { %3344 = vmatmul.msk.f32.vlgmr.msra.gmra.mxu1 %vm5549_vm9, %v1092_v53  ;;  %vm5570_vm9 = vcmask 588800   ;;  %v1162_v53 = vld [vmem:[%s5602_s10 + $0x20] sm:$0xff]  ;;  %s3384_s10 = sshll.u32 %s5660_s24, 2 }
 0x14e   : > { %3356 = vmatmul.msk.f32.vlgmr.msrb.gmra.mxu0 %vm5570_vm9, %v4051_v38  ;;  %1183 = vmatpush.msra.mxu3 %v1168_v41  ;;  %v1213_v41 = vld [vmem:[%s5514_s12 + $0x70] sm:$0xff]  ;;  %s4890_s27 = scalar_lea.vmem %s5525_s23, %s3384_s10  ;;  %s787_s10 = scalar_lea.vmem %s5524_s22, %s5660_s24 }
 0x14f   : > { %1219 = vmatpush.msrb.mxu1 %v1214_v12 }
 0x150   : > { %1184 = vmatpush.msra.mxu3 %v1167_v42  ;;  %v1212_v42 = vld [vmem:[%s5514_s12 + $0x68] sm:$0xff] }
 0x151   : > { %1220 = vmatpush.msrb.mxu1 %v1213_v41 }
 0x152   : > { %1185 = vmatpush.msra.mxu3 %v1166_v50  ;;  %v1211_v50 = vld [vmem:[%s5514_s12 + $0x60] sm:$0xff] }
 0x153   : > { %1221 = vmatpush.msrb.mxu1 %v1212_v42 }
 0x154   : > { %1186 = vmatpush.msra.mxu3 %v1165_v45  ;;  %v1210_v45 = vld [vmem:[%s5514_s12 + $0x58] sm:$0xff] }
 0x155   : > { %1222 = vmatpush.msrb.mxu1 %v1211_v50 }
 0x156   : > { %1187 = vmatpush.msra.mxu3 %v1164_v47  ;;  %v1209_v47 = vld [vmem:[%s5514_s12 + $0x50] sm:$0xff] }
 0x157   : > { %1223 = vmatpush.msrb.mxu1 %v1210_v45  ;;  %v3437_v45 = vld [vmem:[%s5513_s11] ss:$0 sm:$0xff] }
 0x158   : > { %1188 = vmatpush.msra.mxu3 %v1163_v51  ;;  %v1207_v51 = vld [vmem:[%s5514_s12 + $0x40] sm:$0xff] }
 0x159   : > { %1224 = vmatpush.msrb.mxu1 %v1209_v47 }
 0x15a   : > { %1189 = vmatpush.msra.mxu3 %v1162_v53  ;;  %v1205_v53 = vld [vmem:[%s5514_s12 + $0x30] sm:$0xff] }
 0x15c   : > { %1190 = vmatpush.msra.mxu3 %v1161_v58  ;;  %v1203_v58 = vld [vmem:[%s5514_s12 + $0x20] sm:$0xff] }
 0x15e   : > { %1191 = vmatpush.msra.mxu3 %v1160_v14  ;;  %v1200_v14 = vld [vmem:[%s5514_s12 + $0x8] sm:$0xff] }
 0x160   : > { %1192 = vmatpush.msra.mxu3 %v1159_v15  ;;  %v1199_v15 = vld [vmem:[%s5514_s12] sm:$0xff] }
 0x162   : > { %1193 = vmatpush.msra.mxu3 %v1158_v16 }
 0x1ca   : > { %v1119_v52 = vpop.f32.mrf.mxu1 }
 0x1cb   : > { %v1120_v56 = vadd.f32 %v3435_v43, %v1119_v52  ;;  %v1447_v61 = vpop.f32.mrf.mxu0  ;;  %v1208_v43 = vld [vmem:[%s5514_s12 + $0x48] sm:$0xff]  ;;  %v1206_v52 = vld [vmem:[%s5514_s12 + $0x38] sm:$0xff] }
 0x1cc   : > { %v1475_v1 = vmul.f32 %v4106_v59, %v1447_v61  ;;  %1225 = vmatpush.msrb.mxu1 %v1208_v43  ;;  %v1202_v61 = vld [vmem:[%s5514_s12 + $0x18] sm:$0xff] }
 0x1cd   : > { %3345 = vmatmul.msk.f32.vlgmr.msra.gmra.mxu2 %vm5565_vm12, %v1120_v56  ;;  %v1204_v56 = vld [vmem:[%s5514_s12 + $0x28] sm:$0xff] }
 0x1ce   : > { %v1482_v3 = vadd.f32 %v4108_v62, %v1475_v1  ;;  %1226 = vmatpush.msrb.mxu1 %v1207_v51  ;;  %v1201_v1 = vld [vmem:[%s5514_s12 + $0x10] sm:$0xff] }
 0x1d0   : > { %v4112_v8 = vmax.f32 %v1482_v3, 0.0  ;;  %1227 = vmatpush.msrb.mxu1 %v1206_v52 }
 0x1d2   : > { %1544 = vrot.lane.b32.xlu2 %v4112_v8, %s5604_s4  ;;  %1520 = vrot.lane.b32.xlu1 %v4112_v8, %s5605_s8 }
 0x1d3   : > { %1528 = vrot.lane.b32.xlu0 %v4112_v8, %s5606_s1  ;;  %1228 = vmatpush.msrb.mxu1 %v1205_v53 }
 0x1d5   : > { %3357 = vmatmul.msk.f32.vlgmr.msrb.gmra.mxu2 %vm5570_vm9, %v4051_v38  ;;  %1229 = vmatpush.msrb.mxu1 %v1204_v56 }
 0x1d7   : > { %1230 = vmatpush.msrb.mxu1 %v1203_v58 }
 0x1d9   : > { %1231 = vmatpush.msrb.mxu1 %v1202_v61 }
 0x1da   : > { %1536 = vrot.lane.b32.xlu2 %v4112_v8, %s5607_s26  ;;  %1494 = vrot.lane.b32.xlu1 %v4112_v8, %s5608_s7 }
 0x1db   : > { %1502 = vrot.lane.b32.xlu0 %v4112_v8, %s5609_s5  ;;  %1232 = vmatpush.msrb.mxu1 %v1201_v1 }
 0x1dd   : > { %1233 = vmatpush.msrb.mxu1 %v1200_v14 }
 0x1df   : > { %1234 = vmatpush.msrb.mxu1 %v1199_v15 }
 0x1e2   : > { %1510 = vrot.lane.b32.xlu2 %v4112_v8, %s5610_s29 }
 0x22c   : > { %v1545_v3 = vpop.permute.xlu2 %1544 }
 0x244   : > { %v1521_v16 = vpop.permute.xlu1 %1520 }
 0x250   : > { %v1154_v27 = vpop.f32.mrf.mxu2 }
 0x251   : > { %v1155_v29 = vadd.f32 %v3436_v25, %v1154_v27  ;;  %v1537_v25 = vpop.permute.xlu2 %1536  ;;  %v1529_v27 = vpop.permute.xlu0 %1528 }
 0x253   : > { %v1157_v28 = vmax.f32 %v1155_v29, 0.0  ;;  %v1495_v29 = vpop.permute.xlu1 %1494 }
 0x255   : > { %1194 = vmatmul.f32.vlgmr.msra.gmra.mxu3 %v1157_v28 }
 0x258   : > { %v1467_v33 = vpop.f32.mrf.mxu2 }
 0x259   : > { %v1476_v36 = vmul.f32 %v4106_v59, %v1467_v33  ;;  %v1511_v28 = vpop.permute.xlu2 %1510  ;;  %v3353_v33 = vld [vmem:[%s5518_s16 + $0x8] sm:$0xff] }
 0x25b   : > { %v1483_v39 = vadd.f32 %v4108_v62, %v1476_v36  ;;  %v1503_v36 = vpop.permute.xlu0 %1502 }
 0x25d   : > { %v4142_v46 = vmax.f32 %v1483_v39, 0.0 }
 0x25f   : > { %1546 = vrot.lane.b32.xlu1 %v4142_v46, %s5604_s4  ;;  %1522 = vrot.lane.b32.xlu0 %v4142_v46, %s5605_s8 }
 0x260   : > { %1530 = vrot.lane.b32.xlu2 %v4142_v46, %s5606_s1 }
 0x267   : > { %1538 = vrot.lane.b32.xlu1 %v4142_v46, %s5607_s26  ;;  %1496 = vrot.lane.b32.xlu0 %v4142_v46, %s5608_s7 }
 0x268   : > { %1504 = vrot.lane.b32.xlu2 %v4142_v46, %s5609_s5 }
 0x26f   : > { %1512 = vrot.lane.b32.xlu1 %v4142_v46, %s5610_s29  ;;  %1597 = vperm.xlu0 %3407, %v3350_v40  }
 0x270   : > { %1486 = vrot.lane.b32.xlu2 %v4112_v8, %s5612_s20 }
 0x277   : > { %1488 = vrot.lane.b32.xlu1 %v4142_v46, %s5612_s20 }
 0x278   : > { %1604 = vperm.xlu2 %3408, %v3353_v33  }
 0x2ba   : > { %v1531_v50 = vpop.permute.xlu2 %1530 }
 0x2bb   : > { %v1532_v58 = vsel %vm1397_vm15, %v1529_v27, %v1531_v50  ;;  %v1533_v61 = vsel %vm1397_vm15, %v1531_v50, %v1529_v27 }
 0x2d1   : > { %v1547_v39 = vpop.permute.xlu1 %1546  ;;  %v1523_v47 = vpop.permute.xlu0 %1522 }
 0x2d2   : > { %v1549_v40 = vsel %vm1419_vm13, %v1547_v39, %v1545_v3  ;;  %v1548_v12 = vsel %vm1419_vm13, %v1545_v3, %v1547_v39  ;;  %v1524_v15 = vsel %vm1386_vm0, %v1521_v16, %v1523_v47  ;;  %v1525_v33 = vsel %vm1386_vm0, %v1523_v47, %v1521_v16 }
 0x2d3   : > { %v1551_v41 = vmul.f32 %v3936_v18, %v1549_v40  ;;  %v1550_v42 = vmul.f32 %v3905_v37, %v1548_v12  ;;  %v1535_v39 = vmul.f32 %v1533_v61, %v3960_v60  ;;  %v1505_v40 = vpop.permute.xlu2 %1504  ;;  %v1526_v27 = vmul.f32 %v1524_v15, %v3977_v19 }
 0x2d4   : > { %v1527_v12 = vmul.f32 %v1525_v33, %v3983_v22  ;;  %v1518_v16 = vmul.f32 %v4112_v8, %v3980_v20  ;;  %v3346_v33 = vld [vmem:[%s5516_s14 + $0x8] sm:$0xff] }
 0x2d5   : > { %1562 = vmatpush.msrb.mxu3 %v1550_v42  ;;  %1582 = vmatpush.msra.mxu0 %v1551_v41 }
 0x2d8   : > { %v1195_v43 = vpop.f32.mrf.mxu3 }
 0x2d9   : > { %v1196_v51 = vadd.f32 %v3437_v45, %v1195_v43  ;;  %v1539_v52 = vpop.permute.xlu1 %1538  ;;  %v1497_v41 = vpop.permute.xlu0 %1496  ;;  %v1519_v45 = vmul.f32 %v4142_v46, %v3986_v23  ;;  %v1507_v43 = vsel %vm1360_vm10, %v1505_v40, %v1503_v36 }
 0x2da   : > { %v1541_v53 = vsel %vm1408_vm14, %v1539_v52, %v1537_v25  ;;  %v1540_v56 = vsel %vm1408_vm14, %v1537_v25, %v1539_v52  ;;  %v1534_v25 = vmul.f32 %v1532_v58, %v3953_v57  ;;  %v1498_v46 = vsel %vm1349_vm8, %v1495_v29, %v1497_v41 }
 0x2db   : > { %v1198_v1 = vmax.f32 %v1196_v51, 0.0  ;;  %v1542_v3 = vmul.f32 %v1540_v56, %v3922_v44  ;;  %v1543_v14 = vmul.f32 %v1541_v53, %v3947_v55  ;;  %v1506_v51 = vsel %vm1360_vm10, %v1503_v36, %v1505_v40  ;;  %v1487_v61 = vpop.permute.xlu2 %1486 }
 0x2dc   : > { %v1499_v53 = vsel %vm1349_vm8, %v1497_v41, %v1495_v29  ;;  %v1509_v56 = vmul.f32 %v1506_v51, %v4019_v48  ;;  %v1501_v58 = vmul.f32 %v1498_v46, %v4033_v0  ;;  %v928_v51 = vrot.slane %v3718_v5, 4 }
 0x2dd   : > { %1235 = vmatmul.f32.vlgmr.msrb.gmra.mxu1 %v1198_v1  ;;  %1563 = vmatpush.msrb.mxu3 %v1542_v3  ;;  %v1500_v36 = vmul.f32 %v1499_v53, %v4030_v63  ;;  %v984_v53 = vrot.slane %v3724_v13, 4 }
 0x2de   : > { %1583 = vmatpush.msra.mxu0 %v1543_v14  ;;  %v929_v46 = vadd.f32 %v928_v51, %v3718_v5 }
 0x2df   : > { %1564 = vmatpush.msrb.mxu3 %v1534_v25 }
 0x2e0   : > { %1584 = vmatpush.msra.mxu0 %v1535_v39 }
 0x2e1   : > { %v1513_v42 = vpop.permute.xlu1 %1512  ;;  %1565 = vmatpush.msrb.mxu3 %v1526_v27  ;;  %v4276_v25 = vpop.permute.xlu0 %1597 }
 0x2e2   : > { %v1514_v50 = vsel %vm1371_vm1, %v1511_v28, %v1513_v42  ;;  %1585 = vmatpush.msra.mxu0 %v1527_v12  ;;  %v1515_v47 = vsel %vm1371_vm1, %v1513_v42, %v1511_v28  ;;  %v1508_v28 = vmul.f32 %v1507_v43, %v4016_v54  ;;  %v3351_v43 = vld [vmem:[%s5517_s15 + $0x10] sm:$0xff] }
 0x2e3   : > { %1566 = vmatpush.msrb.mxu3 %v1518_v16  ;;  %v1516_v52 = vmul.f32 %v1515_v47, %v3994_v24  ;;  %v1517_v8 = vmul.f32 %v1514_v50, %v3997_v17  ;;  %v4278_v40 = vpop.permute.xlu2 %1604  ;;  %v3354_v47 = vld [vmem:[%s5518_s16 + $0x10] sm:$0xff] }
 0x2e4   : > { %1586 = vmatpush.msra.mxu0 %v1519_v45 }
 0x2e5   : > { %1567 = vmatpush.msrb.mxu3 %v1516_v52  ;;  %v937_v52 = vrot.slane %v3722_v10, 4 }
 0x2e6   : > { %1587 = vmatpush.msra.mxu0 %v1517_v8  ;;  %v975_v8 = vrot.slane %v3720_v6, 4 }
 0x2e7   : > { %1568 = vmatpush.msrb.mxu3 %v1508_v28  ;;  %v938_v28 = vadd.f32 %v937_v52, %v3722_v10 }
 0x2e8   : > { %1588 = vmatpush.msra.mxu0 %v1509_v56  ;;  %v976_v56 = vmax.f32 %v3720_v6, %v975_v8 }
 0x2e9   : > { %v1489_v1 = vpop.permute.xlu1 %1488  ;;  %1569 = vmatpush.msrb.mxu3 %v1500_v36  ;;  %v985_v36 = vmax.f32 %v3724_v13, %v984_v53 }
 0x2ea   : > { %v1490_v3 = vsel %vm5571_vm7, %v1487_v61, %v1489_v1  ;;  %1589 = vmatpush.msra.mxu0 %v1501_v58  ;;  %v1491_v29 = vsel %vm5571_vm7, %v1489_v1, %v1487_v61  ;;  %v930_v61 = vrot.slane %v929_v46, 2  ;;  %v939_v1 = vrot.slane %v938_v28, 2 }
 0x2eb   : > { %v1492_v14 = vmul.f32 %v1491_v29, %v4039_v9  ;;  %v1493_v15 = vmul.f32 %v1490_v3, %v4056_v30  ;;  %v977_v3 = vrot.slane %v976_v56, 2  ;;  %v986_v29 = vrot.slane %v985_v36, 2 }
 0x2ed   : > { %1570 = vmatpush.msrb.mxu3 %v1492_v14  ;;  %1590 = vmatpush.msra.mxu0 %v1493_v15  ;;  %v931_v15 = vadd.f32 %v930_v61, %v929_v46 }
 0x2ee   : > { %3358 = vmatmul.msk.f32.vlgmr.msrb.gmra.mxu3 %vm5570_vm9, %v3346_v33  ;;  %3359 = vmatmul.msk.f32.vlgmr.msra.gmra.mxu0 %vm5570_vm9, %v3346_v33  ;;  %v940_v33 = vadd.f32 %v939_v1, %v938_v28 }
 0x36b   : > { %v1592_v39 = vpop.f32.mrf.mxu0 }
 0x36c   : > { %v1601_v27 = vmul.f32 %v4276_v25, %v1592_v39 }
 0x36e   : > { %v1608_v12 = vadd.f32 %v4278_v40, %v1601_v27  ;;  %v978_v27 = vmax.f32 %v976_v56, %v977_v3 }
 0x370   : > { %v4282_v41 = vmax.f32 %v1608_v12, 0.0  ;;  %v987_v12 = vmax.f32 %v985_v36, %v986_v29 }
 0x371   : > { %v1572_v42 = vpop.f32.mrf.mxu3 }
 0x372   : > { %1655 = vrot.lane.b32.xlu2 %v4282_v41, %s5606_s1  ;;  %1663 = vrot.lane.b32.xlu1 %v4282_v41, %s5607_s26  ;;  %v1600_v16 = vmul.f32 %v4276_v25, %v1572_v42  ;;  %v932_v42 = vrot.slane %v931_v15, 1  ;;  %v988_v10 = vrot.slane %v987_v12, 1 }
 0x373   : > { %1671 = vrot.lane.b32.xlu0 %v4282_v41, %s5604_s4 }
 0x374   : > { %v1607_v50 = vadd.f32 %v4278_v40, %v1600_v16  ;;  %v941_v16 = vrot.slane %v940_v33, 1  ;;  %v933_v6 = vadd.f32 %v932_v42, %v931_v15  ;;  %v989_v52 = vmax.f32 %v987_v12, %v988_v10 }
 0x376   : > { %v4298_v45 = vmax.f32 %v1607_v50, 0.0  ;;  %v979_v50 = vrot.slane %v978_v27, 1  ;;  %v952_v8 = vmul.f32 %v3801_v35, %v933_v6 }
 0x378   : > { %v980_v51 = vmax.f32 %v978_v27, %v979_v50 }
 0x37a   : > { %1629 = vrot.lane.b32.xlu2 %v4282_v41, %s5609_s5  ;;  %1637 = vrot.lane.b32.xlu1 %v4282_v41, %s5610_s29  ;;  %v2034_v28 = vsel %vm1328_vm5, %v952_v8, %v980_v51 }
 0x37b   : > { %1647 = vrot.lane.b32.xlu0 %v4282_v41, %s5605_s8  ;;  %v4341_v1 = vsel %vm1331_vm6, %v2034_v28, 0.0  ;;  %v1643_v28 = vmul.f32 %v4298_v45, %v3980_v20 }
 0x382   : > { %1661 = vrot.lane.b32.xlu2 %v4298_v45, %s5607_s26  ;;  %1669 = vrot.lane.b32.xlu1 %v4298_v45, %s5604_s4 }
 0x383   : > { %1653 = vrot.lane.b32.xlu0 %v4298_v45, %s5606_s1 }
 0x38a   : > { %1635 = vrot.lane.b32.xlu2 %v4298_v45, %s5610_s29  ;;  %1645 = vrot.lane.b32.xlu1 %v4298_v45, %s5605_s8 }
 0x38b   : > { %1627 = vrot.lane.b32.xlu0 %v4298_v45, %s5609_s5 }
 0x392   : > { %1611 = vrot.lane.b32.xlu2 %v4298_v45, %s5612_s20  ;;  %1619 = vrot.lane.b32.xlu1 %v4298_v45, %s5608_s7 }
 0x393   : > { %1621 = vrot.lane.b32.xlu0 %v4282_v41, %s5608_s7 }
 0x39a   : > { %1729 = vperm.xlu2 %3408, %v3354_v47   ;;  %1613 = vrot.lane.b32.xlu1 %v4282_v41, %s5612_s20 }
 0x39b   : > { %1722 = vperm.xlu0 %3407, %v3351_v43   ;;  %v942_v43 = vadd.f32 %v941_v16, %v940_v33 }
 0x39d   : > { %v953_v53 = vmul.f32 %v3801_v35, %v942_v43 }
 0x39f   : > { %v2035_v56 = vsel %vm1328_vm5, %v953_v53, %v989_v52 }
 0x3a0   : > { %v4344_v3 = vsel %vm1331_vm6, %v2035_v56, 0.0  ;;  %v1644_v56 = vmul.f32 %v4282_v41, %v3986_v23 }
 0x3a2   : > { %2096 = vrot.lane.b32.xlu2 %v4341_v1, %s5604_s4  ;;  %2098 = vrot.lane.b32.xlu1 %v4344_v3, %s5604_s4 }
 0x3a3   : > { %2090 = vrot.lane.b32.xlu0 %v4344_v3, %s5607_s26 }
 0x3aa   : > { %2082 = vrot.lane.b32.xlu2 %v4344_v3, %s5606_s1  ;;  %2088 = vrot.lane.b32.xlu1 %v4341_v1, %s5607_s26 }
 0x3ab   : > { %2080 = vrot.lane.b32.xlu0 %v4341_v1, %s5606_s1 }
 0x3b2   : > { %2072 = vrot.lane.b32.xlu2 %v4341_v1, %s5605_s8  ;;  %2074 = vrot.lane.b32.xlu1 %v4344_v3, %s5605_s8 }
 0x3b3   : > { %2064 = vrot.lane.b32.xlu0 %v4344_v3, %s5610_s29 }
 0x3ba   : > { %2054 = vrot.lane.b32.xlu2 %v4341_v1, %s5609_s5  ;;  %2062 = vrot.lane.b32.xlu1 %v4341_v1, %s5610_s29 }
 0x3cc   : > { %v1656_v58 = vpop.permute.xlu2 %1655 }
 0x3d4   : > { %v1630_v5 = vpop.permute.xlu2 %1629 }
 0x3dc   : > { %v1662_v46 = vpop.permute.xlu2 %1661 }
 0x3e4   : > { %v1664_v14 = vpop.permute.xlu1 %1663  ;;  %v1636_v52 = vpop.permute.xlu2 %1635 }
 0x3e5   : > { %v1672_v39 = vpop.permute.xlu0 %1671  ;;  %v1665_v36 = vsel %vm1408_vm14, %v1662_v46, %v1664_v14  ;;  %v1666_v29 = vsel %vm1408_vm14, %v1664_v14, %v1662_v46 }
 0x3e6   : > { %v1668_v16 = vmul.f32 %v1666_v29, %v3947_v55 }
 0x3ec   : > { %v1638_v47 = vpop.permute.xlu1 %1637 }
 0x3ed   : > { %v1648_v13 = vpop.permute.xlu0 %1647  ;;  %v1639_v46 = vsel %vm1371_vm1, %v1636_v52, %v1638_v47 }
 0x3ee   : > { %v1642_v29 = vmul.f32 %v1639_v46, %v3997_v17 }
 0x3f4   : > { %v1670_v61 = vpop.permute.xlu1 %1669 }
 0x3f5   : > { %v1654_v15 = vpop.permute.xlu0 %1653  ;;  %v1673_v35 = vsel %vm1419_vm13, %v1670_v61, %v1672_v39  ;;  %v1674_v33 = vsel %vm1419_vm13, %v1672_v39, %v1670_v61  ;;  %v1667_v39 = vmul.f32 %v1665_v36, %v3922_v44 }
 0x3f6   : > { %v1675_v27 = vmul.f32 %v3905_v37, %v1673_v35  ;;  %v1676_v12 = vmul.f32 %v3936_v18, %v1674_v33  ;;  %v1657_v14 = vsel %vm1397_vm15, %v1654_v15, %v1656_v58  ;;  %v1658_v42 = vsel %vm1397_vm15, %v1656_v58, %v1654_v15 }
 0x3f7   : > { %v1659_v50 = vmul.f32 %v1657_v14, %v3953_v57  ;;  %v1660_v10 = vmul.f32 %v1658_v42, %v3960_v60  ;;  %v1612_v14 = vpop.permute.xlu2 %1611 }
 0x3f8   : > { %1687 = vmatpush.msra.mxu1 %v1675_v27  ;;  %1707 = vmatpush.msra.mxu2 %v1676_v12 }
 0x3fa   : > { %1688 = vmatpush.msra.mxu1 %v1667_v39  ;;  %1708 = vmatpush.msra.mxu2 %v1668_v16 }
 0x3fc   : > { %1689 = vmatpush.msra.mxu1 %v1659_v50  ;;  %1709 = vmatpush.msra.mxu2 %v1660_v10  ;;  %v1646_v6 = vpop.permute.xlu1 %1645 }
 0x3fd   : > { %v1628_v43 = vpop.permute.xlu0 %1627  ;;  %v1649_v51 = vsel %vm1386_vm0, %v1646_v6, %v1648_v13  ;;  %v1650_v58 = vsel %vm1386_vm0, %v1648_v13, %v1646_v6  ;;  %v1640_v13 = vsel %vm1371_vm1, %v1638_v47, %v1636_v52  ;;  %v3347_v6 = vld [vmem:[%s5516_s14 + $0x10] sm:$0xff] }
 0x3fe   : > { %v1651_v8 = vmul.f32 %v1649_v51, %v3977_v19  ;;  %v1652_v53 = vmul.f32 %v1650_v58, %v3983_v22  ;;  %v1631_v36 = vsel %vm1360_vm10, %v1628_v43, %v1630_v5  ;;  %v1632_v61 = vsel %vm1360_vm10, %v1630_v5, %v1628_v43  ;;  %v4423_v43 = vpop.f32.mrf.mxu1 }
 0x3ff   : > { %v1641_v47 = vmul.f32 %v1640_v13, %v3994_v24  ;;  %v1633_v45 = vmul.f32 %v1632_v61, %v4016_v54  ;;  %v1634_v35 = vmul.f32 %v1631_v36, %v4019_v48  ;;  %v3352_v61 = vld [vmem:[%s5517_s15 + $0x18] sm:$0xff] }
 0x400   : > { %1690 = vmatpush.msra.mxu1 %v1651_v8  ;;  %1710 = vmatpush.msra.mxu2 %v1652_v53  ;;  %v4428_v8 = vpop.permute.xlu2 %1729 }
 0x402   : > { %1691 = vmatpush.msra.mxu1 %v1643_v28  ;;  %1711 = vmatpush.msra.mxu2 %v1644_v56 }
 0x404   : > { %1712 = vmatpush.msra.mxu2 %v1642_v29  ;;  %v1620_v15 = vpop.permute.xlu1 %1619  ;;  %1692 = vmatpush.msra.mxu1 %v1641_v47  ;;  %v3355_v29 = vld [vmem:[%s5518_s16 + $0x18] sm:$0xff] }
 0x405   : > { %v1622_v41 = vpop.permute.xlu0 %1621 }
 0x406   : > { %v1623_v5 = vsel %vm1349_vm8, %v1620_v15, %v1622_v41  ;;  %v1624_v33 = vsel %vm1349_vm8, %v1622_v41, %v1620_v15  ;;  %1693 = vmatpush.msra.mxu1 %v1633_v45  ;;  %1713 = vmatpush.msra.mxu2 %v1634_v35 }
 0x407   : > { %v1625_v27 = vmul.f32 %v1624_v33, %v4030_v63  ;;  %v1626_v12 = vmul.f32 %v1623_v5, %v4033_v0 }
 0x408   : > { %v4485_v47 = vpop.permute.xlu2 %2096 }
 0x409   : > { %1694 = vmatpush.msra.mxu1 %v1625_v27  ;;  %1714 = vmatpush.msra.mxu2 %v1626_v12 }
 0x40c   : > { %v1614_v42 = vpop.permute.xlu1 %1613 }
 0x40d   : > { %v1615_v39 = vsel %vm5571_vm7, %v1612_v14, %v1614_v42  ;;  %v1616_v16 = vsel %vm5571_vm7, %v1614_v42, %v1612_v14  ;;  %v4425_v51 = vpop.permute.xlu0 %1722 }
 0x40e   : > { %v1617_v50 = vmul.f32 %v1616_v16, %v4039_v9  ;;  %v1618_v10 = vmul.f32 %v1615_v39, %v4056_v30 }
 0x410   : > { %1695 = vmatpush.msra.mxu1 %v1617_v50  ;;  %1715 = vmatpush.msra.mxu2 %v1618_v10  ;;  %v4489_v45 = vpop.permute.xlu2 %2082 }
 0x411   : > { %3360 = vmatmul.msk.f32.vlgmr.msra.gmra.mxu1 %vm5570_vm9, %v3347_v6  ;;  %3361 = vmatmul.msk.f32.vlgmr.msra.gmra.mxu2 %vm5570_vm9, %v3347_v6 }
 0x414   : > { %v4487_v15 = vpop.permute.xlu1 %2098 }
 0x415   : > { %v4491_v35 = vpop.permute.xlu0 %2090 }
 0x418   : > { %v4495_v5 = vpop.permute.xlu2 %2072 }
 0x41c   : > { %v4493_v41 = vpop.permute.xlu1 %2088 }
 0x41d   : > { %v4497_v33 = vpop.permute.xlu0 %2080 }
 0x420   : > { %v4501_v12 = vpop.permute.xlu2 %2054 }
 0x424   : > { %v4499_v27 = vpop.permute.xlu1 %2074 }
 0x425   : > { %v4503_v14 = vpop.permute.xlu0 %2064 }
 0x42c   : > { %v4505_v42 = vpop.permute.xlu1 %2062 }
 0x48e   : > { %v1697_v58 = vpop.f32.mrf.mxu1 }
 0x48f   : > { %v1725_v52 = vmul.f32 %v4425_v51, %v1697_v58 }
 0x491   : > { %v1732_v53 = vadd.f32 %v4428_v8, %v1725_v52 }
 0x493   : > { %v4431_v46 = vmax.f32 %v1732_v53, 0.0 }
 0x494   : > { %v1717_v13 = vpop.f32.mrf.mxu2 }
 0x495   : > { %1778 = vrot.lane.b32.xlu0 %v4431_v46, %s5606_s1  ;;  %1786 = vrot.lane.b32.xlu2 %v4431_v46, %s5607_s26  ;;  %v1726_v28 = vmul.f32 %v4425_v51, %v1717_v13 }
 0x496   : > { %1794 = vrot.lane.b32.xlu1 %v4431_v46, %s5604_s4 }
 0x497   : > { %v1733_v56 = vadd.f32 %v4428_v8, %v1726_v28 }
 0x499   : > { %v4447_v36 = vmax.f32 %v1733_v56, 0.0 }
 0x49d   : > { %1760 = vrot.lane.b32.xlu0 %v4431_v46, %s5610_s29  ;;  %1752 = vrot.lane.b32.xlu2 %v4431_v46, %s5609_s5 }
 0x49e   : > { %1770 = vrot.lane.b32.xlu1 %v4431_v46, %s5605_s8 }
 0x4a5   : > { %1736 = vrot.lane.b32.xlu0 %v4431_v46, %s5612_s20  ;;  %1780 = vrot.lane.b32.xlu2 %v4447_v36, %s5606_s1 }
 0x4a6   : > { %1744 = vrot.lane.b32.xlu1 %v4431_v46, %s5608_s7 }
 0x4ad   : > { %1796 = vrot.lane.b32.xlu0 %v4447_v36, %s5604_s4  ;;  %1762 = vrot.lane.b32.xlu2 %v4447_v36, %s5610_s29 }
 0x4ae   : > { %1788 = vrot.lane.b32.xlu1 %v4447_v36, %s5607_s26 }
 0x4b5   : > { %1772 = vrot.lane.b32.xlu0 %v4447_v36, %s5605_s8  ;;  %1738 = vrot.lane.b32.xlu2 %v4447_v36, %s5612_s20 }
 0x4b6   : > { %1754 = vrot.lane.b32.xlu1 %v4447_v36, %s5609_s5 }
 0x4bd   : > { %1746 = vrot.lane.b32.xlu0 %v4447_v36, %s5608_s7  ;;  %2048 = vrot.lane.b32.xlu2 %v4344_v3, %s5608_s7 }
 0x4be   : > { %2056 = vrot.lane.b32.xlu1 %v4344_v3, %s5609_s5 }
 0x4c5   : > { %1847 = vperm.xlu2 %3408, %v3352_v61   ;;  %2046 = vrot.lane.b32.xlu0 %v4341_v1, %s5608_s7 }
 0x4c6   : > { %2038 = vrot.lane.b32.xlu1 %v4341_v1, %s5612_s20 }
 0x4cd   : > { %2040 = vrot.lane.b32.xlu0 %v4344_v3, %s5612_s20 }
 0x4ce   : > { %1854 = vperm.xlu1 %3406, %v3355_v29  }
 0x4ef   : > { %v1787_v39 = vpop.permute.xlu2 %1786 }
 0x4f7   : > { %v1753_v58 = vpop.permute.xlu2 %1752 }
 0x4ff   : > { %v1781_v13 = vpop.permute.xlu2 %1780 }
 0x507   : > { %v1779_v16 = vpop.permute.xlu0 %1778 }
 0x508   : > { %v1795_v50 = vpop.permute.xlu1 %1794  ;;  %v1782_v34 = vsel %vm1397_vm15, %v1779_v16, %v1781_v13  ;;  %v1783_v11 = vsel %vm1397_vm15, %v1781_v13, %v1779_v16  ;;  %v1769_v16 = vmul.f32 %v4447_v36, %v3986_v23 }
 0x50f   : > { %v1761_v10 = vpop.permute.xlu0 %1760 }
 0x510   : > { %v1771_v6 = vpop.permute.xlu1 %1770 }
 0x517   : > { %v1737_v52 = vpop.permute.xlu0 %1736 }
 0x518   : > { %v1745_v53 = vpop.permute.xlu1 %1744 }
 0x51f   : > { %v1797_v28 = vpop.permute.xlu0 %1796 }
 0x520   : > { %v1798_v56 = vsel %vm1419_vm13, %v1795_v50, %v1797_v28  ;;  %v1799_v61 = vsel %vm1419_vm13, %v1797_v28, %v1795_v50  ;;  %v1789_v29 = vpop.permute.xlu1 %1788  ;;  %v1763_v28 = vpop.permute.xlu2 %1762 }
 0x521   : > { %v1800_v2 = vmul.f32 %v3905_v37, %v1798_v56  ;;  %v1801_v49 = vmul.f32 %v3936_v18, %v1799_v61  ;;  %v1790_v31 = vsel %vm1408_vm14, %v1787_v39, %v1789_v29  ;;  %v1791_v32 = vsel %vm1408_vm14, %v1789_v29, %v1787_v39 }
 0x522   : > { %v1792_v7 = vmul.f32 %v1790_v31, %v3922_v44  ;;  %v1793_v50 = vmul.f32 %v1791_v32, %v3947_v55  ;;  %v1784_v37 = vmul.f32 %v1782_v34, %v3953_v57  ;;  %v1785_v18 = vmul.f32 %v1783_v11, %v3960_v60 }
 0x523   : > { %1812 = vmatpush.msra.mxu3 %v1800_v2  ;;  %1832 = vmatpush.msrb.mxu0 %v1801_v49  ;;  %v1764_v11 = vsel %vm1371_vm1, %v1761_v10, %v1763_v28  ;;  %v1768_v34 = vmul.f32 %v4431_v46, %v3980_v20 }
 0x524   : > { %v1767_v61 = vmul.f32 %v1764_v11, %v3997_v17  ;;  %v4577_v11 = vld [vmem:[%s5600_s6 + $0x10] ss:$0 sm:$0xff] }
 0x525   : > { %1813 = vmatpush.msra.mxu3 %v1792_v7  ;;  %1833 = vmatpush.msrb.mxu0 %v1793_v50  ;;  %v1765_v7 = vsel %vm1371_vm1, %v1763_v28, %v1761_v10 }
 0x526   : > { %v1766_v13 = vmul.f32 %v1765_v7, %v3994_v24 }
 0x527   : > { %v1773_v39 = vpop.permute.xlu0 %1772  ;;  %1814 = vmatpush.msra.mxu3 %v1784_v37  ;;  %1834 = vmatpush.msrb.mxu0 %v1785_v18 }
 0x528   : > { %v1774_v56 = vsel %vm1386_vm0, %v1771_v6, %v1773_v39  ;;  %v1775_v31 = vsel %vm1386_vm0, %v1773_v39, %v1771_v6  ;;  %v1755_v49 = vpop.permute.xlu1 %1754  ;;  %v1739_v10 = vpop.permute.xlu2 %1738 }
 0x529   : > { %v1776_v32 = vmul.f32 %v1774_v56, %v3977_v19  ;;  %v1777_v2 = vmul.f32 %v1775_v31, %v3983_v22  ;;  %v1757_v6 = vsel %vm1360_vm10, %v1755_v49, %v1753_v58  ;;  %v1756_v29 = vsel %vm1360_vm10, %v1753_v58, %v1755_v49 }
 0x52a   : > { %v1758_v50 = vmul.f32 %v1757_v6, %v4016_v54  ;;  %v1741_v46 = vsel %vm5571_vm7, %v1739_v10, %v1737_v52  ;;  %v1759_v36 = vmul.f32 %v1756_v29, %v4019_v48  ;;  %v1740_v58 = vsel %vm5571_vm7, %v1737_v52, %v1739_v10  ;;  %v3348_v52 = vld [vmem:[%s5516_s14 + $0x18] sm:$0xff] }
 0x52b   : > { %1815 = vmatpush.msra.mxu3 %v1776_v32  ;;  %1835 = vmatpush.msrb.mxu0 %v1777_v2  ;;  %v2100_v31 = vsel %vm1419_vm13, %v4485_v47, %v4487_v15  ;;  %v2101_v32 = vsel %vm1419_vm13, %v4487_v15, %v4485_v47  ;;  %v2092_v2 = vsel %vm1408_vm14, %v4493_v41, %v4491_v35 }
 0x52c   : > { %v1743_v49 = vmul.f32 %v1740_v58, %v4056_v30  ;;  %v2102_v47 = vmul.f32 %v4577_v11, %v2100_v31  ;;  %v2093_v15 = vsel %vm1408_vm14, %v4491_v35, %v4493_v41  ;;  %v2084_v6 = vsel %vm1397_vm15, %v4497_v33, %v4489_v45 }
 0x52d   : > { %1816 = vmatpush.msra.mxu3 %v1768_v34  ;;  %1836 = vmatpush.msrb.mxu0 %v1769_v16  ;;  %v4587_v34 = vld [vmem:[%s5600_s6 + $0x18] ss:$0 sm:$0xff]  ;;  %v2085_v35 = vsel %vm1397_vm15, %v4489_v45, %v4497_v33  ;;  %v2094_v41 = vmul.f32 %v2092_v2, %v3922_v44  ;;  %v2095_v29 = vmul.f32 %v2093_v15, %v3947_v55 }
 0x52e   : > { %v2103_v16 = vmul.f32 %v4587_v34, %v2101_v32  ;;  %v2086_v10 = vmul.f32 %v2084_v6, %v3953_v57  ;;  %v2077_v45 = vsel %vm1386_vm0, %v4499_v27, %v4495_v5  ;;  %v2087_v33 = vmul.f32 %v2085_v35, %v3960_v60 }
 0x52f   : > { %v1747_v37 = vpop.permute.xlu0 %1746  ;;  %1837 = vmatpush.msrb.mxu0 %v1767_v61  ;;  %1817 = vmatpush.msra.mxu3 %v1766_v13  ;;  %v2076_v61 = vsel %vm1386_vm0, %v4495_v5, %v4499_v27  ;;  %v2071_v5 = vmul.f32 %v4344_v3, %v3986_v23  ;;  %v2066_v27 = vsel %vm1371_vm1, %v4505_v42, %v4503_v14 }
 0x530   : > { %v1748_v18 = vsel %vm1349_vm8, %v1745_v53, %v1747_v37  ;;  %v1749_v28 = vsel %vm1349_vm8, %v1747_v37, %v1745_v53  ;;  %v1742_v53 = vmul.f32 %v1741_v46, %v4039_v9  ;;  %v2057_v7 = vpop.permute.xlu1 %2056  ;;  %v2070_v37 = vmul.f32 %v4341_v1, %v3980_v20 }
 0x531   : > { %v1750_v39 = vmul.f32 %v1749_v28, %v4030_v63  ;;  %v1751_v56 = vmul.f32 %v1748_v18, %v4033_v0  ;;  %1818 = vmatpush.msra.mxu3 %v1758_v50  ;;  %1838 = vmatpush.msrb.mxu0 %v1759_v36  ;;  %v2078_v50 = vmul.f32 %v2076_v61, %v3977_v19  ;;  %v2049_v18 = vpop.permute.xlu2 %2048 }
 0x532   : > { %v2067_v46 = vsel %vm1371_vm1, %v4503_v14, %v4505_v42  ;;  %v2079_v36 = vmul.f32 %v2077_v45, %v3983_v22  ;;  %v2059_v1 = vsel %vm1360_vm10, %v2057_v7, %v4501_v12  ;;  %v2058_v58 = vsel %vm1360_vm10, %v4501_v12, %v2057_v7 }
 0x533   : > { %1819 = vmatpush.msra.mxu3 %v1750_v39  ;;  %1839 = vmatpush.msrb.mxu0 %v1751_v56  ;;  %v2068_v14 = vmul.f32 %v2067_v46, %v3994_v24  ;;  %v2069_v56 = vmul.f32 %v2066_v27, %v3997_v17  ;;  %v2060_v32 = vmul.f32 %v2059_v1, %v4016_v54 }
 0x535   : > { %1820 = vmatpush.msra.mxu3 %v1742_v53  ;;  %1840 = vmatpush.msrb.mxu0 %v1743_v49 }
 0x536   : > { %3362 = vmatmul.msk.f32.vlgmr.msra.gmra.mxu3 %vm5570_vm9, %v3348_v52  ;;  %3363 = vmatmul.msk.f32.vlgmr.msrb.gmra.mxu0 %vm5570_vm9, %v3348_v52  ;;  %v2061_v52 = vmul.f32 %v2058_v58, %v4019_v48 }
 0x537   : > { %2111 = vmatpush.msrb.mxu3 %v2102_v47  ;;  %v2047_v13 = vpop.permute.xlu0 %2046  ;;  %2131 = vmatpush.msra.mxu0 %v2103_v16 }
 0x538   : > { %v2051_v28 = vsel %vm1349_vm8, %v2049_v18, %v2047_v13  ;;  %v2039_v3 = vpop.permute.xlu1 %2038  ;;  %v2050_v39 = vsel %vm1349_vm8, %v2047_v13, %v2049_v18 }
 0x539   : > { %2112 = vmatpush.msrb.mxu3 %v2094_v41  ;;  %2132 = vmatpush.msra.mxu0 %v2095_v29  ;;  %v2052_v53 = vmul.f32 %v2051_v28, %v4030_v63  ;;  %v2053_v2 = vmul.f32 %v2050_v39, %v4033_v0  ;;  %v4652_v15 = vpop.permute.xlu2 %1847 }
 0x53b   : > { %2113 = vmatpush.msrb.mxu3 %v2086_v10  ;;  %2133 = vmatpush.msra.mxu0 %v2087_v33 }
 0x53d   : > { %2114 = vmatpush.msrb.mxu3 %v2078_v50  ;;  %2134 = vmatpush.msra.mxu0 %v2079_v36 }
 0x53f   : > { %2115 = vmatpush.msrb.mxu3 %v2070_v37  ;;  %v2041_v42 = vpop.permute.xlu0 %2040  ;;  %2135 = vmatpush.msra.mxu0 %v2071_v5 }
 0x540   : > { %v2043_v31 = vsel %vm5571_vm7, %v2041_v42, %v2039_v3  ;;  %v2042_v12 = vsel %vm5571_vm7, %v2039_v3, %v2041_v42  ;;  %v4655_v6 = vpop.permute.xlu1 %1854 }
 0x541   : > { %2116 = vmatpush.msrb.mxu3 %v2068_v14  ;;  %2136 = vmatpush.msra.mxu0 %v2069_v56  ;;  %v2044_v49 = vmul.f32 %v2043_v31, %v4039_v9  ;;  %v2045_v47 = vmul.f32 %v2042_v12, %v4056_v30 }
 0x543   : > { %2117 = vmatpush.msrb.mxu3 %v2060_v32  ;;  %2137 = vmatpush.msra.mxu0 %v2061_v52 }
 0x545   : > { %2118 = vmatpush.msrb.mxu3 %v2052_v53  ;;  %2138 = vmatpush.msra.mxu0 %v2053_v2 }
 0x547   : > { %2119 = vmatpush.msrb.mxu3 %v2044_v49  ;;  %2139 = vmatpush.msra.mxu0 %v2045_v47 }
 0x548   : > { %3366 = vmatmul.msk.f32.vlgmr.msrb.gmra.mxu3 %vm5570_vm9, %v4051_v38  ;;  %3367 = vmatmul.msk.f32.vlgmr.msra.gmra.mxu0 %vm5570_vm9, %v4051_v38 }
 0x5b3   : > { %v1842_v7 = vpop.f32.mrf.mxu0 }
 0x5b4   : > { %v1851_v16 = vmul.f32 %v4652_v15, %v1842_v7 }
 0x5b6   : > { %v1858_v35 = vadd.f32 %v4655_v6, %v1851_v16 }
 0x5b8   : > { %v4658_v41 = vmax.f32 %v1858_v35, 0.0 }
 0x5b9   : > { %v1822_v38 = vpop.f32.mrf.mxu3 }
 0x5ba   : > { %1905 = vrot.lane.b32.xlu1 %v4658_v41, %s5606_s1  ;;  %1913 = vrot.lane.b32.xlu0 %v4658_v41, %s5607_s26  ;;  %v1850_v13 = vmul.f32 %v4652_v15, %v1822_v38 }
 0x5bb   : > { %1921 = vrot.lane.b32.xlu2 %v4658_v41, %s5604_s4 }
 0x5bc   : > { %v1857_v61 = vadd.f32 %v4655_v6, %v1850_v13 }
 0x5be   : > { %v4674_v29 = vmax.f32 %v1857_v61, 0.0 }
 0x5c2   : > { %1887 = vrot.lane.b32.xlu1 %v4658_v41, %s5610_s29  ;;  %1879 = vrot.lane.b32.xlu0 %v4658_v41, %s5609_s5 }
 0x5c3   : > { %1897 = vrot.lane.b32.xlu2 %v4658_v41, %s5605_s8 }
 0x5c5   : > { %v2141_v10 = vpop.f32.mrf.mxu0 }
 0x5c6   : > { %v2145_v45 = vmul.f32 %v2141_v10, %v4106_v59 }
 0x5c8   : > { %v2147_v33 = vadd.f32 %v2145_v45, %v4108_v62 }
 0x5ca   : > { %1863 = vrot.lane.b32.xlu1 %v4658_v41, %s5612_s20  ;;  %1919 = vrot.lane.b32.xlu0 %v4674_v29, %s5604_s4  ;;  %v4696_v37 = vmax.f32 %v2147_v33, 0.0 }
 0x5cb   : > { %1871 = vrot.lane.b32.xlu2 %v4658_v41, %s5608_s7  ;;  %v2121_v50 = vpop.f32.mrf.mxu3 }
 0x5cc   : > { %v2144_v46 = vmul.f32 %v2121_v50, %v4106_v59 }
 0x5ce   : > { %v2146_v36 = vadd.f32 %v2144_v46, %v4108_v62 }
 0x5d0   : > { %v4706_v5 = vmax.f32 %v2146_v36, 0.0 }
 0x5d2   : > { %1911 = vrot.lane.b32.xlu1 %v4674_v29, %s5607_s26  ;;  %1895 = vrot.lane.b32.xlu0 %v4674_v29, %s5605_s8 }
 0x5d3   : > { %1903 = vrot.lane.b32.xlu2 %v4674_v29, %s5606_s1 }
 0x5da   : > { %1877 = vrot.lane.b32.xlu1 %v4674_v29, %s5609_s5  ;;  %1869 = vrot.lane.b32.xlu0 %v4674_v29, %s5608_s7 }
 0x5db   : > { %1885 = vrot.lane.b32.xlu2 %v4674_v29, %s5610_s29 }
 0x5e2   : > { %2194 = vrot.lane.b32.xlu1 %v4696_v37, %s5606_s1  ;;  %2210 = vrot.lane.b32.xlu0 %v4696_v37, %s5604_s4 }
 0x5e3   : > { %1861 = vrot.lane.b32.xlu2 %v4674_v29, %s5612_s20 }
 0x5ea   : > { %2208 = vrot.lane.b32.xlu1 %v4706_v5, %s5604_s4  ;;  %2186 = vrot.lane.b32.xlu0 %v4696_v37, %s5605_s8 }
 0x5eb   : > { %2202 = vrot.lane.b32.xlu2 %v4696_v37, %s5607_s26 }
 0x5f2   : > { %2184 = vrot.lane.b32.xlu1 %v4706_v5, %s5605_s8  ;;  %2168 = vrot.lane.b32.xlu0 %v4696_v37, %s5609_s5 }
 0x5f3   : > { %2176 = vrot.lane.b32.xlu2 %v4696_v37, %s5610_s29 }
 0x5fa   : > { %2166 = vrot.lane.b32.xlu1 %v4706_v5, %s5609_s5  ;;  %2200 = vrot.lane.b32.xlu0 %v4706_v5, %s5607_s26 }
 0x5fb   : > { %2192 = vrot.lane.b32.xlu2 %v4706_v5, %s5606_s1 }
 0x602   : > { %2160 = vrot.lane.b32.xlu1 %v4696_v37, %s5608_s7  ;;  %2174 = vrot.lane.b32.xlu0 %v4706_v5, %s5610_s29 }
 0x603   : > { %2158 = vrot.lane.b32.xlu2 %v4706_v5, %s5608_s7 }
 0x60a   : > { %2150 = vrot.lane.b32.xlu0 %v4706_v5, %s5612_s20 }
 0x60b   : > { %2152 = vrot.lane.b32.xlu2 %v4696_v37, %s5612_s20 }
 0x615   : > { %v1922_v59 = vpop.permute.xlu2 %1921 }
 0x61d   : > { %v1898_v62 = vpop.permute.xlu2 %1897 }
 0x625   : > { %v1872_v27 = vpop.permute.xlu2 %1871 }
 0x62c   : > { %v1906_v18 = vpop.permute.xlu1 %1905  ;;  %v1914_v1 = vpop.permute.xlu0 %1913 }
 0x62d   : > { %v1904_v3 = vpop.permute.xlu2 %1903 }
 0x62e   : > { %v1907_v2 = vsel %vm1397_vm15, %v1904_v3, %v1906_v18  ;;  %v1908_v49 = vsel %vm1397_vm15, %v1906_v18, %v1904_v3  ;;  %v1893_v18 = vmul.f32 %v4674_v29, %v3980_v20  ;;  %v1894_v3 = vmul.f32 %v4658_v41, %v3986_v23 }
 0x62f   : > { %v1909_v61 = vmul.f32 %v1907_v2, %v3953_v57  ;;  %v1910_v10 = vmul.f32 %v1908_v49, %v3960_v60 }
 0x634   : > { %v1888_v28 = vpop.permute.xlu1 %1887  ;;  %v1880_v58 = vpop.permute.xlu0 %1879 }
 0x635   : > { %v1886_v53 = vpop.permute.xlu2 %1885 }
 0x636   : > { %v1890_v46 = vsel %vm1371_vm1, %v1888_v28, %v1886_v53  ;;  %v1889_v36 = vsel %vm1371_vm1, %v1886_v53, %v1888_v28 }
 0x637   : > { %v1892_v28 = vmul.f32 %v1889_v36, %v3997_v17 }
 0x63c   : > { %v1864_v39 = vpop.permute.xlu1 %1863  ;;  %v1920_v14 = vpop.permute.xlu0 %1919 }
 0x63d   : > { %v1923_v42 = vsel %vm1419_vm13, %v1920_v14, %v1922_v59  ;;  %v1924_v56 = vsel %vm1419_vm13, %v1922_v59, %v1920_v14  ;;  %v1862_v45 = vpop.permute.xlu2 %1861  ;;  %v1891_v14 = vmul.f32 %v1890_v46, %v3994_v24 }
 0x63e   : > { %v1925_v31 = vmul.f32 %v4577_v11, %v1923_v42  ;;  %v1926_v32 = vmul.f32 %v4587_v34, %v1924_v56  ;;  %v1866_v41 = vsel %vm5571_vm7, %v1864_v39, %v1862_v45 }
 0x63f   : > { %v1867_v2 = vmul.f32 %v1866_v41, %v4039_v9 }
 0x640   : > { %1937 = vmatpush.msrb.mxu1 %v1925_v31  ;;  %1957 = vmatpush.msrb.mxu2 %v1926_v32 }
 0x644   : > { %v1912_v12 = vpop.permute.xlu1 %1911  ;;  %v1896_v52 = vpop.permute.xlu0 %1895 }
 0x645   : > { %v1915_v47 = vsel %vm1408_vm14, %v1912_v12, %v1914_v1  ;;  %v1916_v7 = vsel %vm1408_vm14, %v1914_v1, %v1912_v12  ;;  %v1899_v38 = vsel %vm1386_vm0, %v1896_v52, %v1898_v62  ;;  %v1900_v13 = vsel %vm1386_vm0, %v1898_v62, %v1896_v52  ;;  %v2203_v12 = vpop.permute.xlu2 %2202 }
 0x646   : > { %v1917_v16 = vmul.f32 %v1915_v47, %v3922_v44  ;;  %v1918_v35 = vmul.f32 %v1916_v7, %v3947_v55  ;;  %v1901_v33 = vmul.f32 %v1899_v38, %v3977_v19  ;;  %v1902_v50 = vmul.f32 %v1900_v13, %v3983_v22  ;;  %v4790_v47 = vld [vmem:[%s5516_s14 + $0x20] sm:$0xff] }
 0x648   : > { %1938 = vmatpush.msrb.mxu1 %v1917_v16  ;;  %1958 = vmatpush.msrb.mxu2 %v1918_v35 }
 0x64a   : > { %1939 = vmatpush.msrb.mxu1 %v1909_v61  ;;  %1959 = vmatpush.msrb.mxu2 %v1910_v10 }
 0x64c   : > { %v1878_v59 = vpop.permute.xlu1 %1877  ;;  %1940 = vmatpush.msrb.mxu1 %v1901_v33  ;;  %1960 = vmatpush.msrb.mxu2 %v1902_v50  ;;  %v1870_v62 = vpop.permute.xlu0 %1869 }
 0x64d   : > { %v1882_v1 = vsel %vm1360_vm10, %v1880_v58, %v1878_v59  ;;  %v1881_v42 = vsel %vm1360_vm10, %v1878_v59, %v1880_v58  ;;  %v1874_v56 = vsel %vm1349_vm8, %v1872_v27, %v1870_v62  ;;  %v1873_v31 = vsel %vm1349_vm8, %v1870_v62, %v1872_v27  ;;  %v2177_v13 = vpop.permute.xlu2 %2176 }
 0x64e   : > { %1941 = vmatpush.msrb.mxu1 %v1893_v18  ;;  %1961 = vmatpush.msrb.mxu2 %v1894_v3  ;;  %v1883_v29 = vmul.f32 %v1882_v1, %v4016_v54  ;;  %v1884_v32 = vmul.f32 %v1881_v42, %v4019_v48  ;;  %v1865_v58 = vsel %vm5571_vm7, %v1862_v45, %v1864_v39 }
 0x64f   : > { %v1875_v53 = vmul.f32 %v1874_v56, %v4030_v63  ;;  %v1876_v52 = vmul.f32 %v1873_v31, %v4033_v0  ;;  %v1868_v7 = vmul.f32 %v1865_v58, %v4056_v30 }
 0x650   : > { %1942 = vmatpush.msrb.mxu1 %v1891_v14  ;;  %1962 = vmatpush.msrb.mxu2 %v1892_v28 }
 0x652   : > { %1943 = vmatpush.msrb.mxu1 %v1883_v29  ;;  %1963 = vmatpush.msrb.mxu2 %v1884_v32 }
 0x654   : > { %v2195_v27 = vpop.permute.xlu1 %2194  ;;  %v2211_v49 = vpop.permute.xlu0 %2210  ;;  %1944 = vmatpush.msrb.mxu1 %v1875_v53  ;;  %1964 = vmatpush.msrb.mxu2 %v1876_v52 }
 0x655   : > { %v2193_v50 = vpop.permute.xlu2 %2192 }
 0x656   : > { %1945 = vmatpush.msrb.mxu1 %v1867_v2  ;;  %1965 = vmatpush.msrb.mxu2 %v1868_v7  ;;  %v2196_v59 = vsel %vm1397_vm15, %v2193_v50, %v2195_v27  ;;  %v2197_v62 = vsel %vm1397_vm15, %v2195_v27, %v2193_v50 }
 0x657   : > { %3364 = vmatmul.msk.f32.vlgmr.msrb.gmra.mxu1 %vm5570_vm9, %v4790_v47  ;;  %3365 = vmatmul.msk.f32.vlgmr.msrb.gmra.mxu2 %vm5570_vm9, %v4790_v47  ;;  %v2198_v56 = vmul.f32 %v2196_v59, %v3953_v57  ;;  %v2199_v29 = vmul.f32 %v2197_v62, %v3960_v60  ;;  %v3475_v59 = vld [vmem:[%s5516_s14 + $0x8] sm:$0xff] }
 0x65c   : > { %v2209_v39 = vpop.permute.xlu1 %2208  ;;  %v2187_v16 = vpop.permute.xlu0 %2186 }
 0x65d   : > { %v2212_v35 = vsel %vm1419_vm13, %v2209_v39, %v2211_v49  ;;  %v2213_v38 = vsel %vm1419_vm13, %v2211_v49, %v2209_v39  ;;  %v2159_v31 = vpop.permute.xlu2 %2158  ;;  %v2183_v49 = vmul.f32 %v4696_v37, %v3986_v23 }
 0x65e   : > { %v2214_v61 = vmul.f32 %v4577_v11, %v2212_v35  ;;  %v2215_v10 = vmul.f32 %v4587_v34, %v2213_v38 }
 0x660   : > { %2223 = vmatpush.msra.mxu1 %v2214_v61  ;;  %2243 = vmatpush.msra.mxu2 %v2215_v10 }
 0x664   : > { %v2185_v45 = vpop.permute.xlu1 %2184  ;;  %v2169_v33 = vpop.permute.xlu0 %2168 }
 0x665   : > { %v2188_v42 = vsel %vm1386_vm0, %v2185_v45, %v2187_v16  ;;  %v2189_v28 = vsel %vm1386_vm0, %v2187_v16, %v2185_v45  ;;  %v2153_v10 = vpop.permute.xlu2 %2152 }
 0x666   : > { %v2190_v41 = vmul.f32 %v2188_v42, %v3977_v19  ;;  %v2191_v32 = vmul.f32 %v2189_v28, %v3983_v22 }
 0x66c   : > { %v2167_v46 = vpop.permute.xlu1 %2166  ;;  %v2201_v36 = vpop.permute.xlu0 %2200 }
 0x66d   : > { %v2204_v18 = vsel %vm1408_vm14, %v2201_v36, %v2203_v12  ;;  %v2205_v1 = vsel %vm1408_vm14, %v2203_v12, %v2201_v36  ;;  %v2182_v12 = vmul.f32 %v4706_v5, %v3980_v20  ;;  %v2171_v52 = vsel %vm1360_vm10, %v2169_v33, %v2167_v46 }
 0x66e   : > { %v2206_v3 = vmul.f32 %v2204_v18, %v3922_v44  ;;  %v2207_v14 = vmul.f32 %v2205_v1, %v3947_v55  ;;  %v2170_v7 = vsel %vm1360_vm10, %v2167_v46, %v2169_v33  ;;  %v2172_v35 = vmul.f32 %v2171_v52, %v4016_v54 }
 0x66f   : > { %v2173_v37 = vmul.f32 %v2170_v7, %v4019_v48 }
 0x670   : > { %2224 = vmatpush.msra.mxu1 %v2206_v3  ;;  %2244 = vmatpush.msra.mxu2 %v2207_v14 }
 0x672   : > { %2225 = vmatpush.msra.mxu1 %v2198_v56  ;;  %2245 = vmatpush.msra.mxu2 %v2199_v29 }
 0x674   : > { %v2161_v58 = vpop.permute.xlu1 %2160  ;;  %2246 = vmatpush.msra.mxu2 %v2191_v32  ;;  %v2175_v53 = vpop.permute.xlu0 %2174  ;;  %2226 = vmatpush.msra.mxu1 %v2190_v41 }
 0x675   : > { %v2178_v2 = vsel %vm1371_vm1, %v2175_v53, %v2177_v13  ;;  %v2179_v27 = vsel %vm1371_vm1, %v2177_v13, %v2175_v53  ;;  %v2163_v5 = vsel %vm1349_vm8, %v2161_v58, %v2159_v31  ;;  %v2162_v38 = vsel %vm1349_vm8, %v2159_v31, %v2161_v58 }
 0x676   : > { %v2180_v39 = vmul.f32 %v2179_v27, %v3994_v24  ;;  %v2181_v16 = vmul.f32 %v2178_v2, %v3997_v17  ;;  %2227 = vmatpush.msra.mxu1 %v2182_v12  ;;  %2247 = vmatpush.msra.mxu2 %v2183_v49  ;;  %v2164_v13 = vmul.f32 %v2163_v5, %v4030_v63 }
 0x677   : > { %v2165_v61 = vmul.f32 %v2162_v38, %v4033_v0 }
 0x678   : > { %2228 = vmatpush.msra.mxu1 %v2180_v39  ;;  %2248 = vmatpush.msra.mxu2 %v2181_v16 }
 0x67a   : > { %2229 = vmatpush.msra.mxu1 %v2172_v35  ;;  %2249 = vmatpush.msra.mxu2 %v2173_v37 }
 0x67c   : > { %v2151_v45 = vpop.permute.xlu0 %2150  ;;  %2230 = vmatpush.msra.mxu1 %v2164_v13  ;;  %2250 = vmatpush.msra.mxu2 %v2165_v61 }
 0x67d   : > { %v2154_v33 = vsel %vm5571_vm7, %v2151_v45, %v2153_v10  ;;  %v2155_v50 = vsel %vm5571_vm7, %v2153_v10, %v2151_v45 }
 0x67e   : > { %v2156_v46 = vmul.f32 %v2155_v50, %v4039_v9  ;;  %v2157_v36 = vmul.f32 %v2154_v33, %v4056_v30 }
 0x680   : > { %2231 = vmatpush.msra.mxu1 %v2156_v46  ;;  %2251 = vmatpush.msra.mxu2 %v2157_v36 }
 0x681   : > { %3368 = vmatmul.msk.f32.vlgmr.msra.gmra.mxu1 %vm5570_vm9, %v3475_v59  ;;  %3369 = vmatmul.msk.f32.vlgmr.msra.gmra.mxu2 %vm5570_vm9, %v3475_v59 }
 0x6d4   : > { %v1947_v62 = vpop.f32.mrf.mxu1 }
 0x6d5   : > { %v1970_v18 = vsel %vm1331_vm6, %v1947_v62, -inf }
 0x6d6   : > { %v1971_v1 = vrot.slane %v1970_v18, 4 }
 0x6d8   : > { %v1972_v3 = vmax.f32 %v1970_v18, %v1971_v1 }
 0x6da   : > { %v1973_v14 = vrot.slane %v1972_v3, 2  ;;  %v1967_v42 = vpop.f32.mrf.mxu2 }
 0x6db   : > { %v1977_v56 = vsel %vm1331_vm6, %v1967_v42, -inf }
 0x6dc   : > { %v1974_v28 = vmax.f32 %v1972_v3, %v1973_v14  ;;  %v1978_v29 = vrot.slane %v1977_v56, 4 }
 0x6de   : > { %v1975_v31 = vrot.slane %v1974_v28, 1  ;;  %v1979_v41 = vmax.f32 %v1977_v56, %v1978_v29 }
 0x6e0   : > { %v1976_v32 = vmax.f32 %v1974_v28, %v1975_v31  ;;  %v1980_v58 = vrot.slane %v1979_v41, 2 }
 0x6e2   : > { %v1984_v53 = vsub.f32 %v1947_v62, %v1976_v32  ;;  %v1981_v12 = vmax.f32 %v1979_v41, %v1980_v58 }
 0x6e4   : > { %v1986_v52 = vmul.f32 1.442695, %v1984_v53  ;;  %v1982_v2 = vrot.slane %v1981_v12, 1 }
 0x6e6   : > { %3445 = vpow2.f32 %v1986_v52  ;;  %v1983_v27 = vmax.f32 %v1981_v12, %v1982_v2 }
 0x6e8   : > { %v1985_v49 = vsub.f32 %v1967_v42, %v1983_v27 }
 0x6ea   : > { %v1988_v7 = vmul.f32 1.442695, %v1985_v49 }
 0x6ec   : > { %v3446_v39 = vpop.eup %3445  ;;  %3447 = vpow2.f32 %v1988_v7 }
 0x6ed   : > { %v1990_v16 = vsel %vm1331_vm6, %v3446_v39, 0.0 }
 0x6ee   : > { %v1991_v5 = vrot.slane %v1990_v16, 4 }
 0x6f0   : > { %v1992_v35 = vadd.f32 %v1991_v5, %v1990_v16 }
 0x6f2   : > { %v1993_v38 = vrot.slane %v1992_v35, 2  ;;  %v3448_v37 = vpop.eup %3447 }
 0x6f3   : > { %v1997_v61 = vsel %vm1331_vm6, %v3448_v37, 0.0 }
 0x6f4   : > { %v1994_v13 = vadd.f32 %v1993_v38, %v1992_v35  ;;  %v1998_v10 = vrot.slane %v1997_v61, 4 }
 0x6f6   : > { %v1995_v45 = vrot.slane %v1994_v13, 1  ;;  %v1999_v33 = vadd.f32 %v1998_v10, %v1997_v61 }
 0x6f8   : > { %v1996_v50 = vadd.f32 %v1995_v45, %v1994_v13  ;;  %v2000_v46 = vrot.slane %v1999_v33, 2 }
 0x6fa   : > { %3449 = vrcp.f32 %v1996_v50  ;;  %v2001_v36 = vadd.f32 %v2000_v46, %v1999_v33  ;;  %vm2009_vm5 = vweird.f32 %v1996_v50  ;;  %v2013_v32 = vand.u32 2147483647, %v1996_v50 }
 0x6fb   : > { %v2015_v58 = vand.u32 2147483648, %v1996_v50 }
 0x6fc   : > { %v2002_v59 = vrot.slane %v2001_v36, 1  ;;  %vm2014_vm9 = vcmp.eq.f32.partialorder %v2013_v32, 8.507059e+37 }
 0x6fd   : > { %v2016_v5 = vor.u32 1.1754944e-38, %v2015_v58 }
 0x6fe   : > { %v2233_v62 = vpop.f32.mrf.mxu1  ;;  %v2003_v18 = vadd.f32 %v2002_v59, %v2001_v36 }
 0x6ff   : > { %v2256_v1 = vmul.f32 %v2233_v62, %v4276_v25 }
 0x700   : > { %v3450_v3 = vpop.eup %3449  ;;  %3451 = vrcp.f32 %v2003_v18  ;;  %vm2024_vm3 = vweird.f32 %v2003_v18  ;;  %v2030_v53 = vand.u32 2147483648, %v2003_v18  ;;  %v2028_v27 = vand.u32 2147483647, %v2003_v18 }
 0x701   : > { %v2005_v14 = vmul.f32 %v3450_v3, %v1996_v50  ;;  %v2258_v42 = vadd.f32 %v2256_v1, %v4278_v40  ;;  %vm2010_vm12 = vweird.f32 %v3450_v3 }
 0x702   : > { %vm4868_vm2 = vmor %vm2009_vm5, %vm2010_vm12  ;;  %v2031_v35 = vor.u32 1.1754944e-38, %v2030_v53  ;;  %vm2029_vm7 = vcmp.eq.f32.partialorder %v2028_v27, 8.507059e+37 }
 0x703   : > { %v2006_v28 = vsub.f32 1.0, %v2005_v14  ;;  %v4860_v56 = vmax.f32 %v2258_v42, 0.0 }
 0x704   : > { %v2253_v12 = vpop.f32.mrf.mxu2 }
 0x705   : > { %v2007_v29 = vmul.f32 %v3450_v3, %v2006_v28  ;;  %2304 = vrot.lane.b32.xlu0 %v4860_v56, %s5606_s1  ;;  %2312 = vrot.lane.b32.xlu2 %v4860_v56, %s5607_s26  ;;  %v2257_v16 = vmul.f32 %v2253_v12, %v4276_v25 }
 0x706   : > { %v3452_v31 = vpop.eup %3451  ;;  %2320 = vrot.lane.b32.xlu1 %v4860_v56, %s5604_s4 }
 0x707   : > { %v2020_v41 = vmul.f32 %v3452_v31, %v2003_v18  ;;  %v2008_v52 = vadd.f32 %v3450_v3, %v2007_v29  ;;  %vm2025_vm4 = vweird.f32 %v3452_v31  ;;  %v2259_v25 = vadd.f32 %v2257_v16, %v4278_v40 }
 0x708   : > { %vm2026_vm11 = vmor %vm2024_vm3, %vm2025_vm4  ;;  %vm5617_vm4 = vcmask 588800  }
 0x709   : > { %v2021_v2 = vsub.f32 1.0, %v2020_v41  ;;  %v2012_v38 = vsel %vm4868_vm2, %v3450_v3, %v2008_v52  ;;  %v2261_v36 = vmax.f32 %v2259_v25, 0.0  ;;  %vm5615_vm2 = vcmp.lt.s32.totalorder %v3771_v21, 17  ;;  %vm5621_vm12 = vmmov %vm5617_vm4 }
 0x70a   : > { %v2017_v10 = vsel %vm2014_vm9, %v2016_v5, %v2012_v38  ;;  %vm5616_vm3 = vmmov %vm5615_vm2 }
 0x70b   : > { %v2022_v7 = vmul.f32 %v3452_v31, %v2021_v2  ;;  %v4885_v50 = vmul.f32 %v3446_v39, %v2017_v10  ;;  %vm5619_vm9 = vmmov %vm5615_vm2 }
 0x70c   : > { %vm5622_vm5 = vmmov %vm5617_vm4 }
 0x70d   : > { %v2023_v13 = vadd.f32 %v3452_v31, %v2022_v7  ;;  %2278 = vrot.lane.b32.xlu0 %v4860_v56, %s5609_s5  ;;  %2286 = vrot.lane.b32.xlu2 %v4860_v56, %s5610_s29 }
 0x70e   : > { %2296 = vrot.lane.b32.xlu1 %v4860_v56, %s5605_s8 }
 0x70f   : > { %v2027_v61 = vsel %vm2026_vm11, %v3452_v31, %v2023_v13  ;;  %vm5620_vm11 = vmmov %vm5615_vm2 }
 0x710   : > { %v2032_v45 = vsel %vm2029_vm7, %v2031_v35, %v2027_v61  ;;  %vm5618_vm7 = vmmov %vm5617_vm4 }
 0x711   : > { %v4883_v33 = vmul.f32 %v3448_v37, %v2032_v45  ;;  %v2294_v45 = vmul.f32 %v4860_v56, %v3980_v20 }
 0x713   : > { %v2660_v46 = vrot.slane %v4883_v33, 6 }
 0x715   : > { %v2662_v59 = vsel %vm1331_vm6, %v4885_v50, %v2660_v46  ;;  %2322 = vrot.lane.b32.xlu0 %v2261_v36, %s5604_s4  ;;  %2306 = vrot.lane.b32.xlu2 %v2261_v36, %s5606_s1  ;;  %v2295_v46 = vmul.f32 %v2261_v36, %v3986_v23 }
 0x716   : > { %2666 = vst [vmem:[%s4890_s27] sm:$0xf] %v2662_v59  ;;  %2270 = vrot.lane.b32.xlu1 %v4860_v56, %s5608_s7 }
 0x71d   : > { %2298 = vrot.lane.b32.xlu0 %v2261_v36, %s5605_s8  ;;  %2280 = vrot.lane.b32.xlu2 %v2261_v36, %s5609_s5 }
 0x71e   : > { %2314 = vrot.lane.b32.xlu1 %v2261_v36, %s5607_s26 }
 0x725   : > { %2272 = vrot.lane.b32.xlu0 %v2261_v36, %s5608_s7  ;;  %2262 = vrot.lane.b32.xlu2 %v4860_v56, %s5612_s20 }
 0x726   : > { %2288 = vrot.lane.b32.xlu1 %v2261_v36, %s5610_s29 }
 0x72e   : > { %2264 = vrot.lane.b32.xlu1 %v2261_v36, %s5612_s20 }
 0x75f   : > { %v2313_v39 = vpop.permute.xlu2 %2312 }
 0x767   : > { %v2287_v1 = vpop.permute.xlu2 %2286 }
 0x76f   : > { %v2307_v41 = vpop.permute.xlu2 %2306 }
 0x777   : > { %v2305_v40 = vpop.permute.xlu0 %2304  ;;  %v2281_v38 = vpop.permute.xlu2 %2280 }
 0x778   : > { %v2321_v37 = vpop.permute.xlu1 %2320  ;;  %v2308_v53 = vsel %vm1397_vm15, %v2305_v40, %v2307_v41  ;;  %v2309_v12 = vsel %vm1397_vm15, %v2307_v41, %v2305_v40 }
 0x779   : > { %v2310_v5 = vmul.f32 %v2308_v53, %v3953_v57  ;;  %v2311_v35 = vmul.f32 %v2309_v12, %v3960_v60  ;;  %v3476_v53 = vld [vmem:[%s5516_s14 + $0x10] sm:$0xff] }
 0x77f   : > { %v2279_v62 = vpop.permute.xlu0 %2278 }
 0x780   : > { %v2297_v18 = vpop.permute.xlu1 %2296  ;;  %v2282_v59 = vsel %vm1360_vm10, %v2279_v62, %v2281_v38  ;;  %v2283_v40 = vsel %vm1360_vm10, %v2281_v38, %v2279_v62 }
 0x781   : > { %v2284_v62 = vmul.f32 %v2283_v40, %v4016_v54 }
 0x787   : > { %v2323_v3 = vpop.permute.xlu0 %2322 }
 0x788   : > { %v2324_v14 = vsel %vm1419_vm13, %v2321_v37, %v2323_v3  ;;  %v2325_v42 = vsel %vm1419_vm13, %v2323_v3, %v2321_v37  ;;  %v2271_v28 = vpop.permute.xlu1 %2270 }
 0x789   : > { %v2326_v29 = vmul.f32 %v4577_v11, %v2324_v14  ;;  %v2327_v31 = vmul.f32 %v4587_v34, %v2325_v42  ;;  %v2285_v14 = vmul.f32 %v2282_v59, %v4019_v48 }
 0x78b   : > { %2335 = vmatpush.msra.mxu3 %v2326_v29  ;;  %2355 = vmatpush.msrb.mxu0 %v2327_v31  ;;  %v2263_v29 = vpop.permute.xlu2 %2262 }
 0x78f   : > { %v2299_v32 = vpop.permute.xlu0 %2298 }
 0x790   : > { %v2315_v58 = vpop.permute.xlu1 %2314  ;;  %v2300_v7 = vsel %vm1386_vm0, %v2297_v18, %v2299_v32  ;;  %v2301_v16 = vsel %vm1386_vm0, %v2299_v32, %v2297_v18 }
 0x791   : > { %v2316_v52 = vsel %vm1408_vm14, %v2313_v39, %v2315_v58  ;;  %v2317_v2 = vsel %vm1408_vm14, %v2315_v58, %v2313_v39  ;;  %v2302_v13 = vmul.f32 %v2300_v7, %v3977_v19  ;;  %v2303_v61 = vmul.f32 %v2301_v16, %v3983_v22 }
 0x792   : > { %v2318_v27 = vmul.f32 %v2316_v52, %v3922_v44  ;;  %v2319_v49 = vmul.f32 %v2317_v2, %v3947_v55 }
 0x794   : > { %2336 = vmatpush.msra.mxu3 %v2318_v27  ;;  %2356 = vmatpush.msrb.mxu0 %v2319_v49 }
 0x796   : > { %2337 = vmatpush.msra.mxu3 %v2310_v5  ;;  %2357 = vmatpush.msrb.mxu0 %v2311_v35 }
 0x797   : > { %v2273_v25 = vpop.permute.xlu0 %2272 }
 0x798   : > { %2338 = vmatpush.msra.mxu3 %v2302_v13  ;;  %2358 = vmatpush.msrb.mxu0 %v2303_v61  ;;  %v2289_v10 = vpop.permute.xlu1 %2288  ;;  %v2274_v56 = vsel %vm1349_vm8, %v2271_v28, %v2273_v25  ;;  %v2275_v36 = vsel %vm1349_vm8, %v2273_v25, %v2271_v28 }
 0x799   : > { %v2290_v39 = vsel %vm1371_vm1, %v2287_v1, %v2289_v10  ;;  %v2291_v37 = vsel %vm1371_vm1, %v2289_v10, %v2287_v1  ;;  %v2276_v1 = vmul.f32 %v2275_v36, %v4030_v63  ;;  %v2277_v42 = vmul.f32 %v2274_v56, %v4033_v0 }
 0x79a   : > { %v2292_v18 = vmul.f32 %v2291_v37, %v3994_v24  ;;  %v2293_v3 = vmul.f32 %v2290_v39, %v3997_v17  ;;  %2339 = vmatpush.msra.mxu3 %v2294_v45  ;;  %2359 = vmatpush.msrb.mxu0 %v2295_v46 }
 0x79c   : > { %2340 = vmatpush.msra.mxu3 %v2292_v18  ;;  %2360 = vmatpush.msrb.mxu0 %v2293_v3 }
 0x79e   : > { %2341 = vmatpush.msra.mxu3 %v2284_v62  ;;  %2361 = vmatpush.msrb.mxu0 %v2285_v14 }
 0x7a0   : > { %2362 = vmatpush.msrb.mxu0 %v2277_v42  ;;  %v2265_v31 = vpop.permute.xlu1 %2264  ;;  %2342 = vmatpush.msra.mxu3 %v2276_v1 }
 0x7a1   : > { %v2266_v41 = vsel %vm5615_vm2, %v2263_v29, %v2265_v31  ;;  %v2267_v28 = vsel %vm5616_vm3, %v2265_v31, %v2263_v29 }
 0x7a2   : > { %v2268_v32 = vmul.f32 %v2267_v28, %v4039_v9  ;;  %v2269_v58 = vmul.f32 %v2266_v41, %v4056_v30 }
 0x7a4   : > { %2343 = vmatpush.msra.mxu3 %v2268_v32  ;;  %2363 = vmatpush.msrb.mxu0 %v2269_v58 }
 0x7a5   : > { %3370 = vmatmul.msk.f32.vlgmr.msra.gmra.mxu3 %vm5617_vm4, %v3476_v53  ;;  %3371 = vmatmul.msk.f32.vlgmr.msrb.gmra.mxu0 %vm5618_vm7, %v3476_v53 }
 0x822   : > { %v2365_v12 = vpop.f32.mrf.mxu0 }
 0x823   : > { %v2369_v52 = vmul.f32 %v2365_v12, %v4425_v51 }
 0x825   : > { %v2371_v2 = vadd.f32 %v2369_v52, %v4428_v8 }
 0x827   : > { %v2373_v27 = vmax.f32 %v2371_v2, 0.0 }
 0x828   : > { %v2345_v49 = vpop.f32.mrf.mxu3 }
 0x829   : > { %2418 = vrot.lane.b32.xlu1 %v2373_v27, %s5606_s1  ;;  %2426 = vrot.lane.b32.xlu0 %v2373_v27, %s5607_s26  ;;  %v2368_v7 = vmul.f32 %v2345_v49, %v4425_v51  ;;  %v2407_v12 = vmul.f32 %v2373_v27, %v3986_v23 }
 0x82a   : > { %2434 = vrot.lane.b32.xlu2 %v2373_v27, %s5604_s4 }
 0x82b   : > { %v2370_v16 = vadd.f32 %v2368_v7, %v4428_v8 }
 0x82d   : > { %v2372_v5 = vmax.f32 %v2370_v16, 0.0 }
 0x82f   : > { %v2406_v53 = vmul.f32 %v2372_v5, %v3980_v20 }
 0x831   : > { %2392 = vrot.lane.b32.xlu1 %v2373_v27, %s5609_s5  ;;  %2400 = vrot.lane.b32.xlu0 %v2373_v27, %s5610_s29 }
 0x832   : > { %2410 = vrot.lane.b32.xlu2 %v2373_v27, %s5605_s8 }
 0x839   : > { %2424 = vrot.lane.b32.xlu1 %v2372_v5, %s5607_s26  ;;  %2432 = vrot.lane.b32.xlu0 %v2372_v5, %s5604_s4 }
 0x83a   : > { %2416 = vrot.lane.b32.xlu2 %v2372_v5, %s5606_s1 }
 0x841   : > { %2398 = vrot.lane.b32.xlu1 %v2372_v5, %s5610_s29  ;;  %2408 = vrot.lane.b32.xlu0 %v2372_v5, %s5605_s8 }
 0x842   : > { %2390 = vrot.lane.b32.xlu2 %v2372_v5, %s5609_s5 }
 0x849   : > { %2374 = vrot.lane.b32.xlu1 %v2372_v5, %s5612_s20  ;;  %2382 = vrot.lane.b32.xlu0 %v2372_v5, %s5608_s7 }
 0x84a   : > { %2384 = vrot.lane.b32.xlu2 %v2373_v27, %s5608_s7 }
 0x851   : > { %2376 = vrot.lane.b32.xlu0 %v2373_v27, %s5612_s20 }
 0x884   : > { %v2435_v51 = vpop.permute.xlu2 %2434 }
 0x88c   : > { %v2411_v38 = vpop.permute.xlu2 %2410 }
 0x894   : > { %v2417_v25 = vpop.permute.xlu2 %2416 }
 0x89b   : > { %v2419_v8 = vpop.permute.xlu1 %2418  ;;  %v2427_v35 = vpop.permute.xlu0 %2426 }
 0x89c   : > { %v2420_v3 = vsel %vm1397_vm15, %v2417_v25, %v2419_v8  ;;  %v2421_v56 = vsel %vm1397_vm15, %v2419_v8, %v2417_v25  ;;  %v2391_v42 = vpop.permute.xlu2 %2390 }
 0x89d   : > { %v2422_v14 = vmul.f32 %v2420_v3, %v3953_v57  ;;  %v2423_v1 = vmul.f32 %v2421_v56, %v3960_v60 }
 0x8a3   : > { %v2393_v13 = vpop.permute.xlu1 %2392  ;;  %v2401_v61 = vpop.permute.xlu0 %2400 }
 0x8a4   : > { %v2394_v52 = vsel %vm1360_vm10, %v2391_v42, %v2393_v13  ;;  %v2395_v2 = vsel %vm1360_vm10, %v2393_v13, %v2391_v42  ;;  %v2385_v8 = vpop.permute.xlu2 %2384 }
 0x8a5   : > { %v2396_v16 = vmul.f32 %v2395_v2, %v4016_v54 }
 0x8ab   : > { %v2425_v10 = vpop.permute.xlu1 %2424  ;;  %v2433_v45 = vpop.permute.xlu0 %2432 }
 0x8ac   : > { %v2428_v46 = vsel %vm1408_vm14, %v2425_v10, %v2427_v35  ;;  %v2429_v59 = vsel %vm1408_vm14, %v2427_v35, %v2425_v10  ;;  %v2436_v40 = vsel %vm1419_vm13, %v2433_v45, %v2435_v51  ;;  %v2437_v39 = vsel %vm1419_vm13, %v2435_v51, %v2433_v45 }
 0x8ad   : > { %v2438_v37 = vmul.f32 %v4577_v11, %v2436_v40  ;;  %v2439_v18 = vmul.f32 %v4587_v34, %v2437_v39  ;;  %v2430_v36 = vmul.f32 %v2428_v46, %v3922_v44  ;;  %v2431_v62 = vmul.f32 %v2429_v59, %v3947_v55  ;;  %v3477_v40 = vld [vmem:[%s5516_s14 + $0x18] sm:$0xff] }
 0x8ae   : > { %v2397_v51 = vmul.f32 %v2394_v52, %v4019_v48 }
 0x8af   : > { %2447 = vmatpush.msrb.mxu1 %v2438_v37  ;;  %2467 = vmatpush.msrb.mxu2 %v2439_v18 }
 0x8b1   : > { %2448 = vmatpush.msrb.mxu1 %v2430_v36  ;;  %2468 = vmatpush.msrb.mxu2 %v2431_v62 }
 0x8b3   : > { %v2399_v11 = vpop.permute.xlu1 %2398  ;;  %2449 = vmatpush.msrb.mxu1 %v2422_v14  ;;  %2469 = vmatpush.msrb.mxu2 %v2423_v1  ;;  %v2409_v34 = vpop.permute.xlu0 %2408 }
 0x8b4   : > { %v2412_v29 = vsel %vm1386_vm0, %v2409_v34, %v2411_v38  ;;  %v2413_v31 = vsel %vm1386_vm0, %v2411_v38, %v2409_v34  ;;  %v2402_v32 = vsel %vm1371_vm1, %v2399_v11, %v2401_v61  ;;  %v2403_v58 = vsel %vm1371_vm1, %v2401_v61, %v2399_v11 }
 0x8b5   : > { %v2414_v41 = vmul.f32 %v2412_v29, %v3977_v19  ;;  %v2415_v28 = vmul.f32 %v2413_v31, %v3983_v22  ;;  %v2404_v49 = vmul.f32 %v2403_v58, %v3994_v24  ;;  %v2405_v7 = vmul.f32 %v2402_v32, %v3997_v17 }
 0x8b7   : > { %2450 = vmatpush.msrb.mxu1 %v2414_v41  ;;  %2470 = vmatpush.msrb.mxu2 %v2415_v28 }
 0x8b9   : > { %2451 = vmatpush.msrb.mxu1 %v2406_v53  ;;  %2471 = vmatpush.msrb.mxu2 %v2407_v12 }
 0x8bb   : > { %2472 = vmatpush.msrb.mxu2 %v2405_v7  ;;  %v2383_v5 = vpop.permute.xlu0 %2382  ;;  %2452 = vmatpush.msrb.mxu1 %v2404_v49  ;;  %v2375_v61 = vpop.permute.xlu1 %2374  ;;  %v3478_v49 = vld [vmem:[%s5600_s6 + $0x10] ss:$0 sm:$0xff] }
 0x8bc   : > { %v2386_v27 = vsel %vm1349_vm8, %v2383_v5, %v2385_v8  ;;  %v2387_v35 = vsel %vm1349_vm8, %v2385_v8, %v2383_v5 }
 0x8bd   : > { %v2388_v38 = vmul.f32 %v2387_v35, %v4030_v63  ;;  %v2389_v13 = vmul.f32 %v2386_v27, %v4033_v0  ;;  %2453 = vmatpush.msrb.mxu1 %v2396_v16  ;;  %2473 = vmatpush.msrb.mxu2 %v2397_v51  ;;  %v3479_v16 = vld [vmem:[%s5600_s6 + $0x18] ss:$0 sm:$0xff] }
 0x8bf   : > { %2454 = vmatpush.msrb.mxu1 %v2388_v38  ;;  %2474 = vmatpush.msrb.mxu2 %v2389_v13 }
 0x8c3   : > { %v2377_v25 = vpop.permute.xlu0 %2376 }
 0x8c4   : > { %v2378_v10 = vsel %vm5619_vm9, %v2375_v61, %v2377_v25  ;;  %v2379_v45 = vsel %vm5620_vm11, %v2377_v25, %v2375_v61 }
 0x8c5   : > { %v2380_v46 = vmul.f32 %v2379_v45, %v4039_v9  ;;  %v2381_v59 = vmul.f32 %v2378_v10, %v4056_v30 }
 0x8c7   : > { %2455 = vmatpush.msrb.mxu1 %v2380_v46  ;;  %2475 = vmatpush.msrb.mxu2 %v2381_v59 }
 0x8c8   : > { %3372 = vmatmul.msk.f32.vlgmr.msrb.gmra.mxu1 %vm5621_vm12, %v3477_v40  ;;  %3373 = vmatmul.msk.f32.vlgmr.msrb.gmra.mxu2 %vm5622_vm5, %v3477_v40 }
 0x945   : > { %v2457_v39 = vpop.f32.mrf.mxu1 }
 0x946   : > { %v2480_v37 = vmul.f32 %v2457_v39, %v4652_v15 }
 0x948   : > { %v2482_v18 = vadd.f32 %v2480_v37, %v4655_v6 }
 0x94a   : > { %v5041_v3 = vmax.f32 %v2482_v18, 0.0 }
 0x94b   : > { %v2477_v56 = vpop.f32.mrf.mxu2 }
 0x94c   : > { %2528 = vrot.lane.b32.xlu1 %v5041_v3, %s5606_s1  ;;  %2536 = vrot.lane.b32.xlu0 %v5041_v3, %s5607_s26  ;;  %v2481_v36 = vmul.f32 %v2477_v56, %v4652_v15  ;;  %v3438_v15 = vld [vmem:[%s5515_s13] ss:$0 sm:$0xff]  ;;  %v2518_v59 = vmul.f32 %v5041_v3, %v3980_v20 }
 0x94d   : > { %2544 = vrot.lane.b32.xlu2 %v5041_v3, %s5604_s4 }
 0x94e   : > { %v2483_v62 = vadd.f32 %v2481_v36, %v4655_v6  ;;  %v1237_v6 = vadd.f32 %v3438_v15, %v4423_v43 }
 0x950   : > { %v2485_v14 = vmax.f32 %v2483_v62, 0.0  ;;  %v5072_v1 = vmax.f32 %v1237_v6, 0.0 }
 0x952   : > { %v2519_v40 = vmul.f32 %v2485_v14, %v3986_v23 }
 0x954   : > { %2502 = vrot.lane.b32.xlu1 %v5041_v3, %s5609_s5  ;;  %2510 = vrot.lane.b32.xlu0 %v5041_v3, %s5610_s29 }
 0x955   : > { %2520 = vrot.lane.b32.xlu2 %v5041_v3, %s5605_s8 }
 0x95c   : > { %2546 = vrot.lane.b32.xlu1 %v2485_v14, %s5604_s4  ;;  %2530 = vrot.lane.b32.xlu0 %v2485_v14, %s5606_s1  ;;  %s3499_s4 = smov 96  }
 0x95d   : > { %2494 = vrot.lane.b32.xlu2 %v5041_v3, %s5608_s7 }
 0x964   : > { %2522 = vrot.lane.b32.xlu1 %v2485_v14, %s5605_s8  ;;  %2504 = vrot.lane.b32.xlu0 %v2485_v14, %s5609_s5  ;;  %s3500_s5 = smov 32  }
 0x965   : > { %2538 = vrot.lane.b32.xlu2 %v2485_v14, %s5607_s26 }
 0x96c   : > { %2496 = vrot.lane.b32.xlu1 %v2485_v14, %s5608_s7  ;;  %2486 = vrot.lane.b32.xlu0 %v5041_v3, %s5612_s20 }
 0x96d   : > { %2512 = vrot.lane.b32.xlu2 %v2485_v14, %s5610_s29 }
 0x974   : > { %1241 = vrot.lane.b32.xlu1 %v5072_v1, %s3499_s4 }
 0x975   : > { %2488 = vrot.lane.b32.xlu2 %v2485_v14, %s5612_s20 }
 0x9a7   : > { %v2545_v42 = vpop.permute.xlu2 %2544 }
 0x9af   : > { %v2521_v11 = vpop.permute.xlu2 %2520 }
 0x9b7   : > { %v2495_v31 = vpop.permute.xlu2 %2494 }
 0x9be   : > { %v2529_v34 = vpop.permute.xlu1 %2528  ;;  %v2537_v29 = vpop.permute.xlu0 %2536 }
 0x9bf   : > { %v2539_v32 = vpop.permute.xlu2 %2538 }
 0x9c0   : > { %v2540_v43 = vsel %vm1408_vm14, %v2537_v29, %v2539_v32  ;;  %v2541_v12 = vsel %vm1408_vm14, %v2539_v32, %v2537_v29  ;;  %vm5626_vm14 = vmmov %vm5617_vm4 }
 0x9c1   : > { %v2542_v27 = vmul.f32 %v2540_v43, %v3922_v44  ;;  %v2543_v35 = vmul.f32 %v2541_v12, %v3947_v55 }
 0x9c6   : > { %v2503_v41 = vpop.permute.xlu1 %2502  ;;  %v2511_v28 = vpop.permute.xlu0 %2510 }
 0x9c7   : > { %v2513_v38 = vpop.permute.xlu2 %2512 }
 0x9ce   : > { %v2547_v58 = vpop.permute.xlu1 %2546  ;;  %v2531_v53 = vpop.permute.xlu0 %2530 }
 0x9cf   : > { %v2548_v52 = vsel %vm1419_vm13, %v2545_v42, %v2547_v58  ;;  %v2549_v2 = vsel %vm1419_vm13, %v2547_v58, %v2545_v42  ;;  %v2532_v8 = vsel %vm1397_vm15, %v2529_v34, %v2531_v53  ;;  %v2533_v5 = vsel %vm1397_vm15, %v2531_v53, %v2529_v34  ;;  %v2489_v18 = vpop.permute.xlu2 %2488  ;;  %vm5623_vm13 = vmmov %vm5615_vm2 }
 0x9d0   : > { %v2550_v7 = vmul.f32 %v3478_v49, %v2548_v52  ;;  %v2551_v51 = vmul.f32 %v3479_v16, %v2549_v2  ;;  %v2534_v13 = vmul.f32 %v2532_v8, %v3953_v57  ;;  %v2535_v61 = vmul.f32 %v2533_v5, %v3960_v60 }
 0x9d1   : > { %v2514_v57 = vsel %vm1371_vm1, %v2511_v28, %v2513_v38  ;;  %v2515_v60 = vsel %vm1371_vm1, %v2513_v38, %v2511_v28 }
 0x9d2   : > { %2559 = vmatpush.msrb.mxu3 %v2550_v7  ;;  %2579 = vmatpush.msra.mxu0 %v2551_v51 }
 0x9d4   : > { %2560 = vmatpush.msrb.mxu3 %v2542_v27  ;;  %2580 = vmatpush.msra.mxu0 %v2543_v35 }
 0x9d6   : > { %v2523_v25 = vpop.permute.xlu1 %2522  ;;  %v2505_v10 = vpop.permute.xlu0 %2504  ;;  %2561 = vmatpush.msrb.mxu3 %v2534_v13  ;;  %2581 = vmatpush.msra.mxu0 %v2535_v61 }
 0x9d7   : > { %v2524_v45 = vsel %vm1386_vm0, %v2521_v11, %v2523_v25  ;;  %v2525_v44 = vsel %vm1386_vm0, %v2523_v25, %v2521_v11  ;;  %v2507_v39 = vsel %vm1360_vm10, %v2505_v10, %v2503_v41  ;;  %v2506_v37 = vsel %vm1360_vm10, %v2503_v41, %v2505_v10  ;;  %vm5624_vm10 = vmmov %vm5615_vm2 }
 0x9d8   : > { %v2526_v55 = vmul.f32 %v2524_v45, %v3977_v19  ;;  %v2527_v46 = vmul.f32 %v2525_v44, %v3983_v22  ;;  %v2516_v19 = vmul.f32 %v2515_v60, %v3994_v24  ;;  %v2517_v22 = vmul.f32 %v2514_v57, %v3997_v17 }
 0x9d9   : > { %v2508_v56 = vmul.f32 %v2507_v39, %v4016_v54  ;;  %v2509_v20 = vmul.f32 %v2506_v37, %v4019_v48  ;;  %v5627_v11 = vlaneseq }
 0x9da   : > { %2562 = vmatpush.msrb.mxu3 %v2526_v55  ;;  %2582 = vmatpush.msra.mxu0 %v2527_v46 }
 0x9db   : > { %v5143_v34 = vshrl.u32 %v5627_v11, 7 }
 0x9dc   : > { %2563 = vmatpush.msrb.mxu3 %v2518_v59  ;;  %2583 = vmatpush.msra.mxu0 %v2519_v40 }
 0x9dd   : > { %3409 = vset.pattern.permute.xlu0 %v5143_v34  ;;  %3411 = vset.pattern.permute.xlu1 %v5143_v34 }
 0x9de   : > { %v2497_v36 = vpop.permute.xlu1 %2496  ;;  %v2487_v62 = vpop.permute.xlu0 %2486  ;;  %2564 = vmatpush.msrb.mxu3 %v2516_v19  ;;  %2584 = vmatpush.msra.mxu0 %v2517_v22 }
 0x9df   : > { %v2498_v23 = vsel %vm1349_vm8, %v2495_v31, %v2497_v36  ;;  %v2499_v24 = vsel %vm1349_vm8, %v2497_v36, %v2495_v31  ;;  %v2491_v17 = vsel %vm5623_vm13, %v2489_v18, %v2487_v62  ;;  %v2490_v54 = vsel %vm5624_vm10, %v2487_v62, %v2489_v18  ;;  %vm5625_vm8 = vmmov %vm5617_vm4 }
 0x9e0   : > { %v2500_v3 = vmul.f32 %v2499_v24, %v4030_v63  ;;  %v2501_v14 = vmul.f32 %v2498_v23, %v4033_v0  ;;  %2565 = vmatpush.msrb.mxu3 %v2508_v56  ;;  %2585 = vmatpush.msra.mxu0 %v2509_v20  ;;  %v2492_v48 = vmul.f32 %v2491_v17, %v4039_v9 }
 0x9e1   : > { %v2493_v15 = vmul.f32 %v2490_v54, %v4056_v30 }
 0x9e2   : > { %2566 = vmatpush.msrb.mxu3 %v2500_v3  ;;  %2586 = vmatpush.msra.mxu0 %v2501_v14 }
 0x9e4   : > { %2567 = vmatpush.msrb.mxu3 %v2492_v48  ;;  %2587 = vmatpush.msra.mxu0 %v2493_v15 }
 0x9e5   : > { %3374 = vmatmul.msk.f32.vlgmr.msrb.gmra.mxu3 %vm5625_vm8, %v4790_v47  ;;  %3375 = vmatmul.msk.f32.vlgmr.msra.gmra.mxu0 %vm5626_vm14, %v4790_v47  ;;  %v5147_v47 = vadd.s32 8, %v5143_v34 }
 0x9e6   : > { %v1242_v6 = vpop.permute.xlu1 %1241 }
 0x9e7   : > { %v1244_v63 = vmax.f32 %v5072_v1, %v1242_v6  ;;  %3410 = vset.pattern.permute.xlu2 %v5147_v47 }
 0x9e9   : > { %1249 = vrot.lane.b32.xlu0 %v1244_v63, %s3500_s5  ;;  %v1245_v29 = vsub.f32 %v5072_v1, %v1244_v63 }
 0x9eb   : > { %v1246_v31 = vmul.f32 1.442695, %v1245_v29 }
 0xa5b   : > { %v1250_v0 = vpop.permute.xlu0 %1249 }
 0xa5c   : > { %v1252_v9 = vsub.f32 %v5072_v1, %v1250_v0 }
 0xa5e   : > { %v1253_v42 = vmul.f32 1.442695, %v1252_v9 }
 0xa60   : > { %3453 = vpow2.f32 %v1253_v42 }
 0xa61   : > { %3455 = vpow2.f32 %v1246_v31 }
 0xa62   : > { %v2589_v46 = vpop.f32.mrf.mxu0 }
 0xa63   : > { %v2599_v60 = vsel %vm1331_vm6, %v2589_v46, -inf }
 0xa64   : > { %v2600_v40 = vrot.slane %v2599_v60, 4 }
 0xa66   : > { %v5138_v30 = vpop.eup %3453  ;;  %v2601_v19 = vmax.f32 %v2599_v60, %v2600_v40 }
 0xa67   : > { %1256 = vrot.lane.b32.xlu2 %v5138_v30, %s3499_s4  ;;  %v3456_v41 = vpop.eup %3455  ;;  %s5657_s4 = sld [smem:[#allocation24_spill]] }
 0xa68   : > { %v2569_v32 = vpop.f32.mrf.mxu3  ;;  %v2602_v37 = vrot.slane %v2601_v19, 2 }
 0xa69   : > { %v2592_v53 = vsel %vm1331_vm6, %v2569_v32, -inf }
 0xa6a   : > { %v2593_v43 = vrot.slane %v2592_v53, 4  ;;  %v2603_v18 = vmax.f32 %v2601_v19, %v2602_v37 }
 0xa6c   : > { %v2594_v12 = vmax.f32 %v2592_v53, %v2593_v43  ;;  %v2604_v36 = vrot.slane %v2603_v18, 1 }
 0xa6d   : > { %s5465_s8 = scalar_lea.vmem %s5657_s4, %s3632_s25 }
 0xa6e   : > { %v2595_v52 = vrot.slane %v2594_v12, 2  ;;  %v2605_v62 = vmax.f32 %v2603_v18, %v2604_v36 }
 0xa70   : > { %v2596_v2 = vmax.f32 %v2594_v12, %v2595_v52  ;;  %v2607_v23 = vsub.f32 %v2589_v46, %v2605_v62 }
 0xa72   : > { %v2597_v16 = vrot.slane %v2596_v2, 1  ;;  %v2610_v24 = vmul.f32 1.442695, %v2607_v23 }
 0xa74   : > { %v2598_v8 = vmax.f32 %v2596_v2, %v2597_v16 }
 0xa76   : > { %v2606_v35 = vsub.f32 %v2569_v32, %v2598_v8 }
 0xa78   : > { %v2608_v13 = vmul.f32 1.442695, %v2606_v35 }
 0xac1   : > { %v1257_v28 = vpop.permute.xlu2 %1256 }
 0xac2   : > { %v1259_v58 = vadd.f32 %v3456_v41, %v1257_v28 }
 0xac4   : > { %3457 = vrcp.f32 %v1259_v58  ;;  %1276 = vrot.lane.b32.xlu1 %v1259_v58, %s3500_s5  ;;  %v1271_v1 = vand.u32 2147483648, %v1259_v58  ;;  %v1269_v27 = vand.u32 2147483647, %v1259_v58  ;;  %vm1265_vm0 = vweird.f32 %v1259_v58 }
 0xac5   : > { %3459 = vpow2.f32 %v2608_v13 }
 0xac6   : > { %v1272_v61 = vor.u32 1.1754944e-38, %v1271_v1  ;;  %vm1270_vm2 = vcmp.eq.f32.partialorder %v1269_v27, 8.507059e+37  ;;  %3461 = vpow2.f32 %v2610_v24  ;;  %v5186_v24 = vadd.s32 16, %v5143_v34 }
 0xaca   : > { %v3458_v49 = vpop.eup %3457 }
 0xacb   : > { %v1261_v7 = vmul.f32 %v3458_v49, %v1259_v58  ;;  %vm1266_vm15 = vweird.f32 %v3458_v49  ;;  %v3460_v57 = vpop.eup %3459 }
 0xacc   : > { %vm1267_vm1 = vmor %vm1265_vm0, %vm1266_vm15  ;;  %v2612_v59 = vsel %vm1331_vm6, %v3460_v57, 0.0  ;;  %v3462_v14 = vpop.eup %3461  ;;  %vm1298_vm15 = vcmask 516096   ;;  %vm5628_vm0 = vcmask 261120  }
 0xacd   : > { %v1262_v51 = vsub.f32 1.0, %v1261_v7  ;;  %v2613_v39 = vrot.slane %v2612_v59, 4  ;;  %v2619_v54 = vsel %vm1331_vm6, %v3462_v14, 0.0 }
 0xace   : > { %v2620_v48 = vrot.slane %v2619_v54, 4 }
 0xacf   : > { %v1263_v5 = vmul.f32 %v3458_v49, %v1262_v51  ;;  %v2614_v22 = vadd.f32 %v2613_v39, %v2612_v59 }
 0xad0   : > { %v2621_v15 = vadd.f32 %v2620_v48, %v2619_v54 }
 0xad1   : > { %v1264_v38 = vadd.f32 %v3458_v49, %v1263_v5  ;;  %v2615_v56 = vrot.slane %v2614_v22, 2 }
 0xad2   : > { %v2622_v6 = vrot.slane %v2621_v15, 2 }
 0xad3   : > { %v1268_v25 = vsel %vm1267_vm1, %v3458_v49, %v1264_v38  ;;  %v2616_v20 = vadd.f32 %v2615_v56, %v2614_v22  ;;  %vm5637_vm1 = vcmask 130112  }
 0xad4   : > { %v1273_v10 = vsel %vm1270_vm2, %v1272_v61, %v1268_v25  ;;  %v2623_v0 = vadd.f32 %v2622_v6, %v2621_v15  ;;  %v2789_v61 = vadd.s32 32, %v5143_v34  ;;  %v2795_v25 = vadd.s32 40, %v5143_v34  ;;  %v2676_v6 = vld [vmem:[%s3638_s2 + $0x40] sm:$0xff]  ;;  %vm5638_vm2 = vmmov %vm5637_vm1 }
 0xad5   : > { %v5153_v45 = vmul.f32 %v3456_v41, %v1273_v10  ;;  %v2617_v17 = vrot.slane %v2616_v20, 1 }
 0xad6   : > { %v2624_v42 = vrot.slane %v2623_v0, 1 }
 0xad7   : > { %v5156_v44 = vperm.slane %v5153_v45, 1  ;;  %v5159_v55 = vperm.slane %v5153_v45, 0  ;;  %v2618_v3 = vadd.f32 %v2617_v17, %v2616_v20  ;;  %v2801_v17 = vadd.s32 48, %v5143_v34 }
 0xad8   : > { %v2625_v11 = vadd.f32 %v2624_v42, %v2623_v0  ;;  %v2778_v42 = vld [vmem:[%s3644_s28 + $0x40] sm:$0xff] }
 0xad9   : > { %2714 = vperm.xlu1 %3411, %v5156_v44   ;;  %2695 = vperm.xlu2 %3410, %v5159_v55   ;;  %3463 = vrcp.f32 %v2618_v3  ;;  %vm2631_vm3 = vweird.f32 %v2618_v3  ;;  %v2635_v58 = vand.u32 2147483647, %v2618_v3  ;;  %v2637_v53 = vand.u32 2147483648, %v2618_v3 }
 0xada   : > { %2689 = vperm.xlu0 %3409, %v5159_v55   ;;  %3465 = vrcp.f32 %v2625_v11  ;;  %v2652_v43 = vand.u32 2147483648, %v2625_v11  ;;  %vm2646_vm7 = vweird.f32 %v2625_v11  ;;  %v2650_v52 = vand.u32 2147483647, %v2625_v11 }
 0xadb   : > { %v2638_v49 = vor.u32 1.1754944e-38, %v2637_v53  ;;  %vm2636_vm5 = vcmp.eq.f32.partialorder %v2635_v58, 8.507059e+37 }
 0xadc   : > { %v2653_v7 = vor.u32 1.1754944e-38, %v2652_v43  ;;  %vm2651_vm13 = vcmp.eq.f32.partialorder %v2650_v52, 8.507059e+37 }
 0xadf   : > { %v3464_v63 = vpop.eup %3463 }
 0xae0   : > { %v2627_v9 = vmul.f32 %v3464_v63, %v2618_v3  ;;  %v3466_v41 = vpop.eup %3465  ;;  %vm2632_vm4 = vweird.f32 %v3464_v63 }
 0xae1   : > { %2720 = vperm.xlu2 %3410, %v5156_v44   ;;  %v2642_v28 = vmul.f32 %v3466_v41, %v2625_v11  ;;  %vm2647_vm9 = vweird.f32 %v3466_v41  ;;  %vm2633_vm11 = vmor %vm2631_vm3, %vm2632_vm4  ;;  %3412 = vset.pattern.permute.xlu1 %v2789_v61  ;;  %v2779_v11 = vld [vmem:[%s3644_s28 + $0x48] sm:$0xff]  ;;  %vm5639_vm3 = vcmask 392512   ;;  %vm5640_vm4 = vcmask 195712  }
 0xae2   : > { %v2628_v29 = vsub.f32 1.0, %v2627_v9  ;;  %vm2648_vm12 = vmor %vm2646_vm7, %vm2647_vm9  ;;  %3413 = vset.pattern.permute.xlu0 %v2795_v25  ;;  %v2677_v9 = vld [vmem:[%s3638_s2 + $0x48] sm:$0xff]  ;;  %vm5642_vm9 = vcmask 458112  }
 0xae3   : > { %v2643_v12 = vsub.f32 1.0, %v2642_v28  ;;  %vm5641_vm7 = vmmov %vm5640_vm4 }
 0xae4   : > { %v2629_v31 = vmul.f32 %v3464_v63, %v2628_v29 }
 0xae5   : > { %v2644_v2 = vmul.f32 %v3466_v41, %v2643_v12 }
 0xae6   : > { %v2630_v32 = vadd.f32 %v3464_v63, %v2629_v31 }
 0xae7   : > { %v2645_v51 = vadd.f32 %v3466_v41, %v2644_v2 }
 0xae8   : > { %v2634_v16 = vsel %vm2633_vm11, %v3464_v63, %v2630_v32  ;;  %vm5643_vm11 = vmmov %vm5639_vm3 }
 0xae9   : > { %v2649_v8 = vsel %vm2648_vm12, %v3466_v41, %v2645_v51  ;;  %v2639_v1 = vsel %vm2636_vm5, %v2638_v49, %v2634_v16  ;;  %3414 = vset.pattern.permute.xlu2 %v2789_v61  ;;  %v5254_v61 = vperm.slane %v4885_v50, 1  ;;  %vm5644_vm12 = vcmask 261312   ;;  %vm5646_vm5 = vmmov %vm5642_vm9 }
 0xaea   : > { %v2654_v5 = vsel %vm2651_vm13, %v2653_v7, %v2649_v8  ;;  %v5170_v35 = vmul.f32 %v3460_v57, %v2639_v1  ;;  %v5241_v8 = vperm.slane %v4883_v33, 0  ;;  %v5244_v1 = vperm.slane %v4885_v50, 0  ;;  %vm5647_vm13 = vmmov %vm5644_vm12 }
 0xaeb   : > { %v5168_v27 = vmul.f32 %v3462_v14, %v2654_v5  ;;  %v2670_v5 = vld [vmem:[%s3638_s2 + $0x10] sm:$0xff] }
 0xaec   : > { %v5216_v15 = vperm.slane %v5170_v35, 1 }
 0xaed   : > { %v2661_v38 = vrot.slane %v5168_v27, 6  ;;  %v5207_v48 = vperm.slane %v5168_v27, 0 }
 0xaef   : > { %v2663_v13 = vsel %vm1331_vm6, %v5170_v35, %v2661_v38 }
 0xaf0   : > { %2667 = vst [vmem:[%s4890_s27 + $0x4] sm:$0xf] %v2663_v13  ;;  %s5228_s27 = scalar_lea.vmem %s5629_s21, %s3632_s25  ;;  %v5251_v13 = vperm.slane %v4883_v33, 1  ;;  %v2772_v33 = vld [vmem:[%s3644_s28 + $0x10] sm:$0xff]  ;;  %s5631_s21 = sld [smem:[#allocation22_spill]] }
 0xaf1   : > { %v2896_v43 = vld [vmem:[%s5228_s27 + $0x40] sm:$0xff]  ;;  %v2897_v12 = vld [vmem:[%s5228_s27 + $0x48] sm:$0xff] }
 0xb33   : > { %v2696_v3 = vpop.permute.xlu2 %2695 }
 0xb36   : > { %v1277_v10 = vpop.permute.xlu1 %1276 }
 0xb37   : > { %3467 = vrcp.f32 %v1277_v10  ;;  %v1290_v59 = vand.u32 2147483648, %v1277_v10  ;;  %v1288_v39 = vand.u32 2147483647, %v1277_v10  ;;  %vm1284_vm6 = vweird.f32 %v1277_v10 }
 0xb39   : > { %v1291_v22 = vor.u32 1.1754944e-38, %v1290_v59  ;;  %vm1289_vm14 = vcmp.eq.f32.partialorder %v1288_v39, 8.507059e+37 }
 0xb3b   : > { %v5204_v14 = vpop.permute.xlu2 %2720 }
 0xb3d   : > { %v3468_v46 = vpop.eup %3467 }
 0xb3e   : > { %v1280_v60 = vmul.f32 %v3468_v46, %v1277_v10  ;;  %vm1285_vm10 = vweird.f32 %v3468_v46  ;;  %v2741_v10 = vadd.f32 %v5241_v8, %v2696_v3 }
 0xb3f   : > { %vm1286_vm8 = vmor %vm1284_vm6, %vm1285_vm10  ;;  %vm5648_vm10 = vcmask 523712  }
 0xb40   : > { %v1281_v57 = vsub.f32 1.0, %v1280_v60  ;;  %v2770_v60 = vld [vmem:[%s3644_s28] sm:$0xff]  ;;  %vm5649_vm6 = vmmov %vm5648_vm10 }
 0xb42   : > { %v1282_v40 = vmul.f32 %v3468_v46, %v1281_v57  ;;  %v2771_v57 = vld [vmem:[%s3644_s28 + $0x8] sm:$0xff] }
 0xb44   : > { %v1283_v19 = vadd.f32 %v3468_v46, %v1282_v40  ;;  %v2671_v40 = vld [vmem:[%s3638_s2 + $0x18] sm:$0xff] }
 0xb46   : > { %v1287_v37 = vsel %vm1286_vm8, %v3468_v46, %v1283_v19  ;;  %v2669_v46 = vld [vmem:[%s3638_s2 + $0x8] sm:$0xff]  ;;  %vm5650_vm8 = vcmask 1041409  }
 0xb47   : > { %v1292_v18 = vsel %vm1289_vm14, %v1291_v22, %v1287_v37  ;;  %v2773_v22 = vld [vmem:[%s3644_s28 + $0x18] sm:$0xff]  ;;  %vm5651_vm14 = vmmov %vm5650_vm8 }
 0xb48   : > { %v1293_v56 = vmul.f32 %v5138_v30, %v1292_v18  ;;  %v2807_v30 = vadd.s32 56, %v5143_v34 }
 0xb4a   : > { %v2786_v36 = vperm.slane %v1293_v56, 0  ;;  %v1294_v62 = vsel %vm5628_vm0, %v5153_v45, %v1293_v56  ;;  %v2811_v20 = vperm.slane %v1293_v56, 1  ;;  %v5195_v45 = vadd.s32 24, %v5143_v34 }
 0xb4b   : > { %v1296_v23 = vrot.slane %v1294_v62, 1  ;;  %1299 = vst.msk [vmem:[%s787_s10] sm:$0x1] %vm1298_vm15, %v1294_v62  ;;  %v2715_v54 = vpop.permute.xlu1 %2714 }
 0xb4c   : > { %2791 = vperm.xlu1 %3412, %v2786_v36   ;;  %2816 = vperm.xlu2 %3414, %v2811_v20   ;;  %v2747_v0 = vadd.f32 %v5207_v48, %v2715_v54  ;;  %v2690_v51 = vpop.permute.xlu0 %2689 }
 0xb4d   : > { %1300 = vst.msk [vmem:[%s787_s10 + $0x1] sm:$0x1] %vm1298_vm15, %v1296_v23  ;;  %2797 = vperm.xlu0 %3413, %v2786_v36   ;;  %v2739_v38 = vadd.f32 %v5241_v8, %v2690_v51  ;;  %vm5652_vm15 = vmmov %vm5628_vm0  ;;  %vm5653_vm0 = vcmask 523264  }
 0xb4e   : > { %v2763_v32 = vmul.f32 %v2747_v0, %v2677_v9  ;;  %v2890_v9 = vld [vmem:[%s5228_s27 + $0x10] sm:$0xff] }
 0xb54   : > { %3415 = vset.pattern.permute.xlu1 %v2795_v25  ;;  %3416 = vset.pattern.permute.xlu2 %v5186_v24  ;;  %v2740_v25 = vadd.f32 %v5244_v1, %v2696_v3  ;;  %v2889_v3 = vld [vmem:[%s5228_s27 + $0x8] sm:$0xff] }
 0xb55   : > { %3418 = vset.pattern.permute.xlu0 %v2801_v17 }
 0xb56   : > { %v2756_v23 = vmul.f32 %v2740_v25, %v2670_v5 }
 0xb5c   : > { %2822 = vperm.xlu1 %3415, %v2811_v20   ;;  %2701 = vperm.xlu2 %3416, %v5159_v55  }
 0xb5d   : > { %2803 = vperm.xlu0 %3418, %v2786_v36  }
 0xb64   : > { %3417 = vset.pattern.permute.xlu1 %v5186_v24  ;;  %3419 = vset.pattern.permute.xlu2 %v2801_v17  ;;  %v2757_v17 = vmul.f32 %v2741_v10, %v2671_v40  ;;  %v2673_v10 = vld [vmem:[%s3638_s2 + $0x28] sm:$0xff] }
 0xb65   : > { %3423 = vset.pattern.permute.xlu0 %v2807_v30 }
 0xb6c   : > { %2726 = vperm.xlu1 %3417, %v5156_v44   ;;  %2828 = vperm.xlu2 %3419, %v2811_v20  }
 0xb6d   : > { %2834 = vperm.xlu0 %3423, %v2811_v20  }
 0xb74   : > { %3420 = vset.pattern.permute.xlu1 %v5195_v45  ;;  %3421 = vset.pattern.permute.xlu2 %v5195_v45 }
 0xb75   : > { %3424 = vset.pattern.permute.xlu0 %v5143_v34 }
 0xb7c   : > { %2707 = vperm.xlu1 %3420, %v5159_v55   ;;  %2732 = vperm.xlu2 %3421, %v5156_v44   ;;  %v5210_v55 = vperm.slane %v5170_v35, 0  ;;  %v5213_v44 = vperm.slane %v5168_v27, 1  ;;  %v2668_v27 = vld [vmem:[%s3638_s2] sm:$0xff]  ;;  %v2738_v35 = vadd.f32 %v5244_v1, %v2690_v51 }
 0xb7d   : > { %v2672_v51 = vld [vmem:[%s3638_s2 + $0x20] sm:$0xff] }
 0xb7e   : > { %v2746_v63 = vadd.f32 %v5210_v55, %v2715_v54  ;;  %v2754_v56 = vmul.f32 %v2738_v35, %v2668_v27  ;;  %v2780_v35 = vld [vmem:[%s3644_s28 + $0x50] sm:$0xff] }
 0xb80   : > { %v2762_v28 = vmul.f32 %v2746_v63, %v2676_v6 }
 0xb84   : > { %3422 = vset.pattern.permute.xlu1 %v2807_v30  ;;  %3425 = vset.pattern.permute.xlu2 %v5147_v47  ;;  %v2888_v30 = vld [vmem:[%s5228_s27] sm:$0xff] }
 0xb8c   : > { %2809 = vperm.xlu1 %3422, %v2786_v36   ;;  %v2755_v36 = vmul.f32 %v2739_v38, %v2669_v46  ;;  %v2781_v38 = vld [vmem:[%s3644_s28 + $0x58] sm:$0xff] }
 0xb94   : > { %3426 = vset.pattern.permute.xlu1 %v5186_v24 }
 0xba6   : > { %v2817_v29 = vpop.permute.xlu2 %2816 }
 0xba7   : > { %v2848_v31 = vadd.f32 %v5216_v15, %v2817_v29  ;;  %v2849_v41 = vadd.f32 %v5213_v44, %v2817_v29 }
 0xba9   : > { %v2864_v58 = vmul.f32 %v2848_v31, %v2778_v42  ;;  %v2865_v53 = vmul.f32 %v2849_v41, %v2779_v11  ;;  %v2891_v42 = vld [vmem:[%s5228_s27 + $0x18] sm:$0xff] }
 0xbab   : > { %v2880_v52 = vadd.f32 %v2864_v58, %v2762_v28  ;;  %v2881_v2 = vadd.f32 %v2865_v53, %v2763_v32 }
 0xbad   : > { %v5234_v49 = vadd.f32 %v2896_v43, %v2880_v52  ;;  %v5236_v7 = vadd.f32 %v2897_v12, %v2881_v2  ;;  %v2678_v12 = vld [vmem:[%s3638_s2 + $0x50] sm:$0xff]  ;;  %v2679_v52 = vld [vmem:[%s3638_s2 + $0x58] sm:$0xff]  ;;  %v2748_v2 = vadd.f32 %v5210_v55, %v5204_v14 }
 0xbaf   : > { %v2932_v16 = vadd.f32 %v5236_v7, %v5234_v49 }
 0xbb1   : > { %2933 = vadd.xlane.f32.xlu0 %v2932_v16  ;;  %v2749_v16 = vadd.f32 %v5207_v48, %v5204_v14 }
 0xbb6   : > { %v2702_v43 = vpop.permute.xlu2 %2701 }
 0xbb7   : > { %v2742_v5 = vadd.f32 %v5244_v1, %v2702_v43  ;;  %v2743_v27 = vadd.f32 %v5241_v8, %v2702_v43 }
 0xbbe   : > { %v2792_v59 = vpop.permute.xlu1 %2791 }
 0xbbf   : > { %v2840_v39 = vadd.f32 %v5254_v61, %v2792_v59  ;;  %v2841_v19 = vadd.f32 %v5251_v13, %v2792_v59  ;;  %v2798_v50 = vpop.permute.xlu0 %2797  ;;  %v2775_v59 = vld [vmem:[%s3644_s28 + $0x28] sm:$0xff] }
 0xbc0   : > { %v2842_v37 = vadd.f32 %v5254_v61, %v2798_v50  ;;  %v2843_v18 = vadd.f32 %v5251_v13, %v2798_v50 }
 0xbc1   : > { %v2856_v62 = vmul.f32 %v2840_v39, %v2770_v60  ;;  %v2857_v20 = vmul.f32 %v2841_v19, %v2771_v57  ;;  %v2774_v57 = vld [vmem:[%s3644_s28 + $0x20] sm:$0xff] }
 0xbc2   : > { %v2858_v54 = vmul.f32 %v2842_v37, %v2772_v33  ;;  %v2859_v6 = vmul.f32 %v2843_v18, %v2773_v22  ;;  %v2764_v33 = vmul.f32 %v2748_v2, %v2678_v12  ;;  %v2765_v22 = vmul.f32 %v2749_v16, %v2679_v52  ;;  %v2782_v12 = vld [vmem:[%s3644_s28 + $0x60] sm:$0xff]  ;;  %v2783_v52 = vld [vmem:[%s3644_s28 + $0x68] sm:$0xff] }
 0xbc3   : > { %v2872_v63 = vadd.f32 %v2856_v62, %v2754_v56  ;;  %v2873_v0 = vadd.f32 %v2857_v20, %v2755_v36  ;;  %v2758_v18 = vmul.f32 %v2742_v5, %v2672_v51  ;;  %v2759_v56 = vmul.f32 %v2743_v27, %v2673_v10  ;;  %v2898_v36 = vld [vmem:[%s5228_s27 + $0x50] sm:$0xff]  ;;  %v2899_v62 = vld [vmem:[%s5228_s27 + $0x58] sm:$0xff] }
 0xbc4   : > { %v2874_v11 = vadd.f32 %v2858_v54, %v2756_v23  ;;  %v2875_v29 = vadd.f32 %v2859_v6, %v2757_v17  ;;  %v2892_v54 = vld [vmem:[%s5228_s27 + $0x20] sm:$0xff]  ;;  %v2893_v6 = vld [vmem:[%s5228_s27 + $0x28] sm:$0xff]  ;;  %v2682_v51 = vld [vmem:[%s3638_s2 + $0x70] sm:$0xff] }
 0xbc5   : > { %v5272_v31 = vadd.f32 %v2888_v30, %v2872_v63  ;;  %v5274_v41 = vadd.f32 %v2889_v3, %v2873_v0  ;;  %v2683_v10 = vld [vmem:[%s3638_s2 + $0x78] sm:$0xff] }
 0xbc6   : > { %v5276_v28 = vadd.f32 %v2890_v9, %v2874_v11  ;;  %v5278_v32 = vadd.f32 %v2891_v42, %v2875_v29  ;;  %v2829_v17 = vpop.permute.xlu2 %2828 }
 0xbc7   : > { %v2920_v58 = vadd.f32 %v5274_v41, %v5272_v31  ;;  %v2952_v14 = vmax.f32 %v5272_v31, %v5274_v41  ;;  %v2852_v2 = vadd.f32 %v5216_v15, %v2829_v17  ;;  %v2853_v16 = vadd.f32 %v5213_v44, %v2829_v17  ;;  %v2903_v17 = vld [vmem:[%s5228_s27 + $0x78] sm:$0xff] }
 0xbc8   : > { %v2923_v53 = vadd.f32 %v5278_v32, %v5276_v28 }
 0xbc9   : > { %2921 = vadd.xlane.f32.xlu2 %v2920_v58 }
 0xbca   : > { %2924 = vadd.xlane.f32.xlu1 %v2923_v53 }
 0xbce   : > { %v2823_v25 = vpop.permute.xlu1 %2822 }
 0xbcf   : > { %v2850_v46 = vadd.f32 %v5216_v15, %v2823_v25  ;;  %v2851_v60 = vadd.f32 %v5213_v44, %v2823_v25  ;;  %v2804_v40 = vpop.permute.xlu0 %2803 }
 0xbd0   : > { %v2844_v39 = vadd.f32 %v5254_v61, %v2804_v40  ;;  %v2845_v19 = vadd.f32 %v5251_v13, %v2804_v40 }
 0xbd1   : > { %v2866_v50 = vmul.f32 %v2850_v46, %v2780_v35  ;;  %v2867_v37 = vmul.f32 %v2851_v60, %v2781_v38  ;;  %2953 = vmax.xlane.f32.xlu2 %v2952_v14  ;;  %v2680_v35 = vld [vmem:[%s3638_s2 + $0x60] sm:$0xff]  ;;  %v2681_v38 = vld [vmem:[%s3638_s2 + $0x68] sm:$0xff] }
 0xbd2   : > { %v2860_v20 = vmul.f32 %v2844_v39, %v2774_v57  ;;  %v2861_v23 = vmul.f32 %v2845_v19, %v2775_v59  ;;  %v2784_v57 = vld [vmem:[%s3644_s28 + $0x70] sm:$0xff]  ;;  %v2785_v59 = vld [vmem:[%s3644_s28 + $0x78] sm:$0xff]  ;;  %v2868_v19 = vmul.f32 %v2852_v2, %v2782_v12 }
 0xbd3   : > { %v2882_v30 = vadd.f32 %v2866_v50, %v2764_v33  ;;  %v2883_v3 = vadd.f32 %v2867_v37, %v2765_v22  ;;  %v2869_v33 = vmul.f32 %v2853_v16, %v2783_v52  ;;  %v2674_v52 = vld [vmem:[%s3638_s2 + $0x30] sm:$0xff] }
 0xbd4   : > { %v2876_v63 = vadd.f32 %v2860_v20, %v2758_v18  ;;  %v2877_v0 = vadd.f32 %v2861_v23, %v2759_v56  ;;  %v2900_v56 = vld [vmem:[%s5228_s27 + $0x60] sm:$0xff]  ;;  %v2902_v23 = vld [vmem:[%s5228_s27 + $0x70] sm:$0xff] }
 0xbd5   : > { %v5308_v9 = vadd.f32 %v2898_v36, %v2882_v30  ;;  %v5310_v42 = vadd.f32 %v2899_v62, %v2883_v3  ;;  %v2901_v36 = vld [vmem:[%s5228_s27 + $0x68] sm:$0xff] }
 0xbd6   : > { %v5312_v11 = vadd.f32 %v2892_v54, %v2876_v63  ;;  %v5314_v29 = vadd.f32 %v2893_v6, %v2877_v0  ;;  %v2733_v43 = vpop.permute.xlu2 %2732 }
 0xbd7   : > { %v2935_v58 = vadd.f32 %v5310_v42, %v5308_v9  ;;  %v2752_v5 = vadd.f32 %v5210_v55, %v2733_v43  ;;  %v2753_v27 = vadd.f32 %v5207_v48, %v2733_v43 }
 0xbd8   : > { %v2926_v53 = vadd.f32 %v5314_v29, %v5312_v11 }
 0xbd9   : > { %2936 = vadd.xlane.f32.xlu2 %v2935_v58  ;;  %v2768_v37 = vmul.f32 %v2752_v5, %v2682_v51  ;;  %v2769_v18 = vmul.f32 %v2753_v27, %v2683_v10  ;;  %v2967_v58 = vmax.f32 %v5308_v9, %v5310_v42  ;;  %v2675_v51 = vld [vmem:[%s3638_s2 + $0x38] sm:$0xff]  ;;  %v2776_v5 = vld [vmem:[%s3644_s28 + $0x30] sm:$0xff] }
 0xbda   : > { %2927 = vadd.xlane.f32.xlu1 %v2926_v53  ;;  %v2964_v53 = vmax.f32 %v5234_v49, %v5236_v7  ;;  %v2777_v27 = vld [vmem:[%s3644_s28 + $0x38] sm:$0xff]  ;;  %s5654_s28 = sld [smem:[#allocation21_spill]] }
 0xbde   : > { %v2727_v25 = vpop.permute.xlu1 %2726 }
 0xbdf   : > { %v2750_v46 = vadd.f32 %v5210_v55, %v2727_v25  ;;  %v2751_v60 = vadd.f32 %v5207_v48, %v2727_v25  ;;  %v2835_v40 = vpop.permute.xlu0 %2834 }
 0xbe0   : > { %v2854_v14 = vadd.f32 %v5216_v15, %v2835_v40  ;;  %v2855_v39 = vadd.f32 %v5213_v44, %v2835_v40  ;;  %v2895_v40 = vld [vmem:[%s5228_s27 + $0x38] sm:$0xff] }
 0xbe1   : > { %v2766_v22 = vmul.f32 %v2750_v46, %v2680_v35  ;;  %v2767_v50 = vmul.f32 %v2751_v60, %v2681_v38 }
 0xbe2   : > { %v2870_v55 = vmul.f32 %v2854_v14, %v2784_v57  ;;  %v2871_v62 = vmul.f32 %v2855_v39, %v2785_v59  ;;  %v2894_v59 = vld [vmem:[%s5228_s27 + $0x30] sm:$0xff] }
 0xbe3   : > { %v2884_v48 = vadd.f32 %v2868_v19, %v2766_v22  ;;  %v2885_v20 = vadd.f32 %v2869_v33, %v2767_v50  ;;  %v2958_v33 = vmax.f32 %v5312_v11, %v5314_v29 }
 0xbe4   : > { %v2886_v30 = vadd.f32 %v2870_v55, %v2768_v37  ;;  %v2887_v3 = vadd.f32 %v2871_v62, %v2769_v18  ;;  %v3032_v37 = vld [vmem:[%s5630_s3 + $0x38] sm:$0xff]  ;;  %v3030_v55 = vld [vmem:[%s5630_s3 + $0x28] sm:$0xff]  ;;  %v3029_v62 = vld [vmem:[%s5630_s3 + $0x20] sm:$0xff] }
 0xbe5   : > { %v5340_v15 = vadd.f32 %v2900_v56, %v2884_v48  ;;  %v5342_v44 = vadd.f32 %v2901_v36, %v2885_v20  ;;  %3048 = vmatpush.msra.mxu1 %v3032_v37  ;;  %v3031_v56 = vld [vmem:[%s5630_s3 + $0x30] sm:$0xff]  ;;  %v3028_v48 = vld [vmem:[%s5630_s3 + $0x18] sm:$0xff] }
 0xbe6   : > { %v5344_v54 = vadd.f32 %v2902_v23, %v2886_v30  ;;  %v5346_v6 = vadd.f32 %v2903_v17, %v2887_v3  ;;  %v3027_v17 = vld [vmem:[%s5630_s3 + $0x10] sm:$0xff]  ;;  %v3026_v30 = vld [vmem:[%s5630_s3 + $0x8] sm:$0xff] }
 0xbe7   : > { %v2938_v63 = vadd.f32 %v5342_v44, %v5340_v15  ;;  %v2970_v12 = vmax.f32 %v5340_v15, %v5342_v44  ;;  %3049 = vmatpush.msra.mxu1 %v3031_v56  ;;  %v5635_v37 = vld [vmem:[#allocation5_spill] sm:$0xff] }
 0xbe8   : > { %v2941_v0 = vadd.f32 %v5346_v6, %v5344_v54  ;;  %v2973_v22 = vmax.f32 %v5344_v54, %v5346_v6 }
 0xbe9   : > { %2939 = vadd.xlane.f32.xlu2 %v2938_v63  ;;  %3050 = vmatpush.msra.mxu1 %v3030_v55  ;;  %v3025_v63 = vld [vmem:[%s5630_s3] sm:$0xff] }
 0xbea   : > { %2942 = vadd.xlane.f32.xlu0 %v2941_v0  ;;  %v3061_v0 = vld [vmem:[%s5631_s21] sm:$0xff] }
 0xbeb   : > { %3051 = vmatpush.msra.mxu1 %v3029_v62  ;;  %3084 = vmatpush.msra.mxu2 %v3061_v0 }
 0xbed   : > { %3052 = vmatpush.msra.mxu1 %v3028_v48 }
 0xbee   : > { %v2708_v43 = vpop.permute.xlu1 %2707 }
 0xbef   : > { %v2744_v2 = vadd.f32 %v5244_v1, %v2708_v43  ;;  %v2745_v16 = vadd.f32 %v5241_v8, %v2708_v43  ;;  %3053 = vmatpush.msra.mxu1 %v3027_v17 }
 0xbf1   : > { %2968 = vmax.xlane.f32.xlu2 %v2967_v58  ;;  %v2760_v10 = vmul.f32 %v2744_v2, %v2674_v52  ;;  %v2761_v46 = vmul.f32 %v2745_v16, %v2675_v51  ;;  %3054 = vmatpush.msra.mxu1 %v3026_v30 }
 0xbf2   : > { %2965 = vmax.xlane.f32.xlu0 %v2964_v53 }
 0xbf3   : > { %3055 = vmatpush.msra.mxu1 %v3025_v63 }
 0xbfa   : > { %2971 = vmax.xlane.f32.xlu0 %v2970_v12 }
 0xbfe   : > { %v2810_v35 = vpop.permute.xlu1 %2809 }
 0xbff   : > { %v2846_v38 = vadd.f32 %v5254_v61, %v2810_v35  ;;  %v2847_v25 = vadd.f32 %v5251_v13, %v2810_v35  ;;  %v2955_v13 = vmax.f32 %v5276_v28, %v5278_v32 }
 0xc01   : > { %v2862_v60 = vmul.f32 %v2846_v38, %v2776_v5  ;;  %v2863_v57 = vmul.f32 %v2847_v25, %v2777_v27 }
 0xc03   : > { %v2878_v14 = vadd.f32 %v2862_v60, %v2760_v10  ;;  %v2879_v39 = vadd.f32 %v2863_v57, %v2761_v46 }
 0xc05   : > { %v5368_v19 = vadd.f32 %v2894_v59, %v2878_v14  ;;  %v5370_v1 = vadd.f32 %v2895_v40, %v2879_v39  ;;  %v5632_v14 = vld [vmem:[#allocation6_spill] sm:$0xff] }
 0xc07   : > { %v2929_v8 = vadd.f32 %v5370_v1, %v5368_v19  ;;  %v2961_v61 = vmax.f32 %v5368_v19, %v5370_v1 }
 0xc09   : > { %2930 = vadd.xlane.f32.xlu1 %v2929_v8  ;;  %2962 = vmax.xlane.f32.xlu2 %v2961_v61  ;;  %v5633_v61 = vld [vmem:[#allocation3_spill] sm:$0xff] }
 0xc11   : > { %2956 = vmax.xlane.f32.xlu1 %v2955_v13 }
 0xc19   : > { %2959 = vmax.xlane.f32.xlu1 %v2958_v33 }
 0xc21   : > { %2974 = vmax.xlane.f32.xlu1 %v2973_v22  ;;  %v5634_v22 = vld [vmem:[#allocation7_spill] sm:$0xff] }
 0xc24   : > { %v2934_v20 = vpop.xlane.xlu0 %2933 }
 0xc25   : > { %v2948_v27 = vmul.f32 %v2934_v20, %v3775_v26 }
 0xc27   : > { %v2991_v8 = vperm.slane %v2948_v27, %v3771_v21 }
 0xc3c   : > { %v2922_v50 = vpop.xlane.xlu2 %2921 }
 0xc3d   : > { %v2925_v18 = vpop.xlane.xlu1 %2924  ;;  %v2944_v2 = vmul.f32 %v2922_v50, %v3775_v26 }
 0xc3e   : > { %v2945_v51 = vmul.f32 %v2925_v18, %v3775_v26 }
 0xc3f   : > { %v2984_v46 = vperm.slane %v2944_v2, %v3771_v21 }
 0xc40   : > { %v2985_v60 = vperm.slane %v2945_v51, %v3783_v4 }
 0xc42   : > { %v2986_v20 = vsel %vm5637_vm1, %v2985_v60, %v2984_v46  ;;  %vm5655_vm1 = vcmask 64512   ;;  %v3440_v60 = vld [vmem:[%s5656_s18] ss:$0 sm:$0xff] }
 0xc44   : > { %v2954_v36 = vpop.xlane.xlu2 %2953 }
 0xc45   : > { %v3008_v18 = vperm.slane %v2954_v36, %v5635_v37 }
 0xc4c   : > { %v2937_v3 = vpop.xlane.xlu2 %2936 }
 0xc4d   : > { %v2928_v23 = vpop.xlane.xlu1 %2927  ;;  %v2949_v5 = vmul.f32 %v2937_v3, %v3775_v26 }
 0xc4e   : > { %v2946_v35 = vmul.f32 %v2928_v23, %v3775_v26 }
 0xc4f   : > { %v2992_v57 = vperm.slane %v2949_v5, %v3783_v4  ;;  %v5636_v4 = vld [vmem:[#allocation4_spill] sm:$0xff] }
 0xc50   : > { %v2987_v13 = vperm.slane %v2946_v35, %v5633_v61 }
 0xc51   : > { %v2993_v21 = vsel %vm5638_vm2, %v2992_v57, %v2991_v8 }
 0xc52   : > { %v2988_v30 = vsel %vm5640_vm4, %v2987_v13, %v2986_v20 }
 0xc5c   : > { %v2940_v43 = vpop.xlane.xlu2 %2939 }
 0xc5d   : > { %v2943_v58 = vpop.xlane.xlu0 %2942  ;;  %v2950_v38 = vmul.f32 %v2940_v43, %v3775_v26 }
 0xc5e   : > { %v2951_v59 = vmul.f32 %v2943_v58, %v3775_v26 }
 0xc5f   : > { %v2994_v33 = vperm.slane %v2950_v38, %v5633_v61  ;;  %v3439_v38 = vld [vmem:[%s5654_s28] ss:$0 sm:$0xff] }
 0xc60   : > { %v2996_v23 = vperm.slane %v2951_v59, %v5636_v4 }
 0xc61   : > { %v2995_v36 = vsel %vm5641_vm7, %v2994_v33, %v2993_v21 }
 0xc62   : > { %v2997_v2 = vsel %vm5647_vm13, %v2996_v23, %v2995_v36 }
 0xc64   : > { %v2969_v16 = vpop.xlane.xlu2 %2968 }
 0xc65   : > { %v2966_v52 = vpop.xlane.xlu0 %2965  ;;  %v3016_v55 = vperm.slane %v2969_v16, %v5632_v14 }
 0xc66   : > { %v3015_v56 = vperm.slane %v2966_v52, %v5635_v37 }
 0xc68   : > { %v3017_v0 = vsel %vm5643_vm11, %v3016_v55, %v3015_v56 }
 0xc6d   : > { %v2972_v40 = vpop.xlane.xlu0 %2971 }
 0xc7c   : > { %v2931_v53 = vpop.xlane.xlu1 %2930  ;;  %v2963_v48 = vpop.xlane.xlu2 %2962 }
 0xc7d   : > { %v2947_v10 = vmul.f32 %v2931_v53, %v3775_v26  ;;  %v3018_v26 = vperm.slane %v2972_v40, %v5634_v22  ;;  %v5645_v53 = vld [vmem:[#allocation8_spill] sm:$0xff] }
 0xc7e   : > { %v3013_v43 = vperm.slane %v2963_v48, %v5645_v53 }
 0xc7f   : > { %v2989_v62 = vperm.slane %v2947_v10, %v5636_v4  ;;  %v3019_v52 = vsel %vm5646_vm5, %v3018_v26, %v3017_v0 }
 0xc81   : > { %v2990_v58 = vsel %vm5644_vm12, %v2989_v62, %v2988_v30 }
 0xc82   : > { %v2998_v27 = vsel %vm5651_vm14, %v2997_v2, %v2990_v58 }
 0xc84   : > { %v2957_v12 = vpop.xlane.xlu1 %2956 }
 0xc85   : > { %v3009_v39 = vperm.slane %v2957_v12, %v5632_v14 }
 0xc87   : > { %v3010_v17 = vsel %vm5639_vm3, %v3009_v39, %v3008_v18 }
 0xc8c   : > { %v2960_v25 = vpop.xlane.xlu1 %2959 }
 0xc8d   : > { %v3011_v50 = vperm.slane %v2960_v25, %v5634_v22 }
 0xc8f   : > { %v3012_v3 = vsel %vm5642_vm9, %v3011_v50, %v3010_v17 }
 0xc90   : > { %v3014_v16 = vsel %vm5648_vm10, %v3013_v43, %v3012_v3 }
 0xc94   : > { %v2975_v63 = vpop.xlane.xlu1 %2974 }
 0xc95   : > { %v3020_v12 = vperm.slane %v2975_v63, %v5645_v53 }
 0xc97   : > { %v3021_v51 = vsel %vm5649_vm6, %v3020_v12, %v3019_v52 }
 0xc98   : > { %v3022_v5 = vsel %vm5650_vm8, %v3021_v51, %v3014_v16 }
 0xc99   : > { %v3024_v35 = vsel %vm5652_vm15, %v2998_v27, %v3022_v5 }
 0xc9a   : > { %3376 = vmatmul.msk.f32.vlgmr.msra.gmra.mxu1 %vm5653_vm0, %v3024_v35 }
 0xd17   : > { %v3057_v25 = vpop.f32.mrf.mxu1 }
 0xd18   : > { %v3058_v10 = vadd.f32 %v3439_v38, %v3057_v25 }
 0xd1a   : > { %v3060_v46 = vmax.f32 %v3058_v10, 0.0 }
 0xd1c   : > { %3377 = vmatmul.msk.f32.vlgmr.msra.gmra.mxu2 %vm5655_vm1, %v3060_v46 }
 0xd9f   : > { %v3086_v57 = vpop.f32.mrf.mxu2 }
 0xda0   : > { %v3087_v59 = vadd.f32 %v3440_v60, %v3086_v57 }
 0xda2   : > { %v3089_v40 = vsub.f32 0.0, %v3087_v59 }
 0xda4   : > { %v3090_v14 = vmul.f32 1.442695, %v3089_v40 }
 0xda6   : > { %3469 = vpow2.f32 %v3090_v14 }
 0xdac   : > { %v3470_v39 = vpop.eup %3469 }
 0xdad   : > { %v3092_v8 = vadd.f32 1.0, %v3470_v39 }
 0xdaf   : > { %3471 = vrcp.f32 %v3092_v8 }
 0xdb5   : > { %v3472_v61 = vpop.eup %3471 }
 0xdb6   : > { %v3094_v13 = vperm.slane %v3472_v61, 0  ;;  %v3119_v33 = vperm.slane %v3472_v61, 1 }
 0xdb8   : > { %3111 = vperm.xlu1 %3426, %v3094_v13   ;;  %3105 = vperm.xlu2 %3425, %v3094_v13  }
 0xdb9   : > { %3099 = vperm.xlu0 %3424, %v3094_v13  }
 0xdc0   : > { %3428 = vset.pattern.permute.xlu1 %v5143_v34  ;;  %3427 = vset.pattern.permute.xlu2 %v5195_v45 }
 0xdc1   : > { %3431 = vset.pattern.permute.xlu0 %v5195_v45 }
 0xdc8   : > { %3124 = vperm.xlu1 %3428, %v3119_v33   ;;  %3117 = vperm.xlu2 %3427, %v3094_v13  }
 0xdc9   : > { %3142 = vperm.xlu0 %3431, %v3119_v33  }
 0xdd0   : > { %3430 = vset.pattern.permute.xlu1 %v5186_v24  ;;  %3429 = vset.pattern.permute.xlu2 %v5147_v47 }
 0xdd8   : > { %3136 = vperm.xlu1 %3430, %v3119_v33   ;;  %3130 = vperm.xlu2 %3429, %v3119_v33  }
 0xe12   : > { %v3106_v34 = vpop.permute.xlu2 %3105 }
 0xe13   : > { %v3146_v45 = vmul.f32 %v3106_v34, %v5276_v28  ;;  %v3147_v24 = vmul.f32 %v3106_v34, %v5278_v32 }
 0xe15   : > { %3162 = vst [vmem:[%s5465_s8 + $0x10] sm:$0xff] %v3146_v45 }
 0xe16   : > { %3163 = vst [vmem:[%s5465_s8 + $0x18] sm:$0xff] %v3147_v24 }
 0xe22   : > { %v3118_v47 = vpop.permute.xlu2 %3117 }
 0xe23   : > { %v3150_v22 = vmul.f32 %v3118_v47, %v5368_v19  ;;  %v3151_v50 = vmul.f32 %v3118_v47, %v5370_v1 }
 0xe25   : > { %3166 = vst [vmem:[%s5465_s8 + $0x30] sm:$0xff] %v3150_v22 }
 0xe26   : > { %3167 = vst [vmem:[%s5465_s8 + $0x38] sm:$0xff] %v3151_v50 }
 0xe2a   : > { %v3112_v37 = vpop.permute.xlu1 %3111 }
 0xe2b   : > { %v3148_v18 = vmul.f32 %v3112_v37, %v5312_v11  ;;  %v3149_v28 = vmul.f32 %v3112_v37, %v5314_v29  ;;  %v3100_v56 = vpop.permute.xlu0 %3099 }
 0xe2c   : > { %v3144_v32 = vmul.f32 %v3100_v56, %v5272_v31  ;;  %v3145_v55 = vmul.f32 %v3100_v56, %v5274_v41 }
 0xe2d   : > { %3164 = vst [vmem:[%s5465_s8 + $0x20] sm:$0xff] %v3148_v18 }
 0xe2e   : > { %3165 = vst [vmem:[%s5465_s8 + $0x28] sm:$0xff] %v3149_v28 }
 0xe2f   : > { %3160 = vst [vmem:[%s5465_s8] sm:$0xff] %v3144_v32 }
 0xe30   : > { %3161 = vst [vmem:[%s5465_s8 + $0x8] sm:$0xff] %v3145_v55 }
 0xe32   : > { %v3131_v19 = vpop.permute.xlu2 %3130 }
 0xe33   : > { %v3154_v1 = vmul.f32 %v3131_v19, %v5308_v9  ;;  %v3155_v11 = vmul.f32 %v3131_v19, %v5310_v42 }
 0xe35   : > { %3170 = vst [vmem:[%s5465_s8 + $0x50] sm:$0xff] %v3154_v1 }
 0xe36   : > { %3171 = vst [vmem:[%s5465_s8 + $0x58] sm:$0xff] %v3155_v11 }
 0xe3a   : > { %v3125_v31 = vpop.permute.xlu1 %3124 }
 0xe3b   : > { %v3152_v41 = vmul.f32 %v3125_v31, %v5234_v49  ;;  %v3153_v29 = vmul.f32 %v3125_v31, %v5236_v7  ;;  %v3143_v4 = vpop.permute.xlu0 %3142 }
 0xe3c   : > { %v3158_v62 = vmul.f32 %v3143_v4, %v5344_v54  ;;  %v3159_v26 = vmul.f32 %v3143_v4, %v5346_v6 }
 0xe3d   : > { %3168 = vst [vmem:[%s5465_s8 + $0x40] sm:$0xff] %v3152_v41 }
 0xe3e   : > { %3169 = vst [vmem:[%s5465_s8 + $0x48] sm:$0xff] %v3153_v29 }
 0xe3f   : > { %3174 = vst [vmem:[%s5465_s8 + $0x70] sm:$0xff] %v3158_v62 }
 0xe40   : > { %3175 = vst [vmem:[%s5465_s8 + $0x78] sm:$0xff] %v3159_v26 }
 0xe4a   : > { %v3137_v9 = vpop.permute.xlu1 %3136 }
 0xe4b   : > { %v3156_v42 = vmul.f32 %v3137_v9, %v5340_v15  ;;  %v3157_v48 = vmul.f32 %v3137_v9, %v5342_v44 }
 0xe4d   : > { %3172 = vst [vmem:[%s5465_s8 + $0x60] sm:$0xff] %v3156_v42 }
 0xe4e   : > { %3173 = vst [vmem:[%s5465_s8 + $0x68] sm:$0xff] %v3157_v48 }
 0xe4f PF: > { %s5658_s25 = sld [smem:[#allocation2_spill]] }
 0xe55   : > { %s34_s4 = sadd.s32 1, %s5658_s25  }
 0xe56   : > { %p31_p4 = scmp.ge.s32.totalorder %s34_s4, 4  }
 0xe58   :  { %33 = sbr.rel (!%p31_p4) target bundleno = 17 (0x11), region = 174 }

</bundles_post_ra>
